<compile_context>
chip_gen: v7x
topology: tpu7x:2x2x1
jax: 0.10.0
libtpu: 0.0.40
codegen_flags: <defaults>
</compile_context>

<pallas_src>
import jax
import jax.numpy as jnp
from jax import lax
from jax.experimental import pallas as pl
from jax.experimental.pallas import tpu as pltpu


# ---------------------------------------------------------------------------
# Fused DenseBlock kernel (one grid program = one batch element)
# ---------------------------------------------------------------------------
def _make_block_kernel(H, W, c_pad, kmax, pad_max, kernel_sizes, paddings):
    Hp, Wp = H + 2 * pad_max, W + 2 * pad_max
    # If a layer uses fewer taps than kmax*kmax, zero-init the im2col scratch
    # once so stale/uninitialized columns can never poison the (zero-weighted)
    # matmul contraction.  (Not needed when every layer uses kmax taps.)
    needs_col_init = any(k < kmax for k in kernel_sizes)

    def kernel(x_ref, scale_ref, bnb_ref, wmat_ref, cvb_ref, out_ref,
               zpad_ref, col_ref):
        # --- Seed the output channel slab with the raw input features -------
        # (dense-concat slot 0; channels >= C0 arrive zero-padded). Lane-dense.
        out_ref[...] = x_ref[...]

        # --- Zero ONLY the halo border of the padded scratch (once per
        # program; the interior is fully overwritten by every layer). --------
        if pad_max > 0:
            zpad_ref[:pad_max, :, :] = jnp.zeros((pad_max, Wp, c_pad), jnp.float32)
            zpad_ref[pad_max + H:, :, :] = jnp.zeros((pad_max, Wp, c_pad), jnp.float32)
            zpad_ref[pad_max:pad_max + H, :pad_max, :] = jnp.zeros(
                (H, pad_max, c_pad), jnp.float32)
            zpad_ref[pad_max:pad_max + H, pad_max + W:, :] = jnp.zeros(
                (H, pad_max, c_pad), jnp.float32)

        if needs_col_init:
            col_ref[...] = jnp.zeros_like(col_ref)

        # --- Layers, fully fused (static Python loop: traced once) ----------
        for l, (k, p) in enumerate(zip(kernel_sizes, paddings)):
            # Folded-BN + ReLU over the full 128-wide slab. Channels beyond
            # this layer's Cin have scale = bias = 0  =>  exact zeros, so the
            # zero-weighted matmul columns stay exact zeros too.
            z = jnp.maximum(out_ref[0] * scale_ref[l] + bnb_ref[l], 0.0)
            # Write activated features into the interior of the padded buffer
            # (padding happens AFTER the activation, like Conv2d zero padding).
            zpad_ref[pad_max:pad_max + H, pad_max:pad_max + W, :] = z

            # im2col: each of the k*k taps lands at a 128-aligned, lane-dense
            # column block of the (H*W, kmax*kmax*C_PAD) scratch.  All tap
            # offsets are static Python ints (fully unrolled, aligned stores).
            for t in range(k * k):
                dy, dx = divmod(t, k)
                hs = pad_max - p + dy
                ws = pad_max - p + dx
                col_ref[:, t * c_pad:(t + 1) * c_pad] = (
                    zpad_ref[hs:hs + H, ws:ws + W, :].reshape(H * W, c_pad))

            # ONE MXU matmul per layer: (H*W, kk*C_PAD) @ (kk*C_PAD, C_PAD).
            y = jnp.dot(col_ref[...], wmat_ref[l],
                        preferred_element_type=jnp.float32)

            # Conv bias + dense concatenation: weights/bias only target this
            # layer's output-channel slice and the slab is still zero there,
            # so a full-width (lane-dense) add is exact.
            out_ref[0] = out_ref[0] + y.reshape(H, W, c_pad) + cvb_ref[l]

    return kernel


# ---------------------------------------------------------------------------
# Parameter init (deterministic, synthetic) + packing into padded slabs
# ---------------------------------------------------------------------------
def init_dense_block_params(key, input_channels, growth_rates, kernel_sizes):
    params = []
    c = input_channels
    eps = 1e-5
    for gr, ks in zip(growth_rates, kernel_sizes):
        cin = c
        key, k1, k2, k3, k4, k5, k6 = jax.random.split(key, 7)
        gamma = jax.random.uniform(k1, (cin,), minval=0.5, maxval=1.5)
        beta = jax.random.normal(k2, (cin,)) * 0.1
        rmean = jax.random.normal(k3, (cin,)) * 0.1
        rvar = jax.random.uniform(k4, (cin,), minval=0.5, maxval=1.5)
        w = jax.random.normal(k5, (ks, ks, cin, gr)) * 0.1    # HWIO
        b = jax.random.normal(k6, (gr,)) * 0.1
        scale = gamma / jnp.sqrt(rvar + eps)          # fold BN running stats
        bias = beta - rmean * scale
        params.append(dict(scale=scale, bias=bias, w=w, b=b))
        c += gr
    return params


def _pack_params(params, input_channels, c_pad, kmax):
    """Stack per-layer params into lane-padded slabs for the fused kernel."""
    L = len(params)
    scale_p = jnp.zeros((L, 1, 1, c_pad), jnp.float32)
    bnb_p = jnp.zeros((L, 1, 1, c_pad), jnp.float32)
    wmat_p = jnp.zeros((L, kmax * kmax, c_pad, c_pad), jnp.float32)
    cvb_p = jnp.zeros((L, 1, 1, c_pad), jnp.float32)
    cin = input_channels                       # == this layer's channel offset
    for l, prm in enumerate(params):
        k = int(prm["w"].shape[0])
        gr = int(prm["w"].shape[-1])
        scale_p = scale_p.at[l, 0, 0, :cin].set(prm["scale"].astype(jnp.float32))
        bnb_p = bnb_p.at[l, 0, 0, :cin].set(prm["bias"].astype(jnp.float32))
        # wmat[l, tap, ci, cin+co] = w[dy, dx, ci, co] -> output lanes land
        # directly at this layer's slice of the channel slab.
        wmat_p = wmat_p.at[l, :k * k, :cin, cin:cin + gr].set(
            prm["w"].reshape(k * k, cin, gr).astype(jnp.float32))
        cvb_p = cvb_p.at[l, 0, 0, cin:cin + gr].set(prm["b"].astype(jnp.float32))
        cin += gr
    wmat_p = wmat_p.reshape(L, kmax * kmax * c_pad, c_pad)
    return scale_p, bnb_p, wmat_p, cvb_p


# ---------------------------------------------------------------------------
# Public forward (NCHW API, like the PyTorch module)
# ---------------------------------------------------------------------------
def dense_block_forward(x_nchw, params, paddings):
    N, c0, H, W = x_nchw.shape
    L = len(params)
    kernel_sizes = [int(p["w"].shape[0]) for p in params]
    growth_rates = [int(p["w"].shape[-1]) for p in params]
    for k, p in zip(kernel_sizes, paddings):
        # Dense concatenation requires "same" convs (as the PyTorch module does
        # implicitly, otherwise torch.cat would fail on spatial mismatch).
        assert k % 2 == 1 and p == (k - 1) // 2, "need 'same' convolutions"

    c_total = c0 + sum(growth_rates)
    C_PAD = max(128, -(-c_total // 128) * 128)      # lane-dense channel slab
    KMAX = max(kernel_sizes)
    PADMAX = max(paddings)

    # NCHW -> NHWC, pad channels to the 128-lane slab width.
    x = jnp.transpose(x_nchw, (0, 2, 3, 1)).astype(jnp.float32)
    x = jnp.pad(x, ((0, 0), (0, 0), (0, 0), (0, C_PAD - c0)))

    scale_p, bnb_p, wmat_p, cvb_p = _pack_params(params, c0, C_PAD, KMAX)

    kernel = _make_block_kernel(H, W, C_PAD, KMAX, PADMAX,
                                kernel_sizes, list(paddings))

    out_slab = pl.pallas_call(
        kernel,
        out_shape=jax.ShapeDtypeStruct((N, H, W, C_PAD), jnp.float32),
        grid_spec=pltpu.PrefetchScalarGridSpec(
            num_scalar_prefetch=0,
            grid=(N,),                               # one program per batch elem
            in_specs=[
                pl.BlockSpec((1, H, W, C_PAD), lambda n: (n, 0, 0, 0)),
                # Constant index_maps: parameter slabs are DMA'd once and stay
                # VMEM-resident across all grid steps.
                pl.BlockSpec((L, 1, 1, C_PAD), lambda n: (0, 0, 0, 0)),
                pl.BlockSpec((L, 1, 1, C_PAD), lambda n: (0, 0, 0, 0)),
                pl.BlockSpec((L, KMAX * KMAX * C_PAD, C_PAD),
                             lambda n: (0, 0, 0)),
                pl.BlockSpec((L, 1, 1, C_PAD), lambda n: (0, 0, 0, 0)),
            ],
            out_specs=pl.BlockSpec((1, H, W, C_PAD), lambda n: (n, 0, 0, 0)),
            scratch_shapes=[
                pltpu.VMEM((H + 2 * PADMAX, W + 2 * PADMAX, C_PAD), jnp.float32),
                pltpu.VMEM((H * W, KMAX * KMAX * C_PAD), jnp.float32),
            ],
        ),
        compiler_params=pltpu.CompilerParams(
            dimension_semantics=("parallel",),       # megacore sharding on v7x
            vmem_limit_bytes=32 * 1024 * 1024,       # ~4 MiB needed; safe on v7x
        ),
    )(x, scale_p, bnb_p, wmat_p, cvb_p)

    # TODO(synk): add H-row spatial tiling (with compounded halos) for large
    # feature maps; at these shapes one (H, W) block per program fits VMEM.
    out = out_slab[..., :c_total]                    # drop lane padding
    return jnp.transpose(out, (0, 3, 1, 2))          # NHWC -> NCHW


# ---------------------------------------------------------------------------
# Pure-JAX reference (for correctness check)
# ---------------------------------------------------------------------------
def dense_block_reference(x_nchw, params, paddings):
    x = jnp.transpose(x_nchw, (0, 2, 3, 1)).astype(jnp.float32)
    feats = [x]
    for p, pad in zip(params, paddings):
        cur = jnp.concatenate(feats, axis=-1)
        z = jnp.maximum(cur * p["scale"] + p["bias"], 0.0)
        y = lax.conv_general_dilated(
            z, p["w"], window_strides=(1, 1),
            padding=((pad, pad), (pad, pad)),
            dimension_numbers=("NHWC", "HWIO", "NHWC"),
        ) + p["b"]
        feats.append(y)
    out = jnp.concatenate(feats, axis=-1)
    return jnp.transpose(out, (0, 3, 1, 2))


# ---------------------------------------------------------------------------
if __name__ == "__main__":
    # DenseBlock config (matches the PyTorch __init__ arguments):
    input_channels = 4
    growth_rates = [4, 4]
    kernel_sizes = [3, 3]
    paddings = [1, 1]
    padding_modes = ["zeros", "zeros"]        # zero padding
    # activations = [nn.ReLU, nn.ReLU]; dropouts = [0.0, 0.0]  (eval mode)

    key = jax.random.PRNGKey(0)
    kx, kp = jax.random.split(key)
    x = jax.random.normal(kx, (2, input_channels, 16, 16), dtype=jnp.float32)  # NCHW

    params = init_dense_block_params(kp, input_channels, growth_rates, kernel_sizes)

    out = dense_block_forward(x, params, paddings)
    out = jax.block_until_ready(out)

    ref = jax.block_until_ready(dense_block_reference(x, params, paddings))

    assert out.shape == (2, input_channels + sum(growth_rates), 16, 16), out.shape
    err = float(jnp.abs(out - ref).max())
    assert jnp.allclose(out, ref, atol=1e-4, rtol=1e-4), err

    print("KERNEL_OK")
</pallas_src>

<mosaic_0001>
module attributes {stable_mosaic.version = 11 : i64} {
  func.func @kernel(%arg0: i32, %arg1: memref<1x16x16x128xf32, #tpu.memory_space<vmem>>, %arg2: memref<2x1x1x128xf32, #tpu.memory_space<vmem>>, %arg3: memref<2x1x1x128xf32, #tpu.memory_space<vmem>>, %arg4: memref<2x1152x128xf32, #tpu.memory_space<vmem>>, %arg5: memref<2x1x1x128xf32, #tpu.memory_space<vmem>>, %arg6: memref<1x16x16x128xf32, #tpu.memory_space<vmem>>, %arg7: memref<18x18x128xf32, #tpu.memory_space<vmem>>, %arg8: memref<256x1152xf32, #tpu.memory_space<vmem>>) attributes {dimension_semantics = [#tpu.dimension_semantics<parallel>], iteration_bounds = array<i64: 2>, scalar_prefetch = 0 : i64, scratch_operands = 2 : i64, tpu.core_type = #tpu.core_type<tc>, window_params = [{transform_indices = @transform_0, window_bounds = array<i64: 1, 16, 16, 128>}, {pipeline_mode = #tpu.pipeline_mode<synchronous>, transform_indices = @transform_1, window_bounds = array<i64: 2, 1, 1, 128>}, {pipeline_mode = #tpu.pipeline_mode<synchronous>, transform_indices = @transform_2, window_bounds = array<i64: 2, 1, 1, 128>}, {pipeline_mode = #tpu.pipeline_mode<synchronous>, transform_indices = @transform_3, window_bounds = array<i64: 2, 1152, 128>}, {pipeline_mode = #tpu.pipeline_mode<synchronous>, transform_indices = @transform_4, window_bounds = array<i64: 2, 1, 1, 128>}, {transform_indices = @transform_5, window_bounds = array<i64: 1, 16, 16, 128>}]} {
    %c0 = arith.constant 0 : index
    %c0_0 = arith.constant 0 : index
    %c0_1 = arith.constant 0 : index
    %c0_2 = arith.constant 0 : index
    %0 = vector.load %arg1[%c0, %c0_0, %c0_1, %c0_2] : memref<1x16x16x128xf32, #tpu.memory_space<vmem>>, vector<1x16x16x128xf32>
    %c0_3 = arith.constant 0 : index
    %c0_4 = arith.constant 0 : index
    %c0_5 = arith.constant 0 : index
    %c0_6 = arith.constant 0 : index
    %1 = vector.load %arg6[%c0_3, %c0_4, %c0_5, %c0_6] : memref<1x16x16x128xf32, #tpu.memory_space<vmem>>, vector<1x16x16x128xf32>
    tpu.vector_store %arg6[%c0_3, %c0_4, %c0_5, %c0_6], %0 {strides = array<i32>} : memref<1x16x16x128xf32, #tpu.memory_space<vmem>>, vector<1x16x16x128xf32>,
    %cst = arith.constant 0.000000e+00 : f32
    %2 = vector.broadcast %cst : f32 to vector<1x18x128xf32>
    %c0_7 = arith.constant 0 : index
    %c0_8 = arith.constant 0 : index
    %c0_9 = arith.constant 0 : index
    %3 = vector.load %arg7[%c0_7, %c0_8, %c0_9] : memref<18x18x128xf32, #tpu.memory_space<vmem>>, vector<1x18x128xf32>
    tpu.vector_store %arg7[%c0_7, %c0_8, %c0_9], %2 {strides = array<i32>} : memref<18x18x128xf32, #tpu.memory_space<vmem>>, vector<1x18x128xf32>,
    %cst_10 = arith.constant 0.000000e+00 : f32
    %4 = vector.broadcast %cst_10 : f32 to vector<1x18x128xf32>
    %c17 = arith.constant 17 : index
    %c0_11 = arith.constant 0 : index
    %c0_12 = arith.constant 0 : index
    %5 = vector.load %arg7[%c17, %c0_11, %c0_12] : memref<18x18x128xf32, #tpu.memory_space<vmem>>, vector<1x18x128xf32>
    tpu.vector_store %arg7[%c17, %c0_11, %c0_12], %4 {strides = array<i32>} : memref<18x18x128xf32, #tpu.memory_space<vmem>>, vector<1x18x128xf32>,
    %cst_13 = arith.constant 0.000000e+00 : f32
    %6 = vector.broadcast %cst_13 : f32 to vector<16x1x128xf32>
    %c1 = arith.constant 1 : index
    %c0_14 = arith.constant 0 : index
    %c0_15 = arith.constant 0 : index
    %7 = vector.load %arg7[%c1, %c0_14, %c0_15] : memref<18x18x128xf32, #tpu.memory_space<vmem>>, vector<16x1x128xf32>
    tpu.vector_store %arg7[%c1, %c0_14, %c0_15], %6 {strides = array<i32>} : memref<18x18x128xf32, #tpu.memory_space<vmem>>, vector<16x1x128xf32>,
    %cst_16 = arith.constant 0.000000e+00 : f32
    %8 = vector.broadcast %cst_16 : f32 to vector<16x1x128xf32>
    %c1_17 = arith.constant 1 : index
    %c17_18 = arith.constant 17 : index
    %c0_19 = arith.constant 0 : index
    %9 = vector.load %arg7[%c1_17, %c17_18, %c0_19] : memref<18x18x128xf32, #tpu.memory_space<vmem>>, vector<16x1x128xf32>
    tpu.vector_store %arg7[%c1_17, %c17_18, %c0_19], %8 {strides = array<i32>} : memref<18x18x128xf32, #tpu.memory_space<vmem>>, vector<16x1x128xf32>,
    %c0_20 = arith.constant 0 : index
    %c0_21 = arith.constant 0 : index
    %c0_22 = arith.constant 0 : index
    %c0_23 = arith.constant 0 : index
    %10 = vector.load %arg6[%c0_20, %c0_21, %c0_22, %c0_23] : memref<1x16x16x128xf32, #tpu.memory_space<vmem>>, vector<1x16x16x128xf32>
    %11 = vector.shape_cast %10 : vector<1x16x16x128xf32> to vector<16x16x128xf32>
    %c0_24 = arith.constant 0 : index
    %c0_25 = arith.constant 0 : index
    %c0_26 = arith.constant 0 : index
    %c0_27 = arith.constant 0 : index
    %12 = vector.load %arg2[%c0_24, %c0_25, %c0_26, %c0_27] : memref<2x1x1x128xf32, #tpu.memory_space<vmem>>, vector<1x1x1x128xf32>
    %13 = vector.shape_cast %12 : vector<1x1x1x128xf32> to vector<1x1x128xf32>
    %14 = vector.broadcast %13 : vector<1x1x128xf32> to vector<16x16x128xf32>
    %15 = arith.mulf %11, %14 : vector<16x16x128xf32>
    %c0_28 = arith.constant 0 : index
    %c0_29 = arith.constant 0 : index
    %c0_30 = arith.constant 0 : index
    %c0_31 = arith.constant 0 : index
    %16 = vector.load %arg3[%c0_28, %c0_29, %c0_30, %c0_31] : memref<2x1x1x128xf32, #tpu.memory_space<vmem>>, vector<1x1x1x128xf32>
    %17 = vector.shape_cast %16 : vector<1x1x1x128xf32> to vector<1x1x128xf32>
    %18 = vector.broadcast %17 : vector<1x1x128xf32> to vector<16x16x128xf32>
    %19 = arith.addf %15, %18 : vector<16x16x128xf32>
    %cst_32 = arith.constant 0.000000e+00 : f32
    %20 = vector.broadcast %cst_32 : f32 to vector<16x16x128xf32>
    %21 = arith.maximumf %19, %20 : vector<16x16x128xf32>
    %c1_33 = arith.constant 1 : index
    %c1_34 = arith.constant 1 : index
    %c0_35 = arith.constant 0 : index
    %22 = vector.load %arg7[%c1_33, %c1_34, %c0_35] : memref<18x18x128xf32, #tpu.memory_space<vmem>>, vector<16x16x128xf32>
    tpu.vector_store %arg7[%c1_33, %c1_34, %c0_35], %21 {strides = array<i32>} : memref<18x18x128xf32, #tpu.memory_space<vmem>>, vector<16x16x128xf32>,
    %c0_36 = arith.constant 0 : index
    %c0_37 = arith.constant 0 : index
    %c0_38 = arith.constant 0 : index
    %23 = vector.load %arg7[%c0_36, %c0_37, %c0_38] : memref<18x18x128xf32, #tpu.memory_space<vmem>>, vector<16x16x128xf32>
    %24 = vector.shape_cast %23 : vector<16x16x128xf32> to vector<256x128xf32>
    %c0_39 = arith.constant 0 : index
    %c0_40 = arith.constant 0 : index
    %25 = vector.load %arg8[%c0_39, %c0_40] : memref<256x1152xf32, #tpu.memory_space<vmem>>, vector<256x128xf32>
    tpu.vector_store %arg8[%c0_39, %c0_40], %24 {strides = array<i32>} : memref<256x1152xf32, #tpu.memory_space<vmem>>, vector<256x128xf32>,
    %c0_41 = arith.constant 0 : index
    %c1_42 = arith.constant 1 : index
    %c0_43 = arith.constant 0 : index
    %26 = vector.load %arg7[%c0_41, %c1_42, %c0_43] : memref<18x18x128xf32, #tpu.memory_space<vmem>>, vector<16x16x128xf32>
    %27 = vector.shape_cast %26 : vector<16x16x128xf32> to vector<256x128xf32>
    %c0_44 = arith.constant 0 : index
    %c128 = arith.constant 128 : index
    %28 = vector.load %arg8[%c0_44, %c128] : memref<256x1152xf32, #tpu.memory_space<vmem>>, vector<256x128xf32>
    tpu.vector_store %arg8[%c0_44, %c128], %27 {strides = array<i32>} : memref<256x1152xf32, #tpu.memory_space<vmem>>, vector<256x128xf32>,
    %c0_45 = arith.constant 0 : index
    %c2 = arith.constant 2 : index
    %c0_46 = arith.constant 0 : index
    %29 = vector.load %arg7[%c0_45, %c2, %c0_46] : memref<18x18x128xf32, #tpu.memory_space<vmem>>, vector<16x16x128xf32>
    %30 = vector.shape_cast %29 : vector<16x16x128xf32> to vector<256x128xf32>
    %c0_47 = arith.constant 0 : index
    %c256 = arith.constant 256 : index
    %31 = vector.load %arg8[%c0_47, %c256] : memref<256x1152xf32, #tpu.memory_space<vmem>>, vector<256x128xf32>
    tpu.vector_store %arg8[%c0_47, %c256], %30 {strides = array<i32>} : memref<256x1152xf32, #tpu.memory_space<vmem>>, vector<256x128xf32>,
    %c1_48 = arith.constant 1 : index
    %c0_49 = arith.constant 0 : index
    %c0_50 = arith.constant 0 : index
    %32 = vector.load %arg7[%c1_48, %c0_49, %c0_50] : memref<18x18x128xf32, #tpu.memory_space<vmem>>, vector<16x16x128xf32>
    %33 = vector.shape_cast %32 : vector<16x16x128xf32> to vector<256x128xf32>
    %c0_51 = arith.constant 0 : index
    %c384 = arith.constant 384 : index
    %34 = vector.load %arg8[%c0_51, %c384] : memref<256x1152xf32, #tpu.memory_space<vmem>>, vector<256x128xf32>
    tpu.vector_store %arg8[%c0_51, %c384], %33 {strides = array<i32>} : memref<256x1152xf32, #tpu.memory_space<vmem>>, vector<256x128xf32>,
    %c1_52 = arith.constant 1 : index
    %c1_53 = arith.constant 1 : index
    %c0_54 = arith.constant 0 : index
    %35 = vector.load %arg7[%c1_52, %c1_53, %c0_54] : memref<18x18x128xf32, #tpu.memory_space<vmem>>, vector<16x16x128xf32>
    %36 = vector.shape_cast %35 : vector<16x16x128xf32> to vector<256x128xf32>
    %c0_55 = arith.constant 0 : index
    %c512 = arith.constant 512 : index
    %37 = vector.load %arg8[%c0_55, %c512] : memref<256x1152xf32, #tpu.memory_space<vmem>>, vector<256x128xf32>
    tpu.vector_store %arg8[%c0_55, %c512], %36 {strides = array<i32>} : memref<256x1152xf32, #tpu.memory_space<vmem>>, vector<256x128xf32>,
    %c1_56 = arith.constant 1 : index
    %c2_57 = arith.constant 2 : index
    %c0_58 = arith.constant 0 : index
    %38 = vector.load %arg7[%c1_56, %c2_57, %c0_58] : memref<18x18x128xf32, #tpu.memory_space<vmem>>, vector<16x16x128xf32>
    %39 = vector.shape_cast %38 : vector<16x16x128xf32> to vector<256x128xf32>
    %c0_59 = arith.constant 0 : index
    %c640 = arith.constant 640 : index
    %40 = vector.load %arg8[%c0_59, %c640] : memref<256x1152xf32, #tpu.memory_space<vmem>>, vector<256x128xf32>
    tpu.vector_store %arg8[%c0_59, %c640], %39 {strides = array<i32>} : memref<256x1152xf32, #tpu.memory_space<vmem>>, vector<256x128xf32>,
    %c2_60 = arith.constant 2 : index
    %c0_61 = arith.constant 0 : index
    %c0_62 = arith.constant 0 : index
    %41 = vector.load %arg7[%c2_60, %c0_61, %c0_62] : memref<18x18x128xf32, #tpu.memory_space<vmem>>, vector<16x16x128xf32>
    %42 = vector.shape_cast %41 : vector<16x16x128xf32> to vector<256x128xf32>
    %c0_63 = arith.constant 0 : index
    %c768 = arith.constant 768 : index
    %43 = vector.load %arg8[%c0_63, %c768] : memref<256x1152xf32, #tpu.memory_space<vmem>>, vector<256x128xf32>
    tpu.vector_store %arg8[%c0_63, %c768], %42 {strides = array<i32>} : memref<256x1152xf32, #tpu.memory_space<vmem>>, vector<256x128xf32>,
    %c2_64 = arith.constant 2 : index
    %c1_65 = arith.constant 1 : index
    %c0_66 = arith.constant 0 : index
    %44 = vector.load %arg7[%c2_64, %c1_65, %c0_66] : memref<18x18x128xf32, #tpu.memory_space<vmem>>, vector<16x16x128xf32>
    %45 = vector.shape_cast %44 : vector<16x16x128xf32> to vector<256x128xf32>
    %c0_67 = arith.constant 0 : index
    %c896 = arith.constant 896 : index
    %46 = vector.load %arg8[%c0_67, %c896] : memref<256x1152xf32, #tpu.memory_space<vmem>>, vector<256x128xf32>
    tpu.vector_store %arg8[%c0_67, %c896], %45 {strides = array<i32>} : memref<256x1152xf32, #tpu.memory_space<vmem>>, vector<256x128xf32>,
    %c2_68 = arith.constant 2 : index
    %c2_69 = arith.constant 2 : index
    %c0_70 = arith.constant 0 : index
    %47 = vector.load %arg7[%c2_68, %c2_69, %c0_70] : memref<18x18x128xf32, #tpu.memory_space<vmem>>, vector<16x16x128xf32>
    %48 = vector.shape_cast %47 : vector<16x16x128xf32> to vector<256x128xf32>
    %c0_71 = arith.constant 0 : index
    %c1024 = arith.constant 1024 : index
    %49 = vector.load %arg8[%c0_71, %c1024] : memref<256x1152xf32, #tpu.memory_space<vmem>>, vector<256x128xf32>
    tpu.vector_store %arg8[%c0_71, %c1024], %48 {strides = array<i32>} : memref<256x1152xf32, #tpu.memory_space<vmem>>, vector<256x128xf32>,
    %c0_72 = arith.constant 0 : index
    %c0_73 = arith.constant 0 : index
    %50 = vector.load %arg8[%c0_72, %c0_73] : memref<256x1152xf32, #tpu.memory_space<vmem>>, vector<256x1152xf32>
    %c0_74 = arith.constant 0 : index
    %c0_75 = arith.constant 0 : index
    %c0_76 = arith.constant 0 : index
    %51 = vector.load %arg4[%c0_74, %c0_75, %c0_76] : memref<2x1152x128xf32, #tpu.memory_space<vmem>>, vector<1x1152x128xf32>
    %52 = vector.shape_cast %51 : vector<1x1152x128xf32> to vector<1152x128xf32>
    %cst_77 = arith.constant dense<0.000000e+00> : vector<256x128xf32>
    %53 = tpu.matmul %50, %52, %cst_77 {dimension_numbers = #tpu.dot_dimension_numbers<[1], [0], [0], [1], [0, 0, 1, 1], [], []>} : vector<256x1152xf32>, vector<1152x128xf32>, vector<256x128xf32> -> vector<256x128xf32>
    %c0_78 = arith.constant 0 : index
    %c0_79 = arith.constant 0 : index
    %c0_80 = arith.constant 0 : index
    %c0_81 = arith.constant 0 : index
    %54 = vector.load %arg6[%c0_78, %c0_79, %c0_80, %c0_81] : memref<1x16x16x128xf32, #tpu.memory_space<vmem>>, vector<1x16x16x128xf32>
    %55 = vector.shape_cast %54 : vector<1x16x16x128xf32> to vector<16x16x128xf32>
    %56 = vector.shape_cast %53 : vector<256x128xf32> to vector<16x16x128xf32>
    %57 = arith.addf %55, %56 : vector<16x16x128xf32>
    %c0_82 = arith.constant 0 : index
    %c0_83 = arith.constant 0 : index
    %c0_84 = arith.constant 0 : index
    %c0_85 = arith.constant 0 : index
    %58 = vector.load %arg5[%c0_82, %c0_83, %c0_84, %c0_85] : memref<2x1x1x128xf32, #tpu.memory_space<vmem>>, vector<1x1x1x128xf32>
    %59 = vector.shape_cast %58 : vector<1x1x1x128xf32> to vector<1x1x128xf32>
    %60 = vector.broadcast %59 : vector<1x1x128xf32> to vector<16x16x128xf32>
    %61 = arith.addf %57, %60 : vector<16x16x128xf32>
    %c0_86 = arith.constant 0 : index
    %c0_87 = arith.constant 0 : index
    %c0_88 = arith.constant 0 : index
    %c0_89 = arith.constant 0 : index
    %62 = vector.load %arg6[%c0_86, %c0_87, %c0_88, %c0_89] : memref<1x16x16x128xf32, #tpu.memory_space<vmem>>, vector<1x16x16x128xf32>
    %63 = vector.shape_cast %62 : vector<1x16x16x128xf32> to vector<16x16x128xf32>
    %64 = vector.shape_cast %61 : vector<16x16x128xf32> to vector<1x16x16x128xf32>
    tpu.vector_store %arg6[%c0_86, %c0_87, %c0_88, %c0_89], %64 {strides = array<i32>} : memref<1x16x16x128xf32, #tpu.memory_space<vmem>>, vector<1x16x16x128xf32>,
    %c0_90 = arith.constant 0 : index
    %c0_91 = arith.constant 0 : index
    %c0_92 = arith.constant 0 : index
    %c0_93 = arith.constant 0 : index
    %65 = vector.load %arg6[%c0_90, %c0_91, %c0_92, %c0_93] : memref<1x16x16x128xf32, #tpu.memory_space<vmem>>, vector<1x16x16x128xf32>
    %66 = vector.shape_cast %65 : vector<1x16x16x128xf32> to vector<16x16x128xf32>
    %c1_94 = arith.constant 1 : index
    %c0_95 = arith.constant 0 : index
    %c0_96 = arith.constant 0 : index
    %c0_97 = arith.constant 0 : index
    %67 = vector.load %arg2[%c1_94, %c0_95, %c0_96, %c0_97] : memref<2x1x1x128xf32, #tpu.memory_space<vmem>>, vector<1x1x1x128xf32>
    %68 = vector.shape_cast %67 : vector<1x1x1x128xf32> to vector<1x1x128xf32>
    %69 = vector.broadcast %68 : vector<1x1x128xf32> to vector<16x16x128xf32>
    %70 = arith.mulf %66, %69 : vector<16x16x128xf32>
    %c1_98 = arith.constant 1 : index
    %c0_99 = arith.constant 0 : index
    %c0_100 = arith.constant 0 : index
    %c0_101 = arith.constant 0 : index
    %71 = vector.load %arg3[%c1_98, %c0_99, %c0_100, %c0_101] : memref<2x1x1x128xf32, #tpu.memory_space<vmem>>, vector<1x1x1x128xf32>
    %72 = vector.shape_cast %71 : vector<1x1x1x128xf32> to vector<1x1x128xf32>
    %73 = vector.broadcast %72 : vector<1x1x128xf32> to vector<16x16x128xf32>
    %74 = arith.addf %70, %73 : vector<16x16x128xf32>
    %cst_102 = arith.constant 0.000000e+00 : f32
    %75 = vector.broadcast %cst_102 : f32 to vector<16x16x128xf32>
    %76 = arith.maximumf %74, %75 : vector<16x16x128xf32>
    %c1_103 = arith.constant 1 : index
    %c1_104 = arith.constant 1 : index
    %c0_105 = arith.constant 0 : index
    %77 = vector.load %arg7[%c1_103, %c1_104, %c0_105] : memref<18x18x128xf32, #tpu.memory_space<vmem>>, vector<16x16x128xf32>
    tpu.vector_store %arg7[%c1_103, %c1_104, %c0_105], %76 {strides = array<i32>} : memref<18x18x128xf32, #tpu.memory_space<vmem>>, vector<16x16x128xf32>,
    %c0_106 = arith.constant 0 : index
    %c0_107 = arith.constant 0 : index
    %c0_108 = arith.constant 0 : index
    %78 = vector.load %arg7[%c0_106, %c0_107, %c0_108] : memref<18x18x128xf32, #tpu.memory_space<vmem>>, vector<16x16x128xf32>
    %79 = vector.shape_cast %78 : vector<16x16x128xf32> to vector<256x128xf32>
    %c0_109 = arith.constant 0 : index
    %c0_110 = arith.constant 0 : index
    %80 = vector.load %arg8[%c0_109, %c0_110] : memref<256x1152xf32, #tpu.memory_space<vmem>>, vector<256x128xf32>
    tpu.vector_store %arg8[%c0_109, %c0_110], %79 {strides = array<i32>} : memref<256x1152xf32, #tpu.memory_space<vmem>>, vector<256x128xf32>,
    %c0_111 = arith.constant 0 : index
    %c1_112 = arith.constant 1 : index
    %c0_113 = arith.constant 0 : index
    %81 = vector.load %arg7[%c0_111, %c1_112, %c0_113] : memref<18x18x128xf32, #tpu.memory_space<vmem>>, vector<16x16x128xf32>
    %82 = vector.shape_cast %81 : vector<16x16x128xf32> to vector<256x128xf32>
    %c0_114 = arith.constant 0 : index
    %c128_115 = arith.constant 128 : index
    %83 = vector.load %arg8[%c0_114, %c128_115] : memref<256x1152xf32, #tpu.memory_space<vmem>>, vector<256x128xf32>
    tpu.vector_store %arg8[%c0_114, %c128_115], %82 {strides = array<i32>} : memref<256x1152xf32, #tpu.memory_space<vmem>>, vector<256x128xf32>,
    %c0_116 = arith.constant 0 : index
    %c2_117 = arith.constant 2 : index
    %c0_118 = arith.constant 0 : index
    %84 = vector.load %arg7[%c0_116, %c2_117, %c0_118] : memref<18x18x128xf32, #tpu.memory_space<vmem>>, vector<16x16x128xf32>
    %85 = vector.shape_cast %84 : vector<16x16x128xf32> to vector<256x128xf32>
    %c0_119 = arith.constant 0 : index
    %c256_120 = arith.constant 256 : index
    %86 = vector.load %arg8[%c0_119, %c256_120] : memref<256x1152xf32, #tpu.memory_space<vmem>>, vector<256x128xf32>
    tpu.vector_store %arg8[%c0_119, %c256_120], %85 {strides = array<i32>} : memref<256x1152xf32, #tpu.memory_space<vmem>>, vector<256x128xf32>,
    %c1_121 = arith.constant 1 : index
    %c0_122 = arith.constant 0 : index
    %c0_123 = arith.constant 0 : index
    %87 = vector.load %arg7[%c1_121, %c0_122, %c0_123] : memref<18x18x128xf32, #tpu.memory_space<vmem>>, vector<16x16x128xf32>
    %88 = vector.shape_cast %87 : vector<16x16x128xf32> to vector<256x128xf32>
    %c0_124 = arith.constant 0 : index
    %c384_125 = arith.constant 384 : index
    %89 = vector.load %arg8[%c0_124, %c384_125] : memref<256x1152xf32, #tpu.memory_space<vmem>>, vector<256x128xf32>
    tpu.vector_store %arg8[%c0_124, %c384_125], %88 {strides = array<i32>} : memref<256x1152xf32, #tpu.memory_space<vmem>>, vector<256x128xf32>,
    %c1_126 = arith.constant 1 : index
    %c1_127 = arith.constant 1 : index
    %c0_128 = arith.constant 0 : index
    %90 = vector.load %arg7[%c1_126, %c1_127, %c0_128] : memref<18x18x128xf32, #tpu.memory_space<vmem>>, vector<16x16x128xf32>
    %91 = vector.shape_cast %90 : vector<16x16x128xf32> to vector<256x128xf32>
    %c0_129 = arith.constant 0 : index
    %c512_130 = arith.constant 512 : index
    %92 = vector.load %arg8[%c0_129, %c512_130] : memref<256x1152xf32, #tpu.memory_space<vmem>>, vector<256x128xf32>
    tpu.vector_store %arg8[%c0_129, %c512_130], %91 {strides = array<i32>} : memref<256x1152xf32, #tpu.memory_space<vmem>>, vector<256x128xf32>,
    %c1_131 = arith.constant 1 : index
    %c2_132 = arith.constant 2 : index
    %c0_133 = arith.constant 0 : index
    %93 = vector.load %arg7[%c1_131, %c2_132, %c0_133] : memref<18x18x128xf32, #tpu.memory_space<vmem>>, vector<16x16x128xf32>
    %94 = vector.shape_cast %93 : vector<16x16x128xf32> to vector<256x128xf32>
    %c0_134 = arith.constant 0 : index
    %c640_135 = arith.constant 640 : index
    %95 = vector.load %arg8[%c0_134, %c640_135] : memref<256x1152xf32, #tpu.memory_space<vmem>>, vector<256x128xf32>
    tpu.vector_store %arg8[%c0_134, %c640_135], %94 {strides = array<i32>} : memref<256x1152xf32, #tpu.memory_space<vmem>>, vector<256x128xf32>,
    %c2_136 = arith.constant 2 : index
    %c0_137 = arith.constant 0 : index
    %c0_138 = arith.constant 0 : index
    %96 = vector.load %arg7[%c2_136, %c0_137, %c0_138] : memref<18x18x128xf32, #tpu.memory_space<vmem>>, vector<16x16x128xf32>
    %97 = vector.shape_cast %96 : vector<16x16x128xf32> to vector<256x128xf32>
    %c0_139 = arith.constant 0 : index
    %c768_140 = arith.constant 768 : index
    %98 = vector.load %arg8[%c0_139, %c768_140] : memref<256x1152xf32, #tpu.memory_space<vmem>>, vector<256x128xf32>
    tpu.vector_store %arg8[%c0_139, %c768_140], %97 {strides = array<i32>} : memref<256x1152xf32, #tpu.memory_space<vmem>>, vector<256x128xf32>,
    %c2_141 = arith.constant 2 : index
    %c1_142 = arith.constant 1 : index
    %c0_143 = arith.constant 0 : index
    %99 = vector.load %arg7[%c2_141, %c1_142, %c0_143] : memref<18x18x128xf32, #tpu.memory_space<vmem>>, vector<16x16x128xf32>
    %100 = vector.shape_cast %99 : vector<16x16x128xf32> to vector<256x128xf32>
    %c0_144 = arith.constant 0 : index
    %c896_145 = arith.constant 896 : index
    %101 = vector.load %arg8[%c0_144, %c896_145] : memref<256x1152xf32, #tpu.memory_space<vmem>>, vector<256x128xf32>
    tpu.vector_store %arg8[%c0_144, %c896_145], %100 {strides = array<i32>} : memref<256x1152xf32, #tpu.memory_space<vmem>>, vector<256x128xf32>,
    %c2_146 = arith.constant 2 : index
    %c2_147 = arith.constant 2 : index
    %c0_148 = arith.constant 0 : index
    %102 = vector.load %arg7[%c2_146, %c2_147, %c0_148] : memref<18x18x128xf32, #tpu.memory_space<vmem>>, vector<16x16x128xf32>
    %103 = vector.shape_cast %102 : vector<16x16x128xf32> to vector<256x128xf32>
    %c0_149 = arith.constant 0 : index
    %c1024_150 = arith.constant 1024 : index
    %104 = vector.load %arg8[%c0_149, %c1024_150] : memref<256x1152xf32, #tpu.memory_space<vmem>>, vector<256x128xf32>
    tpu.vector_store %arg8[%c0_149, %c1024_150], %103 {strides = array<i32>} : memref<256x1152xf32, #tpu.memory_space<vmem>>, vector<256x128xf32>,
    %c0_151 = arith.constant 0 : index
    %c0_152 = arith.constant 0 : index
    %105 = vector.load %arg8[%c0_151, %c0_152] : memref<256x1152xf32, #tpu.memory_space<vmem>>, vector<256x1152xf32>
    %c1_153 = arith.constant 1 : index
    %c0_154 = arith.constant 0 : index
    %c0_155 = arith.constant 0 : index
    %106 = vector.load %arg4[%c1_153, %c0_154, %c0_155] : memref<2x1152x128xf32, #tpu.memory_space<vmem>>, vector<1x1152x128xf32>
    %107 = vector.shape_cast %106 : vector<1x1152x128xf32> to vector<1152x128xf32>
    %cst_156 = arith.constant dense<0.000000e+00> : vector<256x128xf32>
    %108 = tpu.matmul %105, %107, %cst_156 {dimension_numbers = #tpu.dot_dimension_numbers<[1], [0], [0], [1], [0, 0, 1, 1], [], []>} : vector<256x1152xf32>, vector<1152x128xf32>, vector<256x128xf32> -> vector<256x128xf32>
    %c0_157 = arith.constant 0 : index
    %c0_158 = arith.constant 0 : index
    %c0_159 = arith.constant 0 : index
    %c0_160 = arith.constant 0 : index
    %109 = vector.load %arg6[%c0_157, %c0_158, %c0_159, %c0_160] : memref<1x16x16x128xf32, #tpu.memory_space<vmem>>, vector<1x16x16x128xf32>
    %110 = vector.shape_cast %109 : vector<1x16x16x128xf32> to vector<16x16x128xf32>
    %111 = vector.shape_cast %108 : vector<256x128xf32> to vector<16x16x128xf32>
    %112 = arith.addf %110, %111 : vector<16x16x128xf32>
    %c1_161 = arith.constant 1 : index
    %c0_162 = arith.constant 0 : index
    %c0_163 = arith.constant 0 : index
    %c0_164 = arith.constant 0 : index
    %113 = vector.load %arg5[%c1_161, %c0_162, %c0_163, %c0_164] : memref<2x1x1x128xf32, #tpu.memory_space<vmem>>, vector<1x1x1x128xf32>
    %114 = vector.shape_cast %113 : vector<1x1x1x128xf32> to vector<1x1x128xf32>
    %115 = vector.broadcast %114 : vector<1x1x128xf32> to vector<16x16x128xf32>
    %116 = arith.addf %112, %115 : vector<16x16x128xf32>
    %c0_165 = arith.constant 0 : index
    %c0_166 = arith.constant 0 : index
    %c0_167 = arith.constant 0 : index
    %c0_168 = arith.constant 0 : index
    %117 = vector.load %arg6[%c0_165, %c0_166, %c0_167, %c0_168] : memref<1x16x16x128xf32, #tpu.memory_space<vmem>>, vector<1x16x16x128xf32>
    %118 = vector.shape_cast %117 : vector<1x16x16x128xf32> to vector<16x16x128xf32>
    %119 = vector.shape_cast %116 : vector<16x16x128xf32> to vector<1x16x16x128xf32>
    tpu.vector_store %arg6[%c0_165, %c0_166, %c0_167, %c0_168], %119 {strides = array<i32>} : memref<1x16x16x128xf32, #tpu.memory_space<vmem>>, vector<1x16x16x128xf32>,
    return
  }
  func.func @transform_0(%arg0: i32) -> (i32, i32, i32, i32) {
    %c0_i32 = arith.constant 0 : i32
    %c0_i32_0 = arith.constant 0 : i32
    %c0_i32_1 = arith.constant 0 : i32
    %c0_i32_2 = arith.constant 0 : i32
    return %arg0, %c0_i32, %c0_i32_0, %c0_i32_1 : i32, i32, i32, i32
  }
  func.func @transform_1(%arg0: i32) -> (i32, i32, i32, i32) {
    %c0_i32 = arith.constant 0 : i32
    %c0_i32_0 = arith.constant 0 : i32
    %c0_i32_1 = arith.constant 0 : i32
    %c0_i32_2 = arith.constant 0 : i32
    %c0_i32_3 = arith.constant 0 : i32
    return %c0_i32, %c0_i32_0, %c0_i32_1, %c0_i32_2 : i32, i32, i32, i32
  }
  func.func @transform_2(%arg0: i32) -> (i32, i32, i32, i32) {
    %c0_i32 = arith.constant 0 : i32
    %c0_i32_0 = arith.constant 0 : i32
    %c0_i32_1 = arith.constant 0 : i32
    %c0_i32_2 = arith.constant 0 : i32
    %c0_i32_3 = arith.constant 0 : i32
    return %c0_i32, %c0_i32_0, %c0_i32_1, %c0_i32_2 : i32, i32, i32, i32
  }
  func.func @transform_3(%arg0: i32) -> (i32, i32, i32) {
    %c0_i32 = arith.constant 0 : i32
    %c0_i32_0 = arith.constant 0 : i32
    %c0_i32_1 = arith.constant 0 : i32
    %c0_i32_2 = arith.constant 0 : i32
    return %c0_i32, %c0_i32_0, %c0_i32_1 : i32, i32, i32
  }
  func.func @transform_4(%arg0: i32) -> (i32, i32, i32, i32) {
    %c0_i32 = arith.constant 0 : i32
    %c0_i32_0 = arith.constant 0 : i32
    %c0_i32_1 = arith.constant 0 : i32
    %c0_i32_2 = arith.constant 0 : i32
    %c0_i32_3 = arith.constant 0 : i32
    return %c0_i32, %c0_i32_0, %c0_i32_1, %c0_i32_2 : i32, i32, i32, i32
  }
  func.func @transform_5(%arg0: i32) -> (i32, i32, i32, i32) {
    %c0_i32 = arith.constant 0 : i32
    %c0_i32_0 = arith.constant 0 : i32
    %c0_i32_1 = arith.constant 0 : i32
    %c0_i32_2 = arith.constant 0 : i32
    return %arg0, %c0_i32, %c0_i32_0, %c0_i32_1 : i32, i32, i32, i32
  }
}

</mosaic_0001>

<bundles_post_ra>
// kernel: tpu_custom_call.1
= control target key start
LH: loop header
LB: loop body
LE: loop exit
PB: predicated region body
PF: predicated region fallthrough
CT: control target
= control target key end

     0   :  { %10 = vsyncpa [#allocation5], 0  ;;  %s8980_s0 = inlined_call_operand.hbm [shape: f32[2,16,16,128], index: 0, kind: input, shape index: {}]   ;;  %s8981_s1 = inlined_call_operand.hbm [shape: f32[2,1,1,128], index: 1, kind: input, shape index: {}]   ;;  %s8982_s2 = inlined_call_operand.hbm [shape: f32[2,1,1,128], index: 2, kind: input, shape index: {}]   ;;  %s8983_s3 = inlined_call_operand.hbm [shape: f32[2,1152,128], index: 3, kind: input, shape index: {}]   ;;  %s8984_s4 = inlined_call_operand.hbm [shape: f32[2,1,1,128], index: 4, kind: input, shape index: {}]   ;;  %s8985_s5 = inlined_call_operand.hbm [shape: f32[2,16,16,128], index: 5, kind: output, shape index: {}]  }
   0x1   :  { %12 = vsyncpa [#allocation5 + $0x1], 0 }
   0x2   :  { %13 = vsyncpa [#allocation8], 0 }
   0x3   :  { %14 = vsyncpa [#allocation11], 0 }
   0x4   :  { %15 = vsyncpa [#allocation6], 0 }
   0x5   :  { %17 = vsyncpa [#allocation6 + $0x1], 0  ;;  %s6928_s18 = smov 0   ;;  %s6930_s19 = smov 0  }
   0x6   :  { %s6932_s20 = smov 0   ;;  %s6934_s21 = smov 0  }
   0x7 LB: > { %s6949_s22 = sadd.s32 4294967295, %s6882_s21   ;;  %s5419_s23 = sadd.s32 4294967294, %s6882_s21   ;;  %s6882_s21 = sphi %s6934_s21, %s9088_s21   ;;  %s6878_s20 = sphi %s6932_s20, %s9087_s20   ;;  %s6874_s19 = sphi %s6930_s19, %s9086_s19   ;;  %s6870_s18 = sphi %s6928_s18, %s9085_s18  }
   0x8   : > { %p43_p0 = scmp.ne.s32.totalorder %s6874_s19, %s6870_s18  ;;  %p8986_p1 = scmp.eq.s32.totalorder %s6949_s22, 0 }
   0x9   : > { %p157_p3 = scmp.eq.s32.totalorder %s5419_s23, 1  ;;  %p5420_p5 = scmp.ge.s32.totalorder %s6882_s21, 1 }
   0xa   : > { %p6958_p4 = por %p8986_p1, %p43_p0  ;;  %p164_p7 = scmp.lt.s32.totalorder %s6882_s21, 3 }
   0xb   : > { %p6963_p6 = por %p157_p3, %p43_p0  ;;  %s6884_s27 = smov [#allocation7]  }
   0xc   : > { %s9026_s24 = scalar_select %p6958_p4, 1, 0 }
   0xd   : > { %s9027_s25 = scalar_select %p6963_p6, 1, 0 }
   0xe   : > { %p6968_p8 = pnand %p5420_p5, %p164_p7  ;;  %s176_s28 = sshll.u32 %s6884_s27, 4  ;;  %s6972_s28 = int_to_ptr.vmem [resolvable:$true] %s176_s28 }
   0xf   : > { %s6885_s30 = smov [#allocation10]   ;;  %s6666_s9 = scalar_lea.hbm %s8981_s1, 32 }
  0x10   : > { %s9028_s26 = scalar_select %p6968_p8, 1, 0 }
  0x11   : > { %p6573_p9 = pneg %p6968_p8  ;;  %s202_s6 = sshll.u32 %s6885_s30, 4  ;;  %s6983_s6 = int_to_ptr.vmem [resolvable:$true] %s202_s6 }
  0x12   : > { %p6667_p12 = scmp.ne.s32.totalorder %s8981_s1, %s6666_s9  ;;  %p6673_p5 = scmp.lt.u32.totalorder %s6666_s9, %s8981_s1 }
  0x13   : > { %p6979_p11 = pnand %p6573_p9, %p8986_p1 }
  0x15   : > { %p6993_p13 = pneg %p6979_p11 }
  0x17   : > { %p6669_p0 = pnand %p6993_p13, %p6667_p12 }
  0x19   : > { %p6670_p3 = pneg %p6669_p0 }
  0x1b   : > { %p6675_p7 = pnand %p6673_p5, %p6670_p3 }
  0x1d   : > { %6678 = shalt.err (!%p6675_p7)
}
  0x1e   : > { %s6679_s15 = scalar_lea.vmem %s6972_s28, 32  ;;  %p6687_p2 = scmp.lt.s32.totalorder %s6972_s28, %s6972_s28 }
  0x1f   : > { %p6680_p9 = scmp.ne.s32.totalorder %s6972_s28, %s6679_s15  ;;  %p6688_p6 = scmp.lt.s32.totalorder %s6679_s15, %s6679_s15 }
  0x21   : > { %p6682_p10 = pnand %p6680_p9, %p6993_p13  ;;  %p6689_p12 = por %p6688_p6, %p6687_p2 }
  0x23   : > { %p6683_p1 = pneg %p6682_p10 }
  0x25   : > { %p6690_p0 = pnand %p6689_p12, %p6683_p1 }
  0x27   : > { %6693 = shalt.err (!%p6690_p0)
}
  0x28   : > { %s8987_s16 = smov 16   ;;  %s6887_s17 = smov 1  }
  0x29   : > { %6576 = dma.hbm_to_vmem [thread:$0]  (!%p6979_p11), %s8981_s1, 32, %s6972_s28, [#allocation8], %s8987_s16, %s8987_s16, %s6887_s17  }
  0x2a   : > { %s6694_s8 = scalar_lea.hbm %s8983_s3, 36864 }
  0x2b   : > { %p6695_p1 = scmp.ne.s32.totalorder %s8983_s3, %s6694_s8  ;;  %p6701_p10 = scmp.lt.u32.totalorder %s6694_s8, %s8983_s3 }
  0x2d   : > { %p6697_p2 = pnand %p6695_p1, %p6993_p13 }
  0x2f   : > { %p6698_p6 = pneg %p6697_p2 }
  0x31   : > { %p6703_p3 = pnand %p6701_p10, %p6698_p6 }
  0x33   : > { %6706 = shalt.err (!%p6703_p3)
}
  0x34   : > { %s6707_s28 = scalar_lea.vmem %s6983_s6, 36864  ;;  %p6715_p12 = scmp.lt.s32.totalorder %s6983_s6, %s6983_s6 }
  0x35   : > { %p6708_p5 = scmp.ne.s32.totalorder %s6983_s6, %s6707_s28  ;;  %p6716_p0 = scmp.lt.s32.totalorder %s6707_s28, %s6707_s28 }
  0x37   : > { %p6710_p7 = pnand %p6708_p5, %p6993_p13  ;;  %p6717_p1 = por %p6716_p0, %p6715_p12 }
  0x39   : > { %p6711_p9 = pneg %p6710_p7 }
  0x3b   : > { %p6718_p2 = pnand %p6717_p1, %p6711_p9 }
  0x3d   : > { %6721 = shalt.err (!%p6718_p2)
}
  0x3e   : > { %s6888_s14 = smov 128   ;;  %s6889_s15 = smov 8  }
  0x3f   : > { %6582 = dma.hbm_to_vmem [thread:$0]  (!%p6979_p11), %s8983_s3, 36864, %s6983_s6, [#allocation11], %s6888_s14, %s6888_s14, %s6889_s15  }
  0x40   : > { %s6890_s30 = smov [#allocation9]   ;;  %s6891_s8 = smov [#allocation12]  }
  0x41   : > { %s189_s7 = sshll.u32 %s6890_s30, 4  ;;  %s215_s9 = sshll.u32 %s6891_s8, 4  ;;  %s190_s7 = int_to_ptr.vmem [resolvable:$true] %s189_s7  ;;  %s7043_s9 = int_to_ptr.vmem [resolvable:$true] %s215_s9 }
  0x42   : > { %s6722_s13 = scalar_lea.hbm %s8982_s2, 32 }
  0x43   : > { %p6723_p6 = scmp.ne.s32.totalorder %s8982_s2, %s6722_s13  ;;  %p6729_p5 = scmp.lt.u32.totalorder %s6722_s13, %s8982_s2 }
  0x45   : > { %p6725_p10 = pnand %p6723_p6, %p6993_p13 }
  0x47   : > { %p6726_p3 = pneg %p6725_p10 }
  0x49   : > { %p6731_p7 = pnand %p6729_p5, %p6726_p3 }
  0x4b   : > { %6734 = shalt.err (!%p6731_p7)
}
  0x4c   : > { %s6735_s27 = scalar_lea.vmem %s190_s7, 32  ;;  %p6743_p1 = scmp.lt.s32.totalorder %s190_s7, %s190_s7 }
  0x4d   : > { %p6736_p9 = scmp.ne.s32.totalorder %s190_s7, %s6735_s27  ;;  %p6744_p2 = scmp.lt.s32.totalorder %s6735_s27, %s6735_s27 }
  0x4f   : > { %p6738_p12 = pnand %p6736_p9, %p6993_p13  ;;  %p6745_p4 = por %p6744_p2, %p6743_p1 }
  0x51   : > { %p6739_p0 = pneg %p6738_p12 }
  0x53   : > { %p6746_p8 = pnand %p6745_p4, %p6739_p0 }
  0x55   : > { %6749 = shalt.err (!%p6746_p8)
}
  0x56   : > { %s9031_s16 = smov 16   ;;  %s6750_s13 = scalar_lea.hbm %s8984_s4, 32 }
  0x57   : > { %6579 = dma.hbm_to_vmem [thread:$0]  (!%p6979_p11), %s8982_s2, 32, %s190_s7, [#allocation8], %s9031_s16, %s9031_s16, %s6887_s17  }
  0x58   : > { %p6751_p6 = scmp.ne.s32.totalorder %s8984_s4, %s6750_s13  ;;  %p6757_p10 = scmp.lt.u32.totalorder %s6750_s13, %s8984_s4 }
  0x5a   : > { %p6753_p4 = pnand %p6751_p6, %p6993_p13 }
  0x5c   : > { %p6754_p8 = pneg %p6753_p4 }
  0x5e   : > { %p6759_p3 = pnand %p6757_p10, %p6754_p8 }
  0x60   : > { %6762 = shalt.err (!%p6759_p3)
}
  0x61   : > { %s6763_s7 = scalar_lea.vmem %s7043_s9, 32  ;;  %p6771_p12 = scmp.lt.s32.totalorder %s7043_s9, %s7043_s9 }
  0x62   : > { %p6764_p5 = scmp.ne.s32.totalorder %s7043_s9, %s6763_s7  ;;  %p6772_p0 = scmp.lt.s32.totalorder %s6763_s7, %s6763_s7 }
  0x64   : > { %p6766_p7 = pnand %p6764_p5, %p6993_p13  ;;  %p6773_p1 = por %p6772_p0, %p6771_p12 }
  0x66   : > { %p6767_p9 = pneg %p6766_p7 }
  0x68   : > { %p6774_p2 = pnand %p6773_p1, %p6767_p9 }
  0x6a   : > { %6777 = shalt.err (!%p6774_p2)
}
  0x6b   : > { %6585 = dma.hbm_to_vmem [thread:$0]  (!%p6979_p11), %s8984_s4, 32, %s7043_s9, [#allocation11], %s9031_s16, %s9031_s16, %s6887_s17  }
  0x6c   : > { %s7093_s29 = sadd.s32 1, %s6882_s21   ;;  %s30_s10 = sadd.s32 1, %s6878_s20 }
  0x6d   : > { %s27_s12 = ssub.s32 %s6882_s21, %s7093_s29  ;;  %p37_p6 = scmp.ne.s32.totalorder %s6878_s20, %s6874_s19 }
  0x6e   : > { %p28_p13 = scmp.eq.s32.totalorder %s27_s12, 0  ;;  %p38_p4 = scmp.eq.s32.totalorder %s6882_s21, 0 }
  0x6f   : > { %p9032_p10 = scmp.eq.s32.totalorder %s6949_s22, 1  ;;  %p6598_p5 = scmp.lt.s32.totalorder %s6882_s21, 2 }
  0x70   : > { %s7102_s11 = scalar_select %p28_p13, %s6878_s20, %s30_s10  }
  0x71   : > { %p39_p8 = por %p38_p4, %p37_p6  ;;  %p7106_p3 = por %p9032_p10, %p37_p6 }
  0x72   : > { %s229_s28 = sand.u32 1, %s6878_s20   ;;  %s5447_s17 = sshll.u32 %s6882_s21, 12 }
  0x73   : > { %s5426_s23 = sshll.u32 %s229_s28, 8  ;;  %s7116_s6 = scalar_lea.hbm %s8980_s0, %s5447_s17 }
  0x74   : > { %s233_s27 = scalar_lea.vmem [#allocation4], %s5426_s23  ;;  %p7120_p11 = pnand %p6598_p5, %p39_p8 }
  0x75   : > { %s240_s7 = sshll.u32 %s233_s27, 4  ;;  %s7124_s8 = scalar_lea.sflag [#allocation5], %s229_s28  ;;  %s7118_s7 = int_to_ptr.vmem [resolvable:$true] %s240_s7 }
  0x76   : > { %s6778_s12 = scalar_lea.hbm %s7116_s6, 4096  ;;  %p6780_p9 = pneg %p7120_p11 }
  0x77   : > { %p6779_p7 = scmp.ne.s32.totalorder %s7116_s6, %s6778_s12  ;;  %s6783_s17 = scalar_lea.hbm %s8980_s0, 8192 }
  0x78   : > { %p6784_p1 = scmp.lt.u32.totalorder %s7116_s6, %s8980_s0  ;;  %p6785_p2 = scmp.lt.u32.totalorder %s6783_s17, %s6778_s12 }
  0x79   : > { %p6781_p12 = pnand %p6780_p9, %p6779_p7  ;;  %p6787_p6 = scmp.lt.u32.totalorder %s6778_s12, %s7116_s6 }
  0x7a   : > { %p6786_p13 = por %p6785_p2, %p6784_p1 }
  0x7b   : > { %p6782_p0 = pneg %p6781_p12 }
  0x7c   : > { %p6788_p4 = por %p6787_p6, %p6786_p13 }
  0x7e   : > { %p6789_p8 = pnand %p6788_p4, %p6782_p0 }
  0x80   : > { %6792 = shalt.err (!%p6789_p8)
}
  0x81   : > { %s6793_s28 = scalar_lea.vmem %s7118_s7, 4096  ;;  %s6892_s27 = smov [#allocation4]  }
  0x82   : > { %p6794_p10 = scmp.ne.s32.totalorder %s7118_s7, %s6793_s28  ;;  %s6798_s10 = sshll.u32 %s6892_s27, 4  ;;  %s6799_s10 = int_to_ptr.vmem [resolvable:$false] %s6798_s10 }
  0x83   : > { %s6800_s23 = scalar_lea.vmem %s6799_s10, 8192  ;;  %p6801_p12 = scmp.lt.s32.totalorder %s7118_s7, %s6799_s10 }
  0x84   : > { %p6796_p5 = pnand %p6794_p10, %p6780_p9  ;;  %p6802_p1 = scmp.lt.s32.totalorder %s6800_s23, %s6793_s28 }
  0x86   : > { %p6797_p7 = pneg %p6796_p5  ;;  %p6803_p2 = por %p6802_p1, %p6801_p12 }
  0x88   : > { %p6804_p13 = pnand %p6803_p2, %p6797_p7 }
  0x8a   : > { %6807 = shalt.err (!%p6804_p13)
}
  0x8b   : > { %6589 = dma.hbm_to_vmem [thread:$0]  (!%p7120_p11), %s7116_s6, 4096, %s7118_s7, %s7124_s8, %s6888_s14, %s6888_s14, %s6889_s15  }
  0x8c   : > { %p9035_p9 = scmp.ne.s32.totalorder %s9028_s26, 0 }
  0x8e   : > { %252 = sbr.rel (%p9035_p9) target bundleno = 1594 (0x63a), region = 40 }
  0x95   : > { %s7158_s12 = sand.u32 1, %s6874_s19   ;;  %p9036_p0 = scmp.ne.s32.totalorder %s9026_s24, 0 }
  0x96   : > { %s5430_s17 = sshll.u32 %s7158_s12, 8  ;;  %s255_s9 = scalar_lea.sflag [#allocation5], %s7158_s12 }
  0x97   : > { %s7164_s30 = scalar_lea.vmem [#allocation4], %s5430_s17 }
  0x98   : > { %6853 = dma.done.wait (%p9036_p0), %s255_s9, 4096  }
  0x99   : > { %6855 = vsyncadd (%p9036_p0), %s255_s9, 4294963200  ;;  %p9037_p11 = scmp.eq.s32.totalorder %s6949_s22, 0 }
  0x9b   : > { %6857 = dma.done.wait (%p9037_p11), [#allocation8], 64   ;;  %p9038_p6 = pmov %p9037_p11 }
  0x9d   : > { %6859 = vsyncadd (%p9038_p6), [#allocation8], 4294967232  ;;  %p9039_p4 = pmov %p9038_p6 }
  0x9f   : > { %6861 = dma.done.wait (%p9039_p4), [#allocation11], 36896   ;;  %p9040_p8 = pmov %p9039_p4 }
  0xa0   : > { %v9004_v0 = vmov 0.0|0.0   ;;  %v6894_v1 = vmov 0.0   ;;  %v1444_v2 = vld [vmem:[#allocation10] sm:$0xff]  ;;  %v1445_v3 = vld [vmem:[#allocation10 + $0x8] sm:$0xff]  ;;  %v1446_v4 = vld [vmem:[#allocation10 + $0x10] sm:$0xff]  ;;  %s7227_s24 = scalar_lea.vmem [#allocation13], %s5430_s17 }
  0xa1   : > { %6863 = vsyncadd (%p9040_p8), [#allocation11], 4294930400  ;;  %5705 = vmatprep.subr.bf16.mxu0 %v9004_v0  ;;  %365 = vst [vmem:[#allocation2] sm:$0xff] %v6894_v1  ;;  %v5706_v5 = vpack.c.bf16 %v1445_v3, %v1444_v2  ;;  %v1447_v6 = vld [vmem:[#allocation10 + $0x18] sm:$0xff]  ;;  %v1448_v8 = vld [vmem:[#allocation10 + $0x20] sm:$0xff]  ;;  %s5448_s26 = sshll.u32 %s6949_s22, 12 }
  0xa2   : > { %366 = vst [vmem:[#allocation2 + $0x8] sm:$0xff] %v6894_v1  ;;  %367 = vst [vmem:[#allocation2 + $0x10] sm:$0x3] %v6894_v1  ;;  %v5709_v7 = vpack.c.bf16 %v1447_v6, %v1446_v4  ;;  %v1449_v9 = vld [vmem:[#allocation10 + $0x28] sm:$0xff]  ;;  %v1450_v11 = vld [vmem:[#allocation10 + $0x30] sm:$0xff]  ;;  %s5308_s14 = sshll.u32 %s7227_s24, 4  ;;  %s8931_s7 = scalar_lea.hbm %s8985_s5, %s5448_s26  ;;  %s8933_s14 = int_to_ptr.vmem [resolvable:$true] %s5308_s14 }
  0xa3   : > { %369 = vst [vmem:[#allocation2 + $0x198] sm:$0xff] %v6894_v1  ;;  %370 = vst [vmem:[#allocation2 + $0x1a0] sm:$0xff] %v6894_v1  ;;  %5707 = vmatpush1.bf16.msra.mxu0 %v5706_v5  ;;  %v5712_v10 = vpack.c.bf16 %v1449_v9, %v1448_v8  ;;  %v1451_v12 = vld [vmem:[#allocation10 + $0x38] sm:$0xff]  ;;  %v1452_v15 = vld [vmem:[#allocation10 + $0x40] sm:$0xff]  ;;  %s5295_s22 = scalar_lea.sflag [#allocation6], %s7158_s12  ;;  %s6808_s8 = scalar_lea.vmem %s8933_s14, 4096 }
  0xa4   : > { %371 = vst [vmem:[#allocation2 + $0x1a8] sm:$0x3] %v6894_v1  ;;  %373 = vst [vmem:[#allocation2 + $0x18] sm:$0x1] %v6894_v1  ;;  %5708 = vmatprep.subr.bf16.mxu0 %v9004_v0  ;;  %v5715_v14 = vpack.c.bf16 %v1451_v12, %v1450_v11  ;;  %v1453_v16 = vld [vmem:[#allocation10 + $0x48] sm:$0xff]  ;;  %v301_v17 = vld [vmem:[%s7164_s30] sm:$0xff]  ;;  %p6809_p10 = scmp.ne.s32.totalorder %s8933_s14, %s6808_s8 }
  0xa5   : > { %374 = vst [vmem:[#allocation2 + $0x30] sm:$0x1] %v6894_v1  ;;  %375 = vst [vmem:[#allocation2 + $0x48] sm:$0x1] %v6894_v1  ;;  %v7221_v18 = vld [vmem:[#allocation7] ss:$0 sm:$0xff]  ;;  %v5718_v24 = vpack.c.bf16 %v1453_v16, %v1452_v15 }
  0xa6   : > { %376 = vst [vmem:[#allocation2 + $0x60] sm:$0x1] %v6894_v1  ;;  %377 = vst [vmem:[#allocation2 + $0x78] sm:$0x1] %v6894_v1  ;;  %v7223_v19 = vld [vmem:[#allocation9] ss:$0 sm:$0xff]  ;;  %v444_v20 = vmul.f32 %v7221_v18, %v301_v17  ;;  %p6810_p5 = pnand %p6809_p10, %p7106_p3 }
  0xa7   : > { %378 = vst [vmem:[#allocation2 + $0x90] sm:$0x1] %v6894_v1  ;;  %379 = vst [vmem:[#allocation2 + $0xa8] sm:$0x1] %v6894_v1  ;;  %5710 = vmatpush1.bf16.msra.mxu0 %v5709_v7  ;;  %v302_v21 = vld [vmem:[%s7164_s30 + $0x8] sm:$0xff]  ;;  %v303_v23 = vld [vmem:[%s7164_s30 + $0x10] sm:$0xff] }
  0xa8   : > { %380 = vst [vmem:[#allocation2 + $0xc0] sm:$0x1] %v6894_v1  ;;  %381 = vst [vmem:[#allocation2 + $0xd8] sm:$0x1] %v6894_v1  ;;  %5711 = vmatprep.subr.bf16.mxu0 %v9004_v0  ;;  %v445_v22 = vmul.f32 %v7221_v18, %v302_v21  ;;  %v7235_v25 = vld [vmem:[#allocation10 + $0x50] sm:$0xff]  ;;  %v7238_v26 = vadd.f32 %v7223_v19, %v444_v20  ;;  %v446_v27 = vmul.f32 %v7221_v18, %v303_v23  ;;  %v305_v29 = vld [vmem:[%s7164_s30 + $0x20] sm:$0xff]  ;;  %p6811_p7 = pneg %p6810_p5 }
  0xa9   : > { %382 = vst [vmem:[#allocation2 + $0xf0] sm:$0x1] %v6894_v1  ;;  %383 = vst [vmem:[#allocation2 + $0x108] sm:$0x1] %v6894_v1  ;;  %v643_v13 = vld [vmem:[#allocation2 + $0x1] sm:$0xff]  ;;  %v1455_v30 = vld [vmem:[#allocation10 + $0x58] sm:$0xff]  ;;  %v448_v33 = vmul.f32 %v7221_v18, %v305_v29 }
  0xaa   : > { %384 = vst [vmem:[#allocation2 + $0x120] sm:$0x1] %v6894_v1  ;;  %385 = vst [vmem:[#allocation2 + $0x138] sm:$0x1] %v6894_v1  ;;  %1652 = vmatprep.mubr.f32.mxu0 %v643_v13  ;;  %v304_v28 = vld [vmem:[%s7164_s30 + $0x18] sm:$0xff]  ;;  %v7246_v31 = vadd.f32 %v7223_v19, %v445_v22  ;;  %v306_v34 = vld [vmem:[%s7164_s30 + $0x28] sm:$0xff]  ;;  %v7256_v37 = vadd.f32 %v7223_v19, %v446_v27  ;;  %v5721_v46 = vpack.c.bf16 %v1455_v30, %v7235_v25 }
  0xab   : > { %386 = vst [vmem:[#allocation2 + $0x150] sm:$0x1] %v6894_v1  ;;  %387 = vst [vmem:[#allocation2 + $0x168] sm:$0x1] %v6894_v1  ;;  %5713 = vmatpush1.bf16.msra.mxu0 %v5712_v10  ;;  %v447_v32 = vmul.f32 %v7221_v18, %v304_v28  ;;  %v307_v35 = vld [vmem:[%s7164_s30 + $0x30] sm:$0xff]  ;;  %v515_v36 = vmax.f32 %v7238_v26, 0.0  ;;  %v449_v38 = vmul.f32 %v7221_v18, %v306_v34 }
  0xac   : > { %388 = vst [vmem:[#allocation2 + $0x180] sm:$0x1] %v6894_v1  ;;  %389 = vst [vmem:[#allocation2 + $0x29] sm:$0x1] %v6894_v1  ;;  %5714 = vmatprep.subr.bf16.mxu0 %v9004_v0  ;;  %v308_v39 = vld [vmem:[%s7164_s30 + $0x38] sm:$0xff]  ;;  %v7262_v40 = vld [vmem:[#allocation10 + $0x60] sm:$0xff]  ;;  %v7269_v43 = vadd.f32 %v7223_v19, %v448_v33  ;;  %v450_v44 = vmul.f32 %v7221_v18, %v307_v35 }
  0xad   : > { %390 = vst [vmem:[#allocation2 + $0x41] sm:$0x1] %v6894_v1  ;;  %391 = vst [vmem:[#allocation2 + $0x59] sm:$0x1] %v6894_v1  ;;  %v516_v41 = vmax.f32 %v7246_v31, 0.0  ;;  %v7266_v42 = vadd.f32 %v7223_v19, %v447_v32  ;;  %v309_v45 = vld [vmem:[%s7164_s30 + $0x40] sm:$0xff]  ;;  %v7281_v49 = vadd.f32 %v7223_v19, %v449_v38  ;;  %v451_v50 = vmul.f32 %v7221_v18, %v308_v39 }
  0xae   : > { %392 = vst [vmem:[#allocation2 + $0x71] sm:$0x1] %v6894_v1  ;;  %393 = vst [vmem:[#allocation2 + $0x89] sm:$0x1] %v6894_v1  ;;  %v7275_v47 = vld [vmem:[#allocation10 + $0x68] sm:$0xff]  ;;  %v517_v48 = vmax.f32 %v7256_v37, 0.0  ;;  %v7293_v55 = vadd.f32 %v7223_v19, %v450_v44  ;;  %v452_v56 = vmul.f32 %v7221_v18, %v309_v45 }
  0xaf   : > { %394 = vst [vmem:[#allocation2 + $0xa1] sm:$0x1] %v6894_v1  ;;  %395 = vst [vmem:[#allocation2 + $0xb9] sm:$0x1] %v6894_v1  ;;  %5716 = vmatpush1.bf16.msra.mxu0 %v5715_v14  ;;  %v310_v51 = vld [vmem:[%s7164_s30 + $0x48] sm:$0xff]  ;;  %v311_v52 = vld [vmem:[%s7164_s30 + $0x50] sm:$0xff]  ;;  %v7304_v60 = vadd.f32 %v7223_v19, %v451_v50  ;;  %v5724_v63 = vpack.c.bf16 %v7275_v47, %v7262_v40 }
  0xb0   : > { %396 = vst [vmem:[#allocation2 + $0xd1] sm:$0x1] %v6894_v1  ;;  %397 = vst [vmem:[#allocation2 + $0xe9] sm:$0x1] %v6894_v1  ;;  %5717 = vmatprep.subr.bf16.mxu0 %v9004_v0  ;;  %v518_v53 = vmax.f32 %v7266_v42, 0.0  ;;  %v519_v54 = vmax.f32 %v7269_v43, 0.0  ;;  %v453_v61 = vmul.f32 %v7221_v18, %v310_v51  ;;  %v7320_v4 = vadd.f32 %v7223_v19, %v452_v56 }
  0xb1   : > { %398 = vst [vmem:[#allocation2 + $0x101] sm:$0x1] %v6894_v1  ;;  %399 = vst [vmem:[#allocation2 + $0x119] sm:$0x1] %v6894_v1  ;;  %v312_v57 = vld [vmem:[%s7164_s30 + $0x58] sm:$0xff]  ;;  %v313_v58 = vld [vmem:[%s7164_s30 + $0x60] sm:$0xff]  ;;  %v454_v5 = vmul.f32 %v7221_v18, %v311_v52 }
  0xb2   : > { %400 = vst [vmem:[#allocation2 + $0x131] sm:$0x1] %v6894_v1  ;;  %401 = vst [vmem:[#allocation2 + $0x149] sm:$0x1] %v6894_v1  ;;  %v520_v59 = vmax.f32 %v7281_v49, 0.0  ;;  %v314_v62 = vld [vmem:[%s7164_s30 + $0x68] sm:$0xff]  ;;  %v7331_v9 = vadd.f32 %v7223_v19, %v453_v61  ;;  %v455_v10 = vmul.f32 %v7221_v18, %v312_v57  ;;  %v456_v11 = vmul.f32 %v7221_v18, %v313_v58 }
  0xb3   : > { %402 = vst [vmem:[#allocation2 + $0x161] sm:$0x1] %v6894_v1  ;;  %403 = vst [vmem:[#allocation2 + $0x179] sm:$0x1] %v6894_v1  ;;  %5719 = vmatpush1.bf16.msra.mxu0 %v5718_v24  ;;  %v7312_v2 = vld [vmem:[#allocation10 + $0x70] sm:$0xff]  ;;  %v521_v3 = vmax.f32 %v7293_v55, 0.0  ;;  %v7343_v15 = vadd.f32 %v7223_v19, %v454_v5  ;;  %v457_v16 = vmul.f32 %v7221_v18, %v314_v62 }
  0xb4   : > { %404 = vst [vmem:[#allocation2 + $0x191] sm:$0x1] %v6894_v1  ;;  %333 = vst [vmem:[%s7227_s24] sm:$0xff] %v301_v17  ;;  %5720 = vmatprep.subr.bf16.mxu0 %v9004_v0  ;;  %v315_v6 = vld [vmem:[%s7164_s30 + $0x70] sm:$0xff]  ;;  %v7325_v7 = vld [vmem:[#allocation10 + $0x78] sm:$0xff]  ;;  %v522_v8 = vmax.f32 %v7304_v60, 0.0  ;;  %v523_v14 = vmax.f32 %v7320_v4, 0.0  ;;  %v7354_v22 = vadd.f32 %v7223_v19, %v455_v10 }
  0xb5   : > { %334 = vst [vmem:[%s7227_s24 + $0x8] sm:$0xff] %v302_v21  ;;  %335 = vst [vmem:[%s7227_s24 + $0x10] sm:$0xff] %v303_v23  ;;  %v316_v12 = vld [vmem:[%s7164_s30 + $0x78] sm:$0xff]  ;;  %v317_v13 = vld [vmem:[%s7164_s30 + $0x80] sm:$0xff]  ;;  %v524_v21 = vmax.f32 %v7331_v9, 0.0  ;;  %v7357_v23 = vadd.f32 %v7223_v19, %v456_v11  ;;  %v458_v24 = vmul.f32 %v7221_v18, %v315_v6  ;;  %v5727_v27 = vpack.c.bf16 %v7325_v7, %v7312_v2  ;;  %s6895_s16 = smov [#allocation13]  }
  0xb6   : > { %336 = vst [vmem:[%s7227_s24 + $0x18] sm:$0xff] %v304_v28  ;;  %337 = vst [vmem:[%s7227_s24 + $0x20] sm:$0xff] %v305_v29  ;;  %v318_v17 = vld [vmem:[%s7164_s30 + $0x88] sm:$0xff]  ;;  %v319_v20 = vld [vmem:[%s7164_s30 + $0x90] sm:$0xff]  ;;  %v525_v28 = vmax.f32 %v7343_v15, 0.0  ;;  %v7369_v29 = vadd.f32 %v7223_v19, %v457_v16  ;;  %v459_v30 = vmul.f32 %v7221_v18, %v316_v12  ;;  %s6812_s28 = sshll.u32 %s6895_s16, 4  ;;  %s6813_s28 = int_to_ptr.vmem [resolvable:$false] %s6812_s28 }
  0xb7   : > { %338 = vst [vmem:[%s7227_s24 + $0x28] sm:$0xff] %v306_v34  ;;  %339 = vst [vmem:[%s7227_s24 + $0x30] sm:$0xff] %v307_v35  ;;  %5722 = vmatpush1.bf16.msra.mxu0 %v5721_v46  ;;  %v320_v25 = vld [vmem:[%s7164_s30 + $0x98] sm:$0xff]  ;;  %v321_v32 = vld [vmem:[%s7164_s30 + $0xa0] sm:$0xff]  ;;  %v526_v34 = vmax.f32 %v7354_v22, 0.0  ;;  %v527_v35 = vmax.f32 %v7357_v23, 0.0  ;;  %v7379_v38 = vadd.f32 %v7223_v19, %v458_v24  ;;  %v461_v47 = vmul.f32 %v7221_v18, %v318_v17  ;;  %p6815_p12 = scmp.lt.s32.totalorder %s8933_s14, %s6813_s28 }
  0xb8   : > { %340 = vst [vmem:[%s7227_s24 + $0x38] sm:$0xff] %v308_v39  ;;  %547 = vst [vmem:[#allocation2 + $0x19] sm:$0xff] %v515_v36  ;;  %5723 = vmatprep.subr.bf16.mxu0 %v9004_v0  ;;  %v1460_v33 = vld [vmem:[#allocation10 + $0x80] sm:$0xff]  ;;  %v460_v39 = vmul.f32 %v7221_v18, %v317_v13  ;;  %v1461_v44 = vld [vmem:[#allocation10 + $0x88] sm:$0xff]  ;;  %v7389_v46 = vadd.f32 %v7223_v19, %v459_v30  ;;  %v464_v2 = vmul.f32 %v7221_v18, %v321_v32  ;;  %s6814_s27 = scalar_lea.vmem %s6813_s28, 8192 }
  0xb9   : > { %341 = vst [vmem:[%s7227_s24 + $0x40] sm:$0xff] %v309_v45  ;;  %548 = vst [vmem:[#allocation2 + $0x21] sm:$0xff] %v516_v41  ;;  %v322_v40 = vld [vmem:[%s7164_s30 + $0xa8] sm:$0xff]  ;;  %v528_v45 = vmax.f32 %v7369_v29, 0.0  ;;  %v323_v50 = vld [vmem:[%s7164_s30 + $0xb0] sm:$0xff]  ;;  %v5730_v5 = vpack.c.bf16 %v1461_v44, %v1460_v33  ;;  %p6816_p1 = scmp.lt.s32.totalorder %s6814_s27, %s6808_s8 }
  0xba   : > { %342 = vst [vmem:[%s7227_s24 + $0x48] sm:$0xff] %v310_v51  ;;  %343 = vst [vmem:[%s7227_s24 + $0x50] sm:$0xff] %v311_v52  ;;  %v324_v51 = vld [vmem:[%s7164_s30 + $0xb8] sm:$0xff]  ;;  %v529_v52 = vmax.f32 %v7379_v38, 0.0  ;;  %v7401_v56 = vadd.f32 %v7223_v19, %v460_v39  ;;  %v530_v61 = vmax.f32 %v7389_v46, 0.0  ;;  %v465_v10 = vmul.f32 %v7221_v18, %v322_v40  ;;  %v326_v11 = vld [vmem:[%s7164_s30 + $0xc8] sm:$0xff] }
  0xbb   : > { %549 = vst [vmem:[#allocation2 + $0x31] sm:$0xff] %v517_v48  ;;  %344 = vst [vmem:[%s7227_s24 + $0x58] sm:$0xff] %v312_v57  ;;  %5725 = vmatpush1.bf16.msra.mxu0 %v5724_v63  ;;  %v462_v57 = vmul.f32 %v7221_v18, %v319_v20  ;;  %v463_v63 = vmul.f32 %v7221_v18, %v320_v25  ;;  %v466_v24 = vmul.f32 %v7221_v18, %v323_v50  ;;  %v1484_v26 = vld [vmem:[#allocation10 + $0x140] sm:$0xff]  ;;  %v1486_v31 = vld [vmem:[#allocation10 + $0x150] sm:$0xff]  ;;  %p6817_p2 = por %p6816_p1, %p6815_p12 }
  0xbc   : > { %345 = vst [vmem:[%s7227_s24 + $0x60] sm:$0xff] %v313_v58  ;;  %550 = vst [vmem:[#allocation2 + $0x39] sm:$0xff] %v518_v53  ;;  %5726 = vmatprep.subr.bf16.mxu0 %v9004_v0  ;;  %v325_v58 = vld [vmem:[%s7164_s30 + $0xc0] sm:$0xff]  ;;  %v467_v30 = vmul.f32 %v7221_v18, %v324_v51  ;;  %v469_v44 = vmul.f32 %v7221_v18, %v326_v11  ;;  %v1490_v42 = vld [vmem:[#allocation10 + $0x170] sm:$0xff] }
  0xbd   : > { %551 = vst [vmem:[#allocation2 + $0x49] sm:$0xff] %v519_v54  ;;  %346 = vst [vmem:[%s7227_s24 + $0x68] sm:$0xff] %v314_v62  ;;  %v7411_v62 = vadd.f32 %v7223_v19, %v461_v47  ;;  %v7420_v7 = vadd.f32 %v7223_v19, %v462_v57  ;;  %v1492_v43 = vld [vmem:[#allocation10 + $0x180] sm:$0xff]  ;;  %v1494_v49 = vld [vmem:[#allocation10 + $0x190] sm:$0xff]  ;;  %p6818_p13 = pnand %p6817_p2, %p6811_p7 }
  0xbe   : > { %552 = vst [vmem:[#allocation2 + $0x51] sm:$0xff] %v520_v59  ;;  %347 = vst [vmem:[%s7227_s24 + $0x70] sm:$0xff] %v315_v6  ;;  %v9003_v6 = vmax.f32 %v7401_v56, 0.0  ;;  %v1496_v55 = vld [vmem:[#allocation10 + $0x1a0] sm:$0xff]  ;;  %v1498_v60 = vld [vmem:[#allocation10 + $0x1b0] sm:$0xff] }
  0xbf   : > { %553 = vst [vmem:[#allocation2 + $0x61] sm:$0xff] %v521_v3  ;;  %348 = vst [vmem:[%s7227_s24 + $0x78] sm:$0xff] %v316_v12  ;;  %5728 = vmatpush1.bf16.msra.mxu0 %v5727_v27  ;;  %v1462_v12 = vld [vmem:[#allocation10 + $0x90] sm:$0xff]  ;;  %v9002_v16 = vmax.f32 %v7411_v62, 0.0  ;;  %v7440_v27 = vadd.f32 %v7223_v19, %v465_v10  ;;  %v7469_v10 = vadd.f32 %v7223_v19, %v469_v44  ;;  %v1500_v4 = vld [vmem:[#allocation10 + $0x1c0] sm:$0xff]  ;;  %v9042_v38 = vmax.f32 %v7411_v62, 0.0 }
  0xc0   : > { %349 = vst [vmem:[%s7227_s24 + $0x80] sm:$0xff] %v317_v13  ;;  %554 = vst [vmem:[#allocation2 + $0x69] sm:$0xff] %v522_v8  ;;  %5729 = vmatprep.subr.bf16.mxu0 %v9004_v0  ;;  %v1463_v13 = vld [vmem:[#allocation10 + $0x98] sm:$0xff]  ;;  %v1502_v9 = vld [vmem:[#allocation10 + $0x1d0] sm:$0xff]  ;;  %v9043_v46 = vmax.f32 %v7420_v7, 0.0 }
  0xc1   : > { %350 = vst [vmem:[%s7227_s24 + $0x88] sm:$0xff] %v318_v17  ;;  %351 = vst [vmem:[%s7227_s24 + $0x90] sm:$0xff] %v319_v20  ;;  %v7429_v17 = vadd.f32 %v7223_v19, %v463_v63  ;;  %v7432_v20 = vadd.f32 %v7223_v19, %v464_v2  ;;  %v5733_v47 = vpack.c.bf16 %v1463_v13, %v1462_v12  ;;  %v1464_v63 = vld [vmem:[#allocation10 + $0xa0] sm:$0xff]  ;;  %v1465_v2 = vld [vmem:[#allocation10 + $0xa8] sm:$0xff] }
  0xc2   : > { %555 = vst [vmem:[#allocation2 + $0x79] sm:$0xff] %v523_v14  ;;  %352 = vst [vmem:[%s7227_s24 + $0x98] sm:$0xff] %v320_v25  ;;  %v9001_v25 = vmax.f32 %v7420_v7, 0.0  ;;  %v328_v44 = vld [vmem:[%s7164_s30 + $0xd8] sm:$0xff]  ;;  %v1504_v15 = vld [vmem:[#allocation10 + $0x1e0] sm:$0xff]  ;;  %v9046_v7 = vmax.f32 %v7440_v27, 0.0 }
  0xc3   : > { %556 = vst [vmem:[#allocation2 + $0x81] sm:$0xff] %v524_v21  ;;  %353 = vst [vmem:[%s7227_s24 + $0xa0] sm:$0xff] %v321_v32  ;;  %v468_v32 = vmul.f32 %v7221_v18, %v325_v58  ;;  %v8998_v33 = vmax.f32 %v7429_v17, 0.0  ;;  %v8997_v39 = vmax.f32 %v7432_v20, 0.0  ;;  %5731 = vmatpush1.bf16.msra.mxu0 %v5730_v5  ;;  %v1506_v22 = vld [vmem:[#allocation10 + $0x1f0] sm:$0xff]  ;;  %v9045_v62 = vmax.f32 %v7432_v20, 0.0 }
  0xc4   : > { %557 = vst [vmem:[#allocation2 + $0x91] sm:$0xff] %v525_v28  ;;  %354 = vst [vmem:[%s7227_s24 + $0xa8] sm:$0xff] %v322_v40  ;;  %v7449_v40 = vadd.f32 %v7223_v19, %v466_v24  ;;  %5732 = vmatprep.subr.bf16.mxu0 %v9004_v0  ;;  %v8994_v24 = vmax.f32 %v7469_v10, 0.0 }
  0xc5   : > { %558 = vst [vmem:[#allocation2 + $0x99] sm:$0xff] %v526_v34  ;;  %559 = vst [vmem:[#allocation2 + $0xa9] sm:$0xff] %v527_v35  ;;  %v7459_v57 = vadd.f32 %v7223_v19, %v468_v32  ;;  %v5736_v32 = vpack.c.bf16 %v1465_v2, %v1464_v63 }
  0xc6   : > { %355 = vst [vmem:[%s7227_s24 + $0xb0] sm:$0xff] %v323_v50  ;;  %356 = vst [vmem:[%s7227_s24 + $0xb8] sm:$0xff] %v324_v51  ;;  %v8995_v50 = vmax.f32 %v7440_v27, 0.0  ;;  %v7456_v51 = vadd.f32 %v7223_v19, %v467_v30  ;;  %v8991_v5 = vmax.f32 %v7449_v40, 0.0 }
  0xc7   : > { %560 = vst [vmem:[#allocation2 + $0xb1] sm:$0xff] %v528_v45  ;;  %357 = vst [vmem:[%s7227_s24 + $0xc0] sm:$0xff] %v325_v58  ;;  %v327_v58 = vld [vmem:[%s7164_s30 + $0xd0] sm:$0xff]  ;;  %v8992_v13 = vmax.f32 %v7459_v57, 0.0  ;;  %5734 = vmatpush1.bf16.msra.mxu0 %v5733_v47  ;;  %v471_v47 = vmul.f32 %v7221_v18, %v328_v44  ;;  %v9049_v27 = vmax.f32 %v7459_v57, 0.0  ;;  %v332_v57 = vld [vmem:[%s7164_s30 + $0xf8] sm:$0xff] }
  0xc8   : > { %561 = vst [vmem:[#allocation2 + $0xc1] sm:$0xff] %v529_v52  ;;  %562 = vst [vmem:[#allocation2 + $0xc9] sm:$0xff] %v530_v61  ;;  %v8993_v12 = vmax.f32 %v7456_v51, 0.0  ;;  %5735 = vmatprep.subr.bf16.mxu0 %v9004_v0  ;;  %v9048_v20 = vmax.f32 %v7456_v51, 0.0 }
  0xc9   : > { %358 = vst [vmem:[%s7227_s24 + $0xc8] sm:$0xff] %v326_v11  ;;  %563 = vst [vmem:[#allocation2 + $0xd9] sm:$0xff] %v9003_v6  ;;  %v470_v11 = vmul.f32 %v7221_v18, %v327_v58  ;;  %v7497_v63 = vadd.f32 %v7223_v19, %v471_v47  ;;  %v1471_v47 = vld [vmem:[#allocation10 + $0xd8] sm:$0xff] }
  0xca   : > { %564 = vst [vmem:[#allocation2 + $0xe1] sm:$0xff] %v9002_v16  ;;  %565 = vst [vmem:[#allocation2 + $0xf1] sm:$0xff] %v9001_v25  ;;  %v644_v25 = vld [vmem:[#allocation2 + $0x9] sm:$0xff] }
  0xcb   : > { %566 = vst [vmem:[#allocation2 + $0xf9] sm:$0xff] %v8998_v33  ;;  %567 = vst [vmem:[#allocation2 + $0x109] sm:$0xff] %v8997_v39  ;;  %v7481_v30 = vadd.f32 %v7223_v19, %v470_v11  ;;  %5737 = vmatpush1.bf16.msra.mxu0 %v5736_v32  ;;  %v1478_v16 = vld [vmem:[#allocation10 + $0x110] sm:$0xff]  ;;  %v1479_v6 = vld [vmem:[#allocation10 + $0x118] sm:$0xff] }
  0xcc   : > { %359 = vst [vmem:[%s7227_s24 + $0xd0] sm:$0xff] %v327_v58  ;;  %568 = vst [vmem:[#allocation2 + $0x111] sm:$0xff] %v8995_v50  ;;  %v1466_v58 = vld [vmem:[#allocation10 + $0xb0] sm:$0xff]  ;;  %5738 = vmatprep.subr.bf16.mxu0 %v9004_v0  ;;  %v8999_v50 = vmax.f32 %v7497_v63, 0.0 }
  0xcd   : > { %569 = vst [vmem:[#allocation2 + $0x121] sm:$0xff] %v8991_v5  ;;  %570 = vst [vmem:[#allocation2 + $0x129] sm:$0xff] %v8993_v12  ;;  %v1467_v5 = vld [vmem:[#allocation10 + $0xb8] sm:$0xff]  ;;  %v8996_v11 = vmax.f32 %v7481_v30, 0.0  ;;  %v1468_v12 = vld [vmem:[#allocation10 + $0xc0] sm:$0xff] }
  0xce   : > { %571 = vst [vmem:[#allocation2 + $0x139] sm:$0xff] %v8992_v13  ;;  %572 = vst [vmem:[#allocation2 + $0x141] sm:$0xff] %v8994_v24  ;;  %v5739_v2 = vpack.c.bf16 %v1467_v5, %v1466_v58  ;;  %v329_v13 = vld [vmem:[%s7164_s30 + $0xe0] sm:$0xff]  ;;  %v1469_v24 = vld [vmem:[#allocation10 + $0xc8] sm:$0xff] }
  0xcf   : > { %360 = vst [vmem:[%s7227_s24 + $0xd8] sm:$0xff] %v328_v44  ;;  %573 = vst [vmem:[#allocation2 + $0x151] sm:$0xff] %v8996_v11  ;;  %v472_v44 = vmul.f32 %v7221_v18, %v329_v13  ;;  %v5742_v32 = vpack.c.bf16 %v1469_v24, %v1468_v12  ;;  %v330_v5 = vld [vmem:[%s7164_s30 + $0xe8] sm:$0xff]  ;;  %v1470_v58 = vld [vmem:[#allocation10 + $0xd0] sm:$0xff] }
  0xd0   : > { %361 = vst [vmem:[%s7227_s24 + $0xe0] sm:$0xff] %v329_v13  ;;  %574 = vst [vmem:[#allocation2 + $0x159] sm:$0xff] %v8999_v50  ;;  %5740 = vmatpush1.bf16.msra.mxu0 %v5739_v2  ;;  %v473_v33 = vmul.f32 %v7221_v18, %v330_v5  ;;  %v1472_v12 = vld [vmem:[#allocation10 + $0xe0] sm:$0xff]  ;;  %v1473_v24 = vld [vmem:[#allocation10 + $0xe8] sm:$0xff] }
  0xd1   : > { %v7507_v11 = vadd.f32 %v7223_v19, %v472_v44  ;;  %5741 = vmatprep.subr.bf16.mxu0 %v9004_v0  ;;  %362 = vst [vmem:[%s7227_s24 + $0xe8] sm:$0xff] %v330_v5  ;;  %v5745_v44 = vpack.c.bf16 %v1471_v47, %v1470_v58  ;;  %v5748_v50 = vpack.c.bf16 %v1473_v24, %v1472_v12  ;;  %v1474_v5 = vld [vmem:[#allocation10 + $0xf0] sm:$0xff]  ;;  %v1477_v58 = vld [vmem:[#allocation10 + $0x108] sm:$0xff]  ;;  %364 = vst [vmem:[%s7227_s24 + $0xf8] sm:$0xff] %v332_v57 }
  0xd2   : > { %v7517_v13 = vadd.f32 %v7223_v19, %v473_v33  ;;  %v7531_v12 = vld [vmem:[#allocation2 + $0x18] sm:$0xff]  ;;  %v7618_v23 = vld [vmem:[#allocation2 + $0xc0] sm:$0xff]  ;;  %v7624_v29 = vld [vmem:[#allocation2 + $0xc8] sm:$0xff] }
  0xd3   : > { %v9000_v39 = vmax.f32 %v7507_v11, 0.0 }
  0xd4   : > { %5743 = vmatpush1.bf16.msra.mxu0 %v5742_v32  ;;  %v544_v2 = vmax.f32 %v7517_v13, 0.0  ;;  %v1476_v32 = vld [vmem:[#allocation10 + $0x100] sm:$0xff] }
  0xd5   : > { %575 = vst [vmem:[#allocation2 + $0x169] sm:$0xff] %v9000_v39  ;;  %5744 = vmatprep.subr.bf16.mxu0 %v9004_v0  ;;  %v1475_v39 = vld [vmem:[#allocation10 + $0xf8] sm:$0xff]  ;;  %v5754_v47 = vpack.c.bf16 %v1477_v58, %v1476_v32  ;;  %v7552_v58 = vld [vmem:[#allocation2 + $0x38] sm:$0xff] }
  0xd6   : > { %576 = vst [vmem:[#allocation2 + $0x171] sm:$0xff] %v544_v2  ;;  %v5751_v33 = vpack.c.bf16 %v1475_v39, %v1474_v5  ;;  %v1481_v39 = vld [vmem:[#allocation10 + $0x128] sm:$0xff]  ;;  %v1482_v5 = vld [vmem:[#allocation10 + $0x130] sm:$0xff]  ;;  %v7545_v32 = vld [vmem:[#allocation2 + $0x32] sm:$0xff] }
  0xd7   : > { %5577 = vmatprep.mubr.f32.mxu1 %v7545_v32  ;;  %v1512_v13 = vld [vmem:[#allocation10 + $0x220] sm:$0xff] }
  0xd8   : > { %5746 = vmatpush1.bf16.msra.mxu0 %v5745_v44  ;;  %v5757_v44 = vpack.c.bf16 %v1479_v6, %v1478_v16  ;;  %v7537_v6 = vld [vmem:[#allocation2 + $0x20] sm:$0xff]  ;;  %v7543_v16 = vld [vmem:[#allocation2 + $0x30] sm:$0xff] }
  0xd9   : > { %5747 = vmatprep.subr.bf16.mxu0 %v9004_v0 }
  0xdc   : > { %5749 = vmatpush1.bf16.msra.mxu0 %v5748_v50  ;;  %v1480_v50 = vld [vmem:[#allocation10 + $0x120] sm:$0xff] }
  0xdd   : > { %5750 = vmatprep.subr.bf16.mxu0 %v9004_v0  ;;  %v5760_v24 = vpack.c.bf16 %v1481_v39, %v1480_v50  ;;  %v7564_v39 = vld [vmem:[#allocation2 + $0x50] sm:$0xff] }
  0xe0   : > { %5752 = vmatpush1.bf16.msra.mxu0 %v5751_v33  ;;  %v1483_v33 = vld [vmem:[#allocation10 + $0x138] sm:$0xff] }
  0xe1   : > { %5753 = vmatprep.subr.bf16.mxu0 %v9004_v0 }
  0xe3   : > { %1653 = vmatmul.mubr.f32.vlgmr.msra.gmra.mrb[0].mxu0 %v6894_v1 }
  0xe4   : > { %5755 = vmatpush1.bf16.msra.mxu0 %v5754_v47  ;;  %1657 = vmatprep.mubr.f32.mxu0 %v644_v25  ;;  %v1489_v47 = vld [vmem:[#allocation10 + $0x168] sm:$0xff] }
  0xe5   : > { %5756 = vmatprep.subr.bf16.mxu0 %v9004_v0 }
  0xe7   : > { %1658 = vmatmul.mubr.f32.gmra.mrb[2].mxu0 %v6894_v1  ;;  %v5763_v1 = vpack.c.bf16 %v1483_v33, %v1482_v5  ;;  %v7570_v5 = vld [vmem:[#allocation2 + $0x60] sm:$0xff] }
  0xe8   : > { %1662 = vmatprep.mubr.f32.mxu0 %v515_v36  ;;  %5758 = vmatpush1.bf16.msra.mxu0 %v5757_v44  ;;  %v1485_v36 = vld [vmem:[#allocation10 + $0x148] sm:$0xff]  ;;  %v7558_v44 = vld [vmem:[#allocation2 + $0x48] sm:$0xff] }
  0xe9   : > { %5759 = vmatprep.subr.bf16.mxu0 %v9004_v0  ;;  %v5766_v25 = vpack.c.bf16 %v1485_v36, %v1484_v26  ;;  %v7582_v36 = vld [vmem:[#allocation2 + $0x78] sm:$0xff] }
  0xeb   : > { %1663 = vmatmul.mubr.f32.gmra.mrb[4].mxu0 %v7531_v12 }
  0xec   : > { %1667 = vmatprep.mubr.f32.mxu0 %v516_v41  ;;  %5761 = vmatpush1.bf16.msra.mxu0 %v5760_v24  ;;  %v1487_v41 = vld [vmem:[#allocation10 + $0x158] sm:$0xff] }
  0xed   : > { %5762 = vmatprep.subr.bf16.mxu0 %v9004_v0  ;;  %v5769_v37 = vpack.c.bf16 %v1487_v41, %v1486_v31  ;;  %v7588_v31 = vld [vmem:[#allocation2 + $0x80] sm:$0xff] }
  0xef   : > { %1668 = vmatmul.mubr.f32.gmra.mrb[6].mxu0 %v7537_v6 }
  0xf0   : > { %1672 = vmatprep.mubr.f32.mxu0 %v517_v48  ;;  %5764 = vmatpush1.bf16.msra.mxu0 %v5763_v1  ;;  %v1488_v48 = vld [vmem:[#allocation10 + $0x160] sm:$0xff]  ;;  %v7576_v1 = vld [vmem:[#allocation2 + $0x68] sm:$0xff] }
  0xf1   : > { %5765 = vmatprep.subr.bf16.mxu0 %v9004_v0  ;;  %v5772_v50 = vpack.c.bf16 %v1489_v47, %v1488_v48  ;;  %v7600_v47 = vld [vmem:[#allocation2 + $0x98] sm:$0xff] }
  0xf3   : > { %1673 = vmatmul.mubr.f32.gmra.mrb[8].mxu0 %v7543_v16 }
  0xf4   : > { %1677 = vmatprep.mubr.f32.mxu0 %v518_v53  ;;  %5767 = vmatpush1.bf16.msra.mxu0 %v5766_v25  ;;  %v1491_v53 = vld [vmem:[#allocation10 + $0x178] sm:$0xff] }
  0xf5   : > { %5768 = vmatprep.subr.bf16.mxu0 %v9004_v0  ;;  %v5775_v24 = vpack.c.bf16 %v1491_v53, %v1490_v42  ;;  %v7606_v42 = vld [vmem:[#allocation2 + $0xa8] sm:$0xff] }
  0xf7   : > { %1678 = vmatmul.mubr.f32.gmra.mrb[10].mxu0 %v7552_v58 }
  0xf8   : > { %1682 = vmatprep.mubr.f32.mxu0 %v519_v54  ;;  %5770 = vmatpush1.bf16.msra.mxu0 %v5769_v37  ;;  %v1493_v54 = vld [vmem:[#allocation10 + $0x188] sm:$0xff]  ;;  %v7594_v37 = vld [vmem:[#allocation2 + $0x90] sm:$0xff] }
  0xf9   : > { %5771 = vmatprep.subr.bf16.mxu0 %v9004_v0  ;;  %v5778_v33 = vpack.c.bf16 %v1493_v54, %v1492_v43  ;;  %v7644_v54 = vld [vmem:[#allocation2 + $0xf8] sm:$0xff] }
  0xfb   : > { %1683 = vmatmul.mubr.f32.gmra.mrb[12].mxu0 %v7558_v44 }
  0xfc   : > { %1687 = vmatprep.mubr.f32.mxu0 %v520_v59  ;;  %5773 = vmatpush1.bf16.msra.mxu0 %v5772_v50  ;;  %v1495_v59 = vld [vmem:[#allocation10 + $0x198] sm:$0xff] }
  0xfd   : > { %5774 = vmatprep.subr.bf16.mxu0 %v9004_v0  ;;  %v5781_v26 = vpack.c.bf16 %v1495_v59, %v1494_v49  ;;  %v7654_v49 = vld [vmem:[#allocation2 + $0x110] sm:$0xff]  ;;  %v7659_v59 = vld [vmem:[#allocation2 + $0x120] sm:$0xff] }
  0xff   : > { %1688 = vmatmul.mubr.f32.gmra.mrb[14].mxu0 %v7564_v39 }
 0x100   : > { %1692 = vmatprep.mubr.f32.mxu0 %v521_v3  ;;  %5776 = vmatpush1.bf16.msra.mxu0 %v5775_v24  ;;  %v1497_v3 = vld [vmem:[#allocation10 + $0x1a8] sm:$0xff]  ;;  %v7612_v24 = vld [vmem:[#allocation2 + $0xb0] sm:$0xff] }
 0x101   : > { %5777 = vmatprep.subr.bf16.mxu0 %v9004_v0  ;;  %v5784_v25 = vpack.c.bf16 %v1497_v3, %v1496_v55  ;;  %v7669_v55 = vld [vmem:[#allocation2 + $0x138] sm:$0xff]  ;;  %v9050_v3 = vmax.f32 %v7469_v10, 0.0  ;;  %v475_v10 = vmul.f32 %v7221_v18, %v332_v57 }
 0x102   : > { %v7742_v57 = vld [vmem:[#allocation2 + $0x52] sm:$0xff] }
 0x103   : > { %1693 = vmatmul.mubr.f32.gmra.mrb[16].mxu0 %v7570_v5 }
 0x104   : > { %1697 = vmatprep.mubr.f32.mxu0 %v522_v8  ;;  %5779 = vmatpush1.bf16.msra.mxu0 %v5778_v33  ;;  %v1499_v8 = vld [vmem:[#allocation10 + $0x1b8] sm:$0xff] }
 0x105   : > { %5780 = vmatprep.subr.bf16.mxu0 %v9004_v0  ;;  %v5787_v41 = vpack.c.bf16 %v1499_v8, %v1498_v60  ;;  %v7649_v33 = vld [vmem:[#allocation2 + $0x108] sm:$0xff]  ;;  %v9051_v8 = vmax.f32 %v7481_v30, 0.0  ;;  %v7699_v30 = vld [vmem:[#allocation2 + $0x158] sm:$0xff] }
 0x107   : > { %1698 = vmatmul.mubr.f32.gmra.mrb[18].mxu0 %v7576_v1 }
 0x108   : > { %1702 = vmatprep.mubr.f32.mxu0 %v523_v14  ;;  %5782 = vmatpush1.bf16.msra.mxu0 %v5781_v26  ;;  %v1501_v14 = vld [vmem:[#allocation10 + $0x1c8] sm:$0xff]  ;;  %v7664_v26 = vld [vmem:[#allocation2 + $0x128] sm:$0xff] }
 0x109   : > { %5783 = vmatprep.subr.bf16.mxu0 %v9004_v0  ;;  %v5790_v48 = vpack.c.bf16 %v1501_v14, %v1500_v4  ;;  %v7694_v14 = vadd.f32 %v7223_v19, %v475_v10  ;;  %v1524_v10 = vld [vmem:[#allocation10 + $0x280] sm:$0xff] }
 0x10b   : > { %1703 = vmatmul.mubr.f32.gmra.mrb[20].mxu0 %v7582_v36 }
 0x10c   : > { %1707 = vmatprep.mubr.f32.mxu0 %v524_v21  ;;  %5785 = vmatpush1.bf16.msra.mxu0 %v5784_v25  ;;  %v1503_v21 = vld [vmem:[#allocation10 + $0x1d8] sm:$0xff]  ;;  %v7675_v25 = vld [vmem:[#allocation2 + $0x140] sm:$0xff] }
 0x10d   : > { %5786 = vmatprep.subr.bf16.mxu0 %v9004_v0  ;;  %v5793_v50 = vpack.c.bf16 %v1503_v21, %v1502_v9  ;;  %v546_v9 = vmax.f32 %v7694_v14, 0.0  ;;  %v7707_v21 = vld [vmem:[#allocation2 + $0x168] sm:$0xff] }
 0x10f   : > { %1708 = vmatmul.mubr.f32.gmra.mrb[22].mxu0 %v7588_v31  ;;  %578 = vst [vmem:[#allocation2 + $0x189] sm:$0xff] %v546_v9 }
 0x110   : > { %1712 = vmatprep.mubr.f32.mxu0 %v525_v28  ;;  %5788 = vmatpush1.bf16.msra.mxu0 %v5787_v41  ;;  %v1505_v28 = vld [vmem:[#allocation10 + $0x1e8] sm:$0xff]  ;;  %v7686_v41 = vld [vmem:[#allocation2 + $0x150] sm:$0xff] }
 0x111   : > { %5789 = vmatprep.subr.bf16.mxu0 %v9004_v0  ;;  %v5796_v53 = vpack.c.bf16 %v1505_v28, %v1504_v15  ;;  %v707_v15 = vld [vmem:[#allocation2 + $0x2] sm:$0xff] }
 0x113   : > { %1713 = vmatmul.mubr.f32.gmra.mrb[24].mxu0 %v7594_v37 }
 0x114   : > { %1717 = vmatprep.mubr.f32.mxu0 %v526_v34  ;;  %5791 = vmatpush1.bf16.msra.mxu0 %v5790_v48  ;;  %v1507_v34 = vld [vmem:[#allocation10 + $0x1f8] sm:$0xff]  ;;  %v9052_v48 = vmax.f32 %v7497_v63, 0.0  ;;  %v1508_v63 = vld [vmem:[#allocation10 + $0x200] sm:$0xff] }
 0x115   : > { %5792 = vmatprep.subr.bf16.mxu0 %v9004_v0  ;;  %v5799_v43 = vpack.c.bf16 %v1507_v34, %v1506_v22  ;;  %v708_v22 = vld [vmem:[#allocation2 + $0xa] sm:$0xff] }
 0x117   : > { %1718 = vmatmul.mubr.f32.gmra.mrb[26].mxu0 %v7600_v47 }
 0x118   : > { %1722 = vmatprep.mubr.f32.mxu0 %v527_v35  ;;  %5794 = vmatpush1.bf16.msra.mxu0 %v5793_v50  ;;  %v9041_v35 = vmax.f32 %v7401_v56, 0.0  ;;  %v9044_v56 = vmax.f32 %v7429_v17, 0.0  ;;  %v9047_v17 = vmax.f32 %v7449_v40, 0.0  ;;  %v331_v40 = vld [vmem:[%s7164_s30 + $0xf0] sm:$0xff] }
 0x119   : > { %5795 = vmatprep.subr.bf16.mxu0 %v9004_v0  ;;  %363 = vst [vmem:[%s7227_s24 + $0xf0] sm:$0xff] %v331_v40  ;;  %v474_v51 = vmul.f32 %v7221_v18, %v331_v40  ;;  %v9053_v18 = vmax.f32 %v7507_v11, 0.0  ;;  %v1509_v50 = vld [vmem:[#allocation10 + $0x208] sm:$0xff]  ;;  %v1511_v11 = vld [vmem:[#allocation10 + $0x218] sm:$0xff] }
 0x11a   : > { %v5802_v28 = vpack.c.bf16 %v1509_v50, %v1508_v63  ;;  %v1521_v40 = vld [vmem:[#allocation10 + $0x268] sm:$0xff]  ;;  %v1526_v63 = vld [vmem:[#allocation10 + $0x290] sm:$0xff] }
 0x11b   : > { %1723 = vmatmul.mubr.f32.gmra.mrb[28].mxu0 %v7606_v42  ;;  %v7680_v60 = vadd.f32 %v7223_v19, %v474_v51  ;;  %v7712_v19 = vld [vmem:[#allocation2 + $0x170] sm:$0xff]  ;;  %v1522_v51 = vld [vmem:[#allocation10 + $0x270] sm:$0xff] }
 0x11c   : > { %1727 = vmatprep.mubr.f32.mxu0 %v528_v45  ;;  %5797 = vmatpush1.bf16.msra.mxu0 %v5796_v53  ;;  %v7629_v45 = vld [vmem:[#allocation2 + $0xd8] sm:$0xff]  ;;  %v1510_v53 = vld [vmem:[#allocation10 + $0x210] sm:$0xff] }
 0x11d   : > { %5798 = vmatprep.subr.bf16.mxu0 %v9004_v0  ;;  %v545_v4 = vmax.f32 %v7680_v60, 0.0  ;;  %v5805_v34 = vpack.c.bf16 %v1511_v11, %v1510_v53  ;;  %v7752_v50 = vld [vmem:[#allocation2 + $0x6a] sm:$0xff]  ;;  %v7757_v53 = vld [vmem:[#allocation2 + $0x7a] sm:$0xff] }
 0x11e   : > { %v3894_v60 = vld [vmem:[#allocation10 + $0x4a8] sm:$0xff] }
 0x11f   : > { %1728 = vmatmul.mubr.f32.gmra.mrb[30].mxu0 %v7612_v24  ;;  %577 = vst [vmem:[#allocation2 + $0x181] sm:$0xff] %v545_v4 }
 0x120   : > { %1732 = vmatprep.mubr.f32.mxu0 %v529_v52  ;;  %5800 = vmatpush1.bf16.msra.mxu0 %v5799_v43  ;;  %v7634_v52 = vld [vmem:[#allocation2 + $0xe0] sm:$0xff] }
 0x121   : > { %5801 = vmatprep.subr.bf16.mxu0 %v9004_v0  ;;  %v7719_v43 = vld [vmem:[#allocation2 + $0x1a] sm:$0xff] }
 0x123   : > { %1733 = vmatmul.mubr.f32.gmra.mrb[32].mxu0 %v7618_v23 }
 0x124   : > { %1737 = vmatprep.mubr.f32.mxu0 %v530_v61  ;;  %v7639_v61 = vld [vmem:[#allocation2 + $0xf0] sm:$0xff] }
 0x127   : > { %1738 = vmatmul.mubr.f32.gmra.mrb[34].mxu0 %v7624_v29 }
 0x128   : > { %1742 = vmatprep.mubr.f32.mxu0 %v9041_v35  ;;  %v1514_v35 = vld [vmem:[#allocation10 + $0x230] sm:$0xff] }
 0x12b   : > { %1743 = vmatmul.mubr.f32.gmra.mrb[36].mxu0 %v7629_v45 }
 0x12c   : > { %1747 = vmatprep.mubr.f32.mxu0 %v9042_v38  ;;  %v1515_v38 = vld [vmem:[#allocation10 + $0x238] sm:$0xff] }
 0x12f   : > { %1748 = vmatmul.mubr.f32.gmra.mrb[38].mxu0 %v7634_v52 }
 0x130   : > { %1752 = vmatprep.mubr.f32.mxu0 %v9043_v46  ;;  %v5811_v46 = vpack.c.bf16 %v1515_v38, %v1514_v35  ;;  %v1534_v38 = vld [vmem:[#allocation10 + $0x2d0] sm:$0xff] }
 0x133   : > { %1753 = vmatmul.mubr.f32.gmra.mrb[40].mxu0 %v7639_v61 }
 0x134   : > { %1757 = vmatprep.mubr.f32.mxu0 %v9044_v56  ;;  %v1516_v56 = vld [vmem:[#allocation10 + $0x240] sm:$0xff] }
 0x137   : > { %1758 = vmatmul.mubr.f32.gmra.mrb[42].mxu0 %v7644_v54 }
 0x138   : > { %1762 = vmatprep.mubr.f32.mxu0 %v9045_v62 }
 0x13b   : > { %1763 = vmatmul.mubr.f32.gmra.mrb[44].mxu0 %v7649_v33 }
 0x13c   : > { %1767 = vmatprep.mubr.f32.mxu0 %v9046_v7  ;;  %v1518_v7 = vld [vmem:[#allocation10 + $0x250] sm:$0xff] }
 0x13f   : > { %1768 = vmatmul.mubr.f32.gmra.mrb[46].mxu0 %v7654_v49 }
 0x140   : > { %1772 = vmatprep.mubr.f32.mxu0 %v9047_v17  ;;  %v1519_v17 = vld [vmem:[#allocation10 + $0x258] sm:$0xff] }
 0x143   : > { %1773 = vmatmul.mubr.f32.gmra.mrb[48].mxu0 %v7659_v59 }
 0x144   : > { %1777 = vmatprep.mubr.f32.mxu0 %v9048_v20  ;;  %v5817_v20 = vpack.c.bf16 %v1519_v17, %v1518_v7  ;;  %v1538_v17 = vld [vmem:[#allocation10 + $0x2f0] sm:$0xff] }
 0x147   : > { %1778 = vmatmul.mubr.f32.gmra.mrb[50].mxu0 %v7664_v26 }
 0x148   : > { %1782 = vmatprep.mubr.f32.mxu0 %v9049_v27  ;;  %v1520_v27 = vld [vmem:[#allocation10 + $0x260] sm:$0xff] }
 0x14b   : > { %1783 = vmatmul.mubr.f32.gmra.mrb[52].mxu0 %v7669_v55 }
 0x14c   : > { %1787 = vmatprep.mubr.f32.mxu0 %v9050_v3  ;;  %v5820_v3 = vpack.c.bf16 %v1521_v40, %v1520_v27  ;;  %v7796_v40 = vld [vmem:[#allocation2 + $0xda] sm:$0xff] }
 0x14f   : > { %1788 = vmatmul.mubr.f32.gmra.mrb[54].mxu0 %v7675_v25 }
 0x150   : > { %1792 = vmatprep.mubr.f32.mxu0 %v9051_v8 }
 0x153   : > { %1793 = vmatmul.mubr.f32.gmra.mrb[56].mxu0 %v7686_v41 }
 0x154   : > { %1797 = vmatprep.mubr.f32.mxu0 %v9052_v48  ;;  %v7747_v48 = vld [vmem:[#allocation2 + $0x62] sm:$0xff] }
 0x157   : > { %1798 = vmatmul.mubr.f32.gmra.mrb[58].mxu0 %v7699_v30 }
 0x158   : > { %1802 = vmatprep.mubr.f32.mxu0 %v9053_v18 }
 0x15b   : > { %1803 = vmatmul.mubr.f32.gmra.mrb[60].mxu0 %v7707_v21 }
 0x15c   : > { %1807 = vmatprep.mubr.f32.mxu0 %v544_v2  ;;  %v1513_v2 = vld [vmem:[#allocation10 + $0x228] sm:$0xff] }
 0x15f   : > { %1808 = vmatmul.mubr.f32.gmra.mrb[62].mxu0 %v7712_v19 }
 0x160   : > { %1877 = vmatprep.mubr.f32.mxu0 %v7531_v12  ;;  %v5808_v12 = vpack.c.bf16 %v1513_v2, %v1512_v13  ;;  %v1532_v2 = vld [vmem:[#allocation10 + $0x2c0] sm:$0xff] }
 0x163   : > { %1878 = vmatmul.mubr.f32.vlgmr.msra.gmra.mrb[0].mxu0 %v707_v15 }
 0x164   : > { %5803 = vmatpush1.bf16.msra.mxu0 %v5802_v28  ;;  %1882 = vmatprep.mubr.f32.mxu0 %v7537_v6  ;;  %v7724_v6 = vld [vmem:[#allocation2 + $0x22] sm:$0xff]  ;;  %v1528_v28 = vld [vmem:[#allocation10 + $0x2a0] sm:$0xff] }
 0x165   : > { %5804 = vmatprep.subr.bf16.mxu0 %v9004_v0 }
 0x167   : > { %1883 = vmatmul.mubr.f32.gmra.mrb[2].mxu0 %v708_v22  ;;  %v1530_v22 = vld [vmem:[#allocation10 + $0x2b0] sm:$0xff] }
 0x168   : > { %1887 = vmatprep.mubr.f32.mxu0 %v7543_v16  ;;  %5806 = vmatpush1.bf16.msra.mxu0 %v5805_v34  ;;  %v1517_v16 = vld [vmem:[#allocation10 + $0x248] sm:$0xff] }
 0x169   : > { %5807 = vmatprep.subr.bf16.mxu0 %v9004_v0  ;;  %v5814_v62 = vpack.c.bf16 %v1517_v16, %v1516_v56  ;;  %v7762_v34 = vld [vmem:[#allocation2 + $0x82] sm:$0xff]  ;;  %v1536_v16 = vld [vmem:[#allocation10 + $0x2e0] sm:$0xff] }
 0x16b   : > { %1888 = vmatmul.mubr.f32.gmra.mrb[4].mxu0 %v7719_v43 }
 0x16c   : > { %1892 = vmatprep.mubr.f32.mxu0 %v7552_v58  ;;  %5809 = vmatpush1.bf16.msra.mxu0 %v5808_v12  ;;  %v7732_v58 = vld [vmem:[#allocation2 + $0x3a] sm:$0xff]  ;;  %v7767_v12 = vld [vmem:[#allocation2 + $0x92] sm:$0xff] }
 0x16d   : > { %5810 = vmatprep.subr.bf16.mxu0 %v9004_v0 }
 0x16f   : > { %1893 = vmatmul.mubr.f32.gmra.mrb[6].mxu0 %v7724_v6 }
 0x170   : > { %1897 = vmatprep.mubr.f32.mxu0 %v7558_v44  ;;  %5812 = vmatpush1.bf16.msra.mxu0 %v5811_v46  ;;  %v7737_v44 = vld [vmem:[#allocation2 + $0x4a] sm:$0xff]  ;;  %v7772_v46 = vld [vmem:[#allocation2 + $0x9a] sm:$0xff] }
 0x171   : > { %5813 = vmatprep.subr.bf16.mxu0 %v9004_v0 }
 0x173   : > { %1898 = vmatmul.mubr.f32.gmra.mrb[8].mxu0 %v7545_v32 }
 0x174   : > { %1902 = vmatprep.mubr.f32.mxu0 %v7564_v39  ;;  %5815 = vmatpush1.bf16.msra.mxu0 %v5814_v62  ;;  %v1523_v39 = vld [vmem:[#allocation10 + $0x278] sm:$0xff] }
 0x175   : > { %5816 = vmatprep.subr.bf16.mxu0 %v9004_v0  ;;  %v5823_v8 = vpack.c.bf16 %v1523_v39, %v1522_v51  ;;  %v7777_v62 = vld [vmem:[#allocation2 + $0xaa] sm:$0xff]  ;;  %v1573_v51 = vld [vmem:[#allocation10 + $0x408] sm:$0xff] }
 0x177   : > { %1903 = vmatmul.mubr.f32.gmra.mrb[10].mxu0 %v7732_v58 }
 0x178   : > { %1907 = vmatprep.mubr.f32.mxu0 %v7570_v5  ;;  %5818 = vmatpush1.bf16.msra.mxu0 %v5817_v20  ;;  %v1525_v5 = vld [vmem:[#allocation10 + $0x288] sm:$0xff]  ;;  %v7782_v20 = vld [vmem:[#allocation2 + $0xb2] sm:$0xff] }
 0x179   : > { %5819 = vmatprep.subr.bf16.mxu0 %v9004_v0  ;;  %v5826_v18 = vpack.c.bf16 %v1525_v5, %v1524_v10  ;;  %v1576_v5 = vld [vmem:[#allocation10 + $0x420] sm:$0xff] }
 0x17b   : > { %1908 = vmatmul.mubr.f32.gmra.mrb[12].mxu0 %v7737_v44 }
 0x17c   : > { %1912 = vmatprep.mubr.f32.mxu0 %v7576_v1  ;;  %5821 = vmatpush1.bf16.msra.mxu0 %v5820_v3  ;;  %v1527_v1 = vld [vmem:[#allocation10 + $0x298] sm:$0xff] }
 0x17d   : > { %5822 = vmatprep.subr.bf16.mxu0 %v9004_v0  ;;  %v5829_v15 = vpack.c.bf16 %v1527_v1, %v1526_v63  ;;  %v7804_v3 = vld [vmem:[#allocation2 + $0xf2] sm:$0xff]  ;;  %v7828_v63 = vld [vmem:[#allocation2 + $0x13a] sm:$0xff]  ;;  %v1578_v1 = vld [vmem:[#allocation10 + $0x430] sm:$0xff] }
 0x17f   : > { %1913 = vmatmul.mubr.f32.gmra.mrb[14].mxu0 %v7742_v57 }
 0x180   : > { %1917 = vmatprep.mubr.f32.mxu0 %v7582_v36  ;;  %5824 = vmatpush1.bf16.msra.mxu0 %v5823_v8  ;;  %v1529_v36 = vld [vmem:[#allocation10 + $0x2a8] sm:$0xff]  ;;  %v1575_v8 = vld [vmem:[#allocation10 + $0x418] sm:$0xff] }
 0x181   : > { %5825 = vmatprep.subr.bf16.mxu0 %v9004_v0  ;;  %v5832_v11 = vpack.c.bf16 %v1529_v36, %v1528_v28  ;;  %v7832_v28 = vld [vmem:[#allocation2 + $0x142] sm:$0xff]  ;;  %v1580_v36 = vld [vmem:[#allocation10 + $0x440] sm:$0xff] }
 0x183   : > { %1918 = vmatmul.mubr.f32.gmra.mrb[16].mxu0 %v7747_v48 }
 0x184   : > { %1922 = vmatprep.mubr.f32.mxu0 %v7588_v31  ;;  %5827 = vmatpush1.bf16.msra.mxu0 %v5826_v18  ;;  %v1531_v31 = vld [vmem:[#allocation10 + $0x2b8] sm:$0xff]  ;;  %v1577_v18 = vld [vmem:[#allocation10 + $0x428] sm:$0xff] }
 0x185   : > { %5828 = vmatprep.subr.bf16.mxu0 %v9004_v0  ;;  %v5835_v13 = vpack.c.bf16 %v1531_v31, %v1530_v22  ;;  %v7836_v22 = vld [vmem:[#allocation2 + $0x152] sm:$0xff]  ;;  %v1582_v31 = vld [vmem:[#allocation10 + $0x450] sm:$0xff] }
 0x187   : > { %1923 = vmatmul.mubr.f32.gmra.mrb[18].mxu0 %v7752_v50 }
 0x188   : > { %1927 = vmatprep.mubr.f32.mxu0 %v7594_v37  ;;  %5830 = vmatpush1.bf16.msra.mxu0 %v5829_v15  ;;  %v1533_v37 = vld [vmem:[#allocation10 + $0x2c8] sm:$0xff]  ;;  %v1579_v15 = vld [vmem:[#allocation10 + $0x438] sm:$0xff] }
 0x189   : > { %5831 = vmatprep.subr.bf16.mxu0 %v9004_v0  ;;  %v5838_v35 = vpack.c.bf16 %v1533_v37, %v1532_v2  ;;  %v7840_v2 = vld [vmem:[#allocation2 + $0x15a] sm:$0xff] }
 0x18a   : > { %v7842_v37 = vld [vmem:[#allocation2 + $0x180] sm:$0xff] }
 0x18b   : > { %1928 = vmatmul.mubr.f32.gmra.mrb[20].mxu0 %v7757_v53 }
 0x18c   : > { %1932 = vmatprep.mubr.f32.mxu0 %v7600_v47  ;;  %5833 = vmatpush1.bf16.msra.mxu0 %v5832_v11  ;;  %v1535_v47 = vld [vmem:[#allocation10 + $0x2d8] sm:$0xff]  ;;  %v1581_v11 = vld [vmem:[#allocation10 + $0x448] sm:$0xff] }
 0x18d   : > { %5834 = vmatprep.subr.bf16.mxu0 %v9004_v0  ;;  %v5841_v56 = vpack.c.bf16 %v1535_v47, %v1534_v38  ;;  %v1585_v38 = vld [vmem:[#allocation10 + $0x468] sm:$0xff]  ;;  %v7846_v47 = vld [vmem:[#allocation2 + $0x16a] sm:$0xff] }
 0x18f   : > { %1933 = vmatmul.mubr.f32.gmra.mrb[22].mxu0 %v7762_v34 }
 0x190   : > { %1937 = vmatprep.mubr.f32.mxu0 %v7606_v42  ;;  %5836 = vmatpush1.bf16.msra.mxu0 %v5835_v13  ;;  %v1537_v42 = vld [vmem:[#allocation10 + $0x2e8] sm:$0xff]  ;;  %v1583_v13 = vld [vmem:[#allocation10 + $0x458] sm:$0xff] }
 0x191   : > { %5837 = vmatprep.subr.bf16.mxu0 %v9004_v0  ;;  %v5844_v7 = vpack.c.bf16 %v1537_v42, %v1536_v16  ;;  %v1587_v16 = vld [vmem:[#allocation10 + $0x478] sm:$0xff] }
 0x193   : > { %1938 = vmatmul.mubr.f32.gmra.mrb[24].mxu0 %v7767_v12 }
 0x194   : > { %1942 = vmatprep.mubr.f32.mxu0 %v7612_v24  ;;  %5839 = vmatpush1.bf16.msra.mxu0 %v5838_v35  ;;  %v1539_v24 = vld [vmem:[#allocation10 + $0x2f8] sm:$0xff]  ;;  %v1584_v35 = vld [vmem:[#allocation10 + $0x460] sm:$0xff] }
 0x195   : > { %5840 = vmatprep.subr.bf16.mxu0 %v9004_v0  ;;  %v5847_v27 = vpack.c.bf16 %v1539_v24, %v1538_v17  ;;  %v1540_v17 = vld [vmem:[#allocation10 + $0x300] sm:$0xff]  ;;  %v1541_v24 = vld [vmem:[#allocation10 + $0x308] sm:$0xff] }
 0x197   : > { %1943 = vmatmul.mubr.f32.gmra.mrb[26].mxu0 %v7772_v46 }
 0x198   : > { %1947 = vmatprep.mubr.f32.mxu0 %v7618_v23  ;;  %5842 = vmatpush1.bf16.msra.mxu0 %v5841_v56  ;;  %v7787_v23 = vld [vmem:[#allocation2 + $0xc2] sm:$0xff] }
 0x199   : > { %5843 = vmatprep.subr.bf16.mxu0 %v9004_v0  ;;  %v7848_v56 = vld [vmem:[#allocation2 + $0x188] sm:$0xff] }
 0x19b   : > { %1948 = vmatmul.mubr.f32.gmra.mrb[28].mxu0 %v7777_v62 }
 0x19c   : > { %1952 = vmatprep.mubr.f32.mxu0 %v7624_v29  ;;  %5845 = vmatpush1.bf16.msra.mxu0 %v5844_v7  ;;  %v7792_v29 = vld [vmem:[#allocation2 + $0xca] sm:$0xff]  ;;  %v7852_v7 = vld [vmem:[#allocation2 + $0x172] sm:$0xff] }
 0x19d   : > { %5846 = vmatprep.subr.bf16.mxu0 %v9004_v0 }
 0x19f   : > { %1953 = vmatmul.mubr.f32.gmra.mrb[30].mxu0 %v7782_v20 }
 0x1a0   : > { %1957 = vmatprep.mubr.f32.mxu0 %v7629_v45  ;;  %5848 = vmatpush1.bf16.msra.mxu0 %v5847_v27  ;;  %v7800_v45 = vld [vmem:[#allocation2 + $0xe2] sm:$0xff]  ;;  %v835_v27 = vld [vmem:[#allocation2 + $0x19] sm:$0xff] }
 0x1a1   : > { %5849 = vmatprep.subr.bf16.mxu0 %v9004_v0 }
 0x1a3   : > { %1958 = vmatmul.mubr.f32.gmra.mrb[32].mxu0 %v7787_v23 }
 0x1a4   : > { %1962 = vmatprep.mubr.f32.mxu0 %v7634_v52  ;;  %v7808_v52 = vld [vmem:[#allocation2 + $0xfa] sm:$0xff] }
 0x1a7   : > { %1963 = vmatmul.mubr.f32.gmra.mrb[34].mxu0 %v7792_v29 }
 0x1a8   : > { %1967 = vmatprep.mubr.f32.mxu0 %v7639_v61  ;;  %v7812_v61 = vld [vmem:[#allocation2 + $0x10a] sm:$0xff] }
 0x1ab   : > { %1968 = vmatmul.mubr.f32.gmra.mrb[36].mxu0 %v7796_v40 }
 0x1ac   : > { %1972 = vmatprep.mubr.f32.mxu0 %v7644_v54  ;;  %v7816_v54 = vld [vmem:[#allocation2 + $0x112] sm:$0xff] }
 0x1af   : > { %1973 = vmatmul.mubr.f32.gmra.mrb[38].mxu0 %v7800_v45 }
 0x1b0   : > { %1977 = vmatprep.mubr.f32.mxu0 %v7649_v33  ;;  %v1572_v33 = vld [vmem:[#allocation10 + $0x400] sm:$0xff] }
 0x1b1   : > { %v5897_v39 = vpack.c.bf16 %v1573_v51, %v1572_v33  ;;  %v5850_v33 = vpack.c.bf16 %v1541_v24, %v1540_v17  ;;  %v1542_v51 = vld [vmem:[#allocation10 + $0x310] sm:$0xff]  ;;  %v7906_v17 = vld [vmem:[#allocation2 + $0x79] sm:$0xff] }
 0x1b2   : > { %v1558_v24 = vld [vmem:[#allocation10 + $0x390] sm:$0xff] }
 0x1b3   : > { %1978 = vmatmul.mubr.f32.gmra.mrb[40].mxu0 %v7804_v3  ;;  %5898 = vmatprep.subr.bf16.mxu1 %v5897_v39 }
 0x1b4   : > { %1982 = vmatprep.mubr.f32.mxu0 %v7654_v49  ;;  %v7820_v49 = vld [vmem:[#allocation2 + $0x122] sm:$0xff]  ;;  %5900 = vmatpush3.bf16.msra.mxu1 %v5897_v39  ;;  %v1543_v39 = vld [vmem:[#allocation10 + $0x318] sm:$0xff] }
 0x1b7   : > { %1983 = vmatmul.mubr.f32.gmra.mrb[42].mxu0 %v7808_v52 }
 0x1b8   : > { %1987 = vmatprep.mubr.f32.mxu0 %v7659_v59  ;;  %v1574_v59 = vld [vmem:[#allocation10 + $0x410] sm:$0xff] }
 0x1b9   : > { %v5901_v10 = vpack.c.bf16 %v1575_v8, %v1574_v59  ;;  %v836_v59 = vld [vmem:[#allocation2 + $0x21] sm:$0xff]  ;;  %v5853_v8 = vpack.c.bf16 %v1543_v39, %v1542_v51  ;;  %v1560_v51 = vld [vmem:[#allocation10 + $0x3a0] sm:$0xff] }
 0x1ba   : > { %v1561_v39 = vld [vmem:[#allocation10 + $0x3a8] sm:$0xff] }
 0x1bb   : > { %1988 = vmatmul.mubr.f32.gmra.mrb[44].mxu0 %v7812_v61  ;;  %5902 = vmatprep.subr.bf16.mxu1 %v5901_v10 }
 0x1bc   : > { %1992 = vmatprep.mubr.f32.mxu0 %v7664_v26  ;;  %v7824_v26 = vld [vmem:[#allocation2 + $0x12a] sm:$0xff]  ;;  %5904 = vmatpush3.bf16.msra.mxu1 %v5901_v10  ;;  %v1544_v10 = vld [vmem:[#allocation10 + $0x320] sm:$0xff] }
 0x1bf   : > { %1993 = vmatmul.mubr.f32.gmra.mrb[46].mxu0 %v7816_v54 }
 0x1c0   : > { %1997 = vmatprep.mubr.f32.mxu0 %v7669_v55  ;;  %v5905_v55 = vpack.c.bf16 %v1577_v18, %v1576_v5  ;;  %v1545_v5 = vld [vmem:[#allocation10 + $0x328] sm:$0xff] }
 0x1c1   : > { %v5856_v18 = vpack.c.bf16 %v1545_v5, %v1544_v10  ;;  %v1563_v10 = vld [vmem:[#allocation10 + $0x3b8] sm:$0xff]  ;;  %v7927_v5 = vld [vmem:[#allocation2 + $0x99] sm:$0xff] }
 0x1c2   : > { %5906 = vmatprep.subr.bf16.mxu1 %v5905_v55 }
 0x1c3   : > { %1998 = vmatmul.mubr.f32.gmra.mrb[48].mxu0 %v7820_v49  ;;  %5908 = vmatpush3.bf16.msra.mxu1 %v5905_v55  ;;  %v1547_v55 = vld [vmem:[#allocation10 + $0x338] sm:$0xff] }
 0x1c4   : > { %2002 = vmatprep.mubr.f32.mxu0 %v7675_v25  ;;  %v5909_v25 = vpack.c.bf16 %v1579_v15, %v1578_v1  ;;  %v7871_v1 = vld [vmem:[#allocation2 + $0x39] sm:$0xff] }
 0x1c5   : > { %v1548_v15 = vld [vmem:[#allocation10 + $0x340] sm:$0xff] }
 0x1c6   : > { %5910 = vmatprep.subr.bf16.mxu1 %v5909_v25 }
 0x1c7   : > { %2003 = vmatmul.mubr.f32.gmra.mrb[50].mxu0 %v7824_v26  ;;  %5912 = vmatpush3.bf16.msra.mxu1 %v5909_v25  ;;  %v1549_v25 = vld [vmem:[#allocation10 + $0x348] sm:$0xff] }
 0x1c8   : > { %2007 = vmatprep.mubr.f32.mxu0 %v7686_v41  ;;  %v5913_v41 = vpack.c.bf16 %v1581_v11, %v1580_v36  ;;  %v7878_v36 = vld [vmem:[#allocation2 + $0x49] sm:$0xff] }
 0x1c9   : > { %v1550_v11 = vld [vmem:[#allocation10 + $0x350] sm:$0xff] }
 0x1ca   : > { %5914 = vmatprep.subr.bf16.mxu1 %v5913_v41 }
 0x1cb   : > { %2008 = vmatmul.mubr.f32.gmra.mrb[52].mxu0 %v7828_v63  ;;  %5916 = vmatpush3.bf16.msra.mxu1 %v5913_v41  ;;  %v1551_v41 = vld [vmem:[#allocation10 + $0x358] sm:$0xff] }
 0x1cc   : > { %2012 = vmatprep.mubr.f32.mxu0 %v7699_v30  ;;  %v5917_v30 = vpack.c.bf16 %v1583_v13, %v1582_v31  ;;  %v7885_v31 = vld [vmem:[#allocation2 + $0x51] sm:$0xff] }
 0x1cd   : > { %v1552_v13 = vld [vmem:[#allocation10 + $0x360] sm:$0xff] }
 0x1ce   : > { %5918 = vmatprep.subr.bf16.mxu1 %v5917_v30 }
 0x1cf   : > { %2013 = vmatmul.mubr.f32.gmra.mrb[54].mxu0 %v7832_v28  ;;  %5920 = vmatpush3.bf16.msra.mxu1 %v5917_v30  ;;  %v1553_v30 = vld [vmem:[#allocation10 + $0x368] sm:$0xff] }
 0x1d0   : > { %2017 = vmatprep.mubr.f32.mxu0 %v7707_v21  ;;  %v5921_v21 = vpack.c.bf16 %v1585_v38, %v1584_v35  ;;  %v7892_v35 = vld [vmem:[#allocation2 + $0x61] sm:$0xff] }
 0x1d1   : > { %v1554_v38 = vld [vmem:[#allocation10 + $0x370] sm:$0xff] }
 0x1d2   : > { %5922 = vmatprep.subr.bf16.mxu1 %v5921_v21 }
 0x1d3   : > { %2018 = vmatmul.mubr.f32.gmra.mrb[56].mxu0 %v7836_v22  ;;  %5924 = vmatpush3.bf16.msra.mxu1 %v5921_v21  ;;  %v1555_v21 = vld [vmem:[#allocation10 + $0x378] sm:$0xff] }
 0x1d4   : > { %2022 = vmatprep.mubr.f32.mxu0 %v7712_v19  ;;  %v1586_v19 = vld [vmem:[#allocation10 + $0x470] sm:$0xff] }
 0x1d5   : > { %v5925_v42 = vpack.c.bf16 %v1587_v16, %v1586_v19  ;;  %v7899_v19 = vld [vmem:[#allocation2 + $0x69] sm:$0xff]  ;;  %v1556_v16 = vld [vmem:[#allocation10 + $0x380] sm:$0xff] }
 0x1d7   : > { %2023 = vmatmul.mubr.f32.gmra.mrb[58].mxu0 %v7840_v2  ;;  %5926 = vmatprep.subr.bf16.mxu1 %v5925_v42 }
 0x1d8   : > { %2027 = vmatprep.mubr.f32.mxu0 %v7842_v37  ;;  %5928 = vmatpush3.bf16.msra.mxu1 %v5925_v42  ;;  %v1557_v42 = vld [vmem:[#allocation10 + $0x388] sm:$0xff] }
 0x1d9   : > { %5929 = vmatprep.subr.bf16.mxu1 %v9004_v0 }
 0x1db   : > { %2028 = vmatmul.mubr.f32.gmra.mrb[60].mxu0 %v7846_v47  ;;  %5578 = vmatmul.mubr.f32.vlgmr.msra.gmra.mrb[0].mxu1 %v7732_v58 }
 0x1dc   : > { %2032 = vmatprep.mubr.f32.mxu0 %v7848_v56  ;;  %5580 = vmatprep.mubr.f32.mxu1 %v7737_v44 }
 0x1df   : > { %2033 = vmatmul.mubr.f32.gmra.mrb[62].mxu0 %v7852_v7  ;;  %5581 = vmatmul.mubr.f32.gmra.mrb[2].mxu1 %v7742_v57 }
 0x1e0   : > { %2102 = vmatprep.mubr.f32.mxu0 %v7719_v43  ;;  %5583 = vmatprep.mubr.f32.mxu1 %v7747_v48  ;;  %v7864_v43 = vld [vmem:[#allocation2 + $0x31] sm:$0xff] }
 0x1e3   : > { %2103 = vmatmul.mubr.f32.vlgmr.msra.gmra.mrb[0].mxu0 %v835_v27  ;;  %5584 = vmatmul.mubr.f32.gmra.mrb[4].mxu1 %v7752_v50  ;;  %v1559_v27 = vld [vmem:[#allocation10 + $0x398] sm:$0xff] }
 0x1e4   : > { %5851 = vmatpush1.bf16.msra.mxu0 %v5850_v33  ;;  %2107 = vmatprep.mubr.f32.mxu0 %v7724_v6  ;;  %v1546_v6 = vld [vmem:[#allocation10 + $0x330] sm:$0xff] }
 0x1e5   : > { %5852 = vmatprep.subr.bf16.mxu0 %v9004_v0  ;;  %5586 = vmatprep.mubr.f32.mxu1 %v7757_v53  ;;  %v7913_v33 = vld [vmem:[#allocation2 + $0x81] sm:$0xff] }
 0x1e7   : > { %2108 = vmatmul.mubr.f32.gmra.mrb[2].mxu0 %v836_v59  ;;  %5587 = vmatmul.mubr.f32.gmra.mrb[6].mxu1 %v7762_v34  ;;  %v7920_v59 = vld [vmem:[#allocation2 + $0x91] sm:$0xff] }
 0x1e8   : > { %2112 = vmatprep.mubr.f32.mxu0 %v7545_v32  ;;  %5854 = vmatpush1.bf16.msra.mxu0 %v5853_v8  ;;  %v5859_v32 = vpack.c.bf16 %v1547_v55, %v1546_v6  ;;  %v1562_v8 = vld [vmem:[#allocation10 + $0x3b0] sm:$0xff]  ;;  %v1565_v6 = vld [vmem:[#allocation10 + $0x3c8] sm:$0xff] }
 0x1e9   : > { %5855 = vmatprep.subr.bf16.mxu0 %v9004_v0  ;;  %5589 = vmatprep.mubr.f32.mxu1 %v7767_v12  ;;  %v7934_v55 = vld [vmem:[#allocation2 + $0xa9] sm:$0xff] }
 0x1eb   : > { %2113 = vmatmul.mubr.f32.gmra.mrb[4].mxu0 %v7864_v43  ;;  %5590 = vmatmul.mubr.f32.gmra.mrb[8].mxu1 %v7772_v46 }
 0x1ec   : > { %2117 = vmatprep.mubr.f32.mxu0 %v7732_v58  ;;  %5857 = vmatpush1.bf16.msra.mxu0 %v5856_v18  ;;  %v5862_v58 = vpack.c.bf16 %v1549_v25, %v1548_v15  ;;  %v1564_v18 = vld [vmem:[#allocation10 + $0x3c0] sm:$0xff]  ;;  %v1567_v15 = vld [vmem:[#allocation10 + $0x3d8] sm:$0xff] }
 0x1ed   : > { %5858 = vmatprep.subr.bf16.mxu0 %v9004_v0  ;;  %5592 = vmatprep.mubr.f32.mxu1 %v7777_v62  ;;  %v7941_v25 = vld [vmem:[#allocation2 + $0xb1] sm:$0xff] }
 0x1ef   : > { %2118 = vmatmul.mubr.f32.gmra.mrb[6].mxu0 %v7871_v1  ;;  %5593 = vmatmul.mubr.f32.gmra.mrb[10].mxu1 %v7782_v20 }
 0x1f0   : > { %2122 = vmatprep.mubr.f32.mxu0 %v7737_v44  ;;  %5860 = vmatpush1.bf16.msra.mxu0 %v5859_v32  ;;  %v5865_v44 = vpack.c.bf16 %v1551_v41, %v1550_v11  ;;  %v1566_v32 = vld [vmem:[#allocation10 + $0x3d0] sm:$0xff]  ;;  %v1569_v11 = vld [vmem:[#allocation10 + $0x3e8] sm:$0xff] }
 0x1f1   : > { %5861 = vmatprep.subr.bf16.mxu0 %v9004_v0  ;;  %5595 = vmatprep.mubr.f32.mxu1 %v7787_v23  ;;  %v7944_v41 = vld [vmem:[#allocation2 + $0x182] sm:$0xff] }
 0x1f3   : > { %2123 = vmatmul.mubr.f32.gmra.mrb[8].mxu0 %v7878_v36  ;;  %5596 = vmatmul.mubr.f32.gmra.mrb[12].mxu1 %v7792_v29 }
 0x1f4   : > { %2127 = vmatprep.mubr.f32.mxu0 %v7742_v57  ;;  %5863 = vmatpush1.bf16.msra.mxu0 %v5862_v58  ;;  %v5868_v57 = vpack.c.bf16 %v1553_v30, %v1552_v13  ;;  %v1568_v58 = vld [vmem:[#allocation10 + $0x3e0] sm:$0xff]  ;;  %v930_v13 = vld [vmem:[#allocation2 + $0x18a] sm:$0xff] }
 0x1f5   : > { %5864 = vmatprep.subr.bf16.mxu0 %v9004_v0  ;;  %5598 = vmatprep.mubr.f32.mxu1 %v7796_v40  ;;  %v1570_v30 = vld [vmem:[#allocation10 + $0x3f0] sm:$0xff] }
 0x1f7   : > { %2128 = vmatmul.mubr.f32.gmra.mrb[10].mxu0 %v7885_v31  ;;  %5599 = vmatmul.mubr.f32.gmra.mrb[14].mxu1 %v7800_v45 }
 0x1f8   : > { %2132 = vmatprep.mubr.f32.mxu0 %v7747_v48  ;;  %5866 = vmatpush1.bf16.msra.mxu0 %v5865_v44  ;;  %v5871_v48 = vpack.c.bf16 %v1555_v21, %v1554_v38  ;;  %v7950_v44 = vld [vmem:[#allocation2 + $0xc1] sm:$0xff]  ;;  %v7955_v38 = vld [vmem:[#allocation2 + $0xc9] sm:$0xff] }
 0x1f9   : > { %5867 = vmatprep.subr.bf16.mxu0 %v9004_v0  ;;  %5601 = vmatprep.mubr.f32.mxu1 %v7804_v3 }
 0x1fb   : > { %2133 = vmatmul.mubr.f32.gmra.mrb[12].mxu0 %v7892_v35  ;;  %5602 = vmatmul.mubr.f32.gmra.mrb[16].mxu1 %v7808_v52 }
 0x1fc   : > { %2137 = vmatprep.mubr.f32.mxu0 %v7752_v50  ;;  %5869 = vmatpush1.bf16.msra.mxu0 %v5868_v57  ;;  %v5874_v50 = vpack.c.bf16 %v1557_v42, %v1556_v16  ;;  %v1571_v57 = vld [vmem:[#allocation10 + $0x3f8] sm:$0xff]  ;;  %v6651_v16 = vld [vmem:[#allocation2 + $0xf9] sm:$0xff] }
 0x1fd   : > { %5870 = vmatprep.subr.bf16.mxu0 %v9004_v0  ;;  %5604 = vmatprep.mubr.f32.mxu1 %v7812_v61  ;;  %v5895_v21 = vpack.c.bf16 %v1571_v57, %v1570_v30  ;;  %v6652_v42 = vld [vmem:[#allocation2 + $0x109] sm:$0xff] }
 0x1fe   : > { %v3907_v57 = vld [vmem:[#allocation10 + $0x510] sm:$0xff] }
 0x1ff   : > { %2138 = vmatmul.mubr.f32.gmra.mrb[14].mxu0 %v7899_v19  ;;  %5605 = vmatmul.mubr.f32.gmra.mrb[18].mxu1 %v7816_v54 }
 0x200   : > { %2142 = vmatprep.mubr.f32.mxu0 %v7757_v53  ;;  %5872 = vmatpush1.bf16.msra.mxu0 %v5871_v48  ;;  %v5877_v53 = vpack.c.bf16 %v1559_v27, %v1558_v24  ;;  %v6649_v48 = vld [vmem:[#allocation2 + $0xe1] sm:$0xff]  ;;  %v3892_v27 = vld [vmem:[#allocation10 + $0x498] sm:$0xff] }
 0x201   : > { %5873 = vmatprep.subr.bf16.mxu0 %v9004_v0  ;;  %5607 = vmatprep.mubr.f32.mxu1 %v7820_v49 }
 0x203   : > { %2143 = vmatmul.mubr.f32.gmra.mrb[16].mxu0 %v7906_v17  ;;  %5608 = vmatmul.mubr.f32.gmra.mrb[20].mxu1 %v7824_v26 }
 0x204   : > { %2147 = vmatprep.mubr.f32.mxu0 %v7762_v34  ;;  %5875 = vmatpush1.bf16.msra.mxu0 %v5874_v50  ;;  %v5880_v34 = vpack.c.bf16 %v1561_v39, %v1560_v51  ;;  %v1122_v50 = vld [vmem:[#allocation2 + $0x19a] sm:$0xff]  ;;  %v966_v39 = vld [vmem:[#allocation2 + $0x48] sm:$0xff] }
 0x205   : > { %5876 = vmatprep.subr.bf16.mxu0 %v9004_v0  ;;  %5610 = vmatprep.mubr.f32.mxu1 %v7828_v63  ;;  %v3893_v51 = vld [vmem:[#allocation10 + $0x4a0] sm:$0xff] }
 0x206   : > { %v5936_v14 = vpack.c.bf16 %v3894_v60, %v3893_v51  ;;  %v3916_v51 = vld [vmem:[#allocation10 + $0x558] sm:$0xff] }
 0x207   : > { %2148 = vmatmul.mubr.f32.gmra.mrb[18].mxu0 %v7913_v33  ;;  %5611 = vmatmul.mubr.f32.gmra.mrb[22].mxu1 %v7832_v28  ;;  %v1049_v60 = vld [vmem:[#allocation2 + $0x129] sm:$0xff] }
 0x208   : > { %2152 = vmatprep.mubr.f32.mxu0 %v7767_v12  ;;  %5878 = vmatpush1.bf16.msra.mxu0 %v5877_v53  ;;  %v5883_v12 = vpack.c.bf16 %v1563_v10, %v1562_v8  ;;  %v3897_v8 = vld [vmem:[#allocation10 + $0x4c0] sm:$0xff]  ;;  %v3898_v10 = vld [vmem:[#allocation10 + $0x4c8] sm:$0xff] }
 0x209   : > { %5879 = vmatprep.subr.bf16.mxu0 %v9004_v0  ;;  %5613 = vmatprep.mubr.f32.mxu1 %v7836_v22 }
 0x20b   : > { %2153 = vmatmul.mubr.f32.gmra.mrb[20].mxu0 %v7920_v59  ;;  %5614 = vmatmul.mubr.f32.gmra.mrb[24].mxu1 %v7840_v2 }
 0x20c   : > { %2157 = vmatprep.mubr.f32.mxu0 %v7772_v46  ;;  %5881 = vmatpush1.bf16.msra.mxu0 %v5880_v34  ;;  %v5886_v46 = vpack.c.bf16 %v1565_v6, %v1564_v18  ;;  %v3899_v18 = vld [vmem:[#allocation10 + $0x4d0] sm:$0xff]  ;;  %v3900_v6 = vld [vmem:[#allocation10 + $0x4d8] sm:$0xff] }
 0x20d   : > { %5882 = vmatprep.subr.bf16.mxu0 %v9004_v0  ;;  %5616 = vmatprep.mubr.f32.mxu1 %v7846_v47 }
 0x20f   : > { %2158 = vmatmul.mubr.f32.gmra.mrb[22].mxu0 %v7927_v5  ;;  %5617 = vmatmul.mubr.f32.gmra.mrb[26].mxu1 %v7852_v7 }
 0x210   : > { %2162 = vmatprep.mubr.f32.mxu0 %v7777_v62  ;;  %5884 = vmatpush1.bf16.msra.mxu0 %v5883_v12  ;;  %v5889_v62 = vpack.c.bf16 %v1567_v15, %v1566_v32  ;;  %v5942_v12 = vpack.c.bf16 %v3898_v10, %v3897_v8  ;;  %v3901_v32 = vld [vmem:[#allocation10 + $0x4e0] sm:$0xff]  ;;  %v3902_v15 = vld [vmem:[#allocation10 + $0x4e8] sm:$0xff] }
 0x211   : > { %5885 = vmatprep.subr.bf16.mxu0 %v9004_v0  ;;  %5619 = vmatprep.mubr.f32.mxu1 %v7944_v41  ;;  %v4017_v10 = vld [vmem:[#allocation10 + $0x880] sm:$0xff] }
 0x213   : > { %2163 = vmatmul.mubr.f32.gmra.mrb[24].mxu0 %v7934_v55  ;;  %5620 = vmatmul.mubr.f32.gmra.mrb[28].mxu1 %v930_v13 }
 0x214   : > { %2167 = vmatprep.mubr.f32.mxu0 %v7782_v20  ;;  %5887 = vmatpush1.bf16.msra.mxu0 %v5886_v46  ;;  %v5892_v20 = vpack.c.bf16 %v1569_v11, %v1568_v58  ;;  %v5945_v46 = vpack.c.bf16 %v3900_v6, %v3899_v18  ;;  %v3903_v58 = vld [vmem:[#allocation10 + $0x4f0] sm:$0xff]  ;;  %v3904_v11 = vld [vmem:[#allocation10 + $0x4f8] sm:$0xff]  ;;  %v986_v6 = vld [vmem:[#allocation2 + $0x138] sm:$0xff] }
 0x215   : > { %5888 = vmatprep.subr.bf16.mxu0 %v9004_v0  ;;  %5622 = vmatprep.mubr.f32.mxu1 %v1122_v50  ;;  %v1047_v50 = vld [vmem:[#allocation2 + $0x111] sm:$0xff] }
 0x217   : > { %2168 = vmatmul.mubr.f32.gmra.mrb[26].mxu0 %v7941_v25 }
 0x218   : > { %2172 = vmatprep.mubr.f32.mxu0 %v7787_v23  ;;  %5890 = vmatpush1.bf16.msra.mxu0 %v5889_v62  ;;  %v6648_v23 = vld [vmem:[#allocation2 + $0xd9] sm:$0xff]  ;;  %v5948_v62 = vpack.c.bf16 %v3902_v15, %v3901_v32  ;;  %v1051_v32 = vld [vmem:[#allocation2 + $0x141] sm:$0xff] }
 0x219   : > { %5891 = vmatprep.subr.bf16.mxu0 %v9004_v0  ;;  %v4019_v15 = vld [vmem:[#allocation10 + $0x890] sm:$0xff] }
 0x21b   : > { %2173 = vmatmul.mubr.f32.gmra.mrb[28].mxu0 %v7950_v44 }
 0x21c   : > { %2177 = vmatprep.mubr.f32.mxu0 %v7792_v29  ;;  %5893 = vmatpush1.bf16.msra.mxu0 %v5892_v20  ;;  %v6650_v29 = vld [vmem:[#allocation2 + $0xf1] sm:$0xff] }
 0x21d   : > { %5894 = vmatprep.subr.bf16.mxu0 %v9004_v0  ;;  %v3905_v20 = vld [vmem:[#allocation10 + $0x500] sm:$0xff] }
 0x21f   : > { %2178 = vmatmul.mubr.f32.gmra.mrb[30].mxu0 %v7955_v38 }
 0x220   : > { %2182 = vmatprep.mubr.f32.mxu0 %v7796_v40  ;;  %5896 = vmatpush1.bf16.msra.mxu0 %v5895_v21  ;;  %v6653_v40 = vld [vmem:[#allocation2 + $0x111] sm:$0xff] }
 0x221   : > { %v3908_v21 = vld [vmem:[#allocation10 + $0x518] sm:$0xff] }
 0x223   : > { %2183 = vmatmul.mubr.f32.gmra.mrb[32].mxu0 %v6648_v23  ;;  %v5957_v23 = vpack.c.bf16 %v3908_v21, %v3907_v57  ;;  %v8025_v21 = vld [vmem:[#allocation2] sm:$0xff] }
 0x224   : > { %2187 = vmatprep.mubr.f32.mxu0 %v7800_v45  ;;  %v6654_v45 = vld [vmem:[#allocation2 + $0x121] sm:$0xff] }
 0x227   : > { %2188 = vmatmul.mubr.f32.gmra.mrb[34].mxu0 %v6649_v48  ;;  %v3909_v48 = vld [vmem:[#allocation10 + $0x520] sm:$0xff] }
 0x228   : > { %2192 = vmatprep.mubr.f32.mxu0 %v7804_v3  ;;  %v6655_v3 = vld [vmem:[#allocation2 + $0x129] sm:$0xff] }
 0x22b   : > { %2193 = vmatmul.mubr.f32.gmra.mrb[36].mxu0 %v6650_v29  ;;  %v3910_v29 = vld [vmem:[#allocation10 + $0x528] sm:$0xff] }
 0x22c   : > { %2197 = vmatprep.mubr.f32.mxu0 %v7808_v52  ;;  %v6656_v52 = vld [vmem:[#allocation2 + $0x139] sm:$0xff] }
 0x22f   : > { %2198 = vmatmul.mubr.f32.gmra.mrb[38].mxu0 %v6651_v16  ;;  %v5960_v16 = vpack.c.bf16 %v3910_v29, %v3909_v48  ;;  %v1053_v48 = vld [vmem:[#allocation2 + $0x159] sm:$0xff]  ;;  %v4023_v29 = vld [vmem:[#allocation10 + $0x8b0] sm:$0xff] }
 0x230   : > { %2202 = vmatprep.mubr.f32.mxu0 %v7812_v61  ;;  %v6657_v61 = vld [vmem:[#allocation2 + $0x141] sm:$0xff] }
 0x233   : > { %2203 = vmatmul.mubr.f32.gmra.mrb[40].mxu0 %v6652_v42  ;;  %v974_v42 = vld [vmem:[#allocation2 + $0xa8] sm:$0xff] }
 0x234   : > { %2207 = vmatprep.mubr.f32.mxu0 %v7816_v54  ;;  %v6658_v54 = vld [vmem:[#allocation2 + $0x151] sm:$0xff] }
 0x237   : > { %2208 = vmatmul.mubr.f32.gmra.mrb[42].mxu0 %v6653_v40  ;;  %v977_v40 = vld [vmem:[#allocation2 + $0xc8] sm:$0xff] }
 0x238   : > { %2212 = vmatprep.mubr.f32.mxu0 %v7820_v49  ;;  %v6659_v49 = vld [vmem:[#allocation2 + $0x159] sm:$0xff] }
 0x23b   : > { %2213 = vmatmul.mubr.f32.gmra.mrb[44].mxu0 %v6654_v45  ;;  %v1042_v45 = vld [vmem:[#allocation2 + $0xd9] sm:$0xff] }
 0x23c   : > { %2217 = vmatprep.mubr.f32.mxu0 %v7824_v26  ;;  %v6660_v26 = vld [vmem:[#allocation2 + $0x169] sm:$0xff] }
 0x23f   : > { %2218 = vmatmul.mubr.f32.gmra.mrb[46].mxu0 %v6655_v3  ;;  %v1043_v3 = vld [vmem:[#allocation2 + $0xe1] sm:$0xff] }
 0x240   : > { %2222 = vmatprep.mubr.f32.mxu0 %v7828_v63  ;;  %v6661_v63 = vld [vmem:[#allocation2 + $0x171] sm:$0xff] }
 0x243   : > { %2223 = vmatmul.mubr.f32.gmra.mrb[48].mxu0 %v6656_v52  ;;  %v979_v52 = vld [vmem:[#allocation2 + $0xe0] sm:$0xff] }
 0x244   : > { %2227 = vmatprep.mubr.f32.mxu0 %v7832_v28  ;;  %v1123_v28 = vld [vmem:[#allocation2 + $0x1a2] sm:$0xff] }
 0x245   : > { %5623 = vmatmul.mubr.f32.gmra.mrb[30].mxu1 %v1123_v28 }
 0x247   : > { %2228 = vmatmul.mubr.f32.gmra.mrb[50].mxu0 %v6657_v61  ;;  %v1044_v61 = vld [vmem:[#allocation2 + $0xf1] sm:$0xff] }
 0x248   : > { %2232 = vmatprep.mubr.f32.mxu0 %v7836_v22  ;;  %v3889_v22 = vld [vmem:[#allocation10 + $0x480] sm:$0xff] }
 0x24b   : > { %2233 = vmatmul.mubr.f32.gmra.mrb[52].mxu0 %v6658_v54  ;;  %v1045_v54 = vld [vmem:[#allocation2 + $0xf9] sm:$0xff] }
 0x24c   : > { %2237 = vmatprep.mubr.f32.mxu0 %v7840_v2  ;;  %v3890_v2 = vld [vmem:[#allocation10 + $0x488] sm:$0xff] }
 0x24d   : > { %v5930_v24 = vpack.c.bf16 %v3890_v2, %v3889_v22  ;;  %v983_v22 = vld [vmem:[#allocation2 + $0x110] sm:$0xff] }
 0x24e   : > { %v3913_v2 = vld [vmem:[#allocation10 + $0x540] sm:$0xff] }
 0x24f   : > { %2238 = vmatmul.mubr.f32.gmra.mrb[54].mxu0 %v6659_v49  ;;  %5931 = vmatpush1.bf16.msra.mxu1 %v5930_v24  ;;  %v1046_v49 = vld [vmem:[#allocation2 + $0x109] sm:$0xff] }
 0x250   : > { %2242 = vmatprep.mubr.f32.mxu0 %v7846_v47  ;;  %v3891_v47 = vld [vmem:[#allocation10 + $0x490] sm:$0xff]  ;;  %5932 = vmatprep.subr.bf16.mxu1 %v9004_v0 }
 0x251   : > { %v5933_v53 = vpack.c.bf16 %v3892_v27, %v3891_v47  ;;  %v3914_v47 = vld [vmem:[#allocation10 + $0x548] sm:$0xff] }
 0x252   : > { %v5966_v24 = vpack.c.bf16 %v3914_v47, %v3913_v2  ;;  %v984_v27 = vld [vmem:[#allocation2 + $0x120] sm:$0xff]  ;;  %v4032_v47 = vld [vmem:[#allocation10 + $0x8f8] sm:$0xff] }
 0x253   : > { %2243 = vmatmul.mubr.f32.gmra.mrb[56].mxu0 %v6660_v26  ;;  %5934 = vmatpush1.bf16.msra.mxu1 %v5933_v53  ;;  %v3911_v26 = vld [vmem:[#allocation10 + $0x530] sm:$0xff] }
 0x254   : > { %2247 = vmatprep.mubr.f32.mxu0 %v7852_v7  ;;  %v964_v7 = vld [vmem:[#allocation2 + $0x30] sm:$0xff]  ;;  %5935 = vmatprep.subr.bf16.mxu1 %v9004_v0  ;;  %v3915_v53 = vld [vmem:[#allocation10 + $0x550] sm:$0xff] }
 0x255   : > { %v4031_v2 = vld [vmem:[#allocation10 + $0x8f0] sm:$0xff] }
 0x257   : > { %2248 = vmatmul.mubr.f32.gmra.mrb[58].mxu0 %v6661_v63  ;;  %5937 = vmatpush1.bf16.msra.mxu1 %v5936_v14  ;;  %v3912_v63 = vld [vmem:[#allocation10 + $0x538] sm:$0xff] }
 0x258   : > { %2252 = vmatprep.mubr.f32.mxu0 %v7944_v41  ;;  %5938 = vmatprep.subr.bf16.mxu1 %v9004_v0  ;;  %v5951_v41 = vpack.c.bf16 %v3904_v11, %v3903_v58  ;;  %v5963_v28 = vpack.c.bf16 %v3912_v63, %v3911_v26  ;;  %v985_v14 = vld [vmem:[#allocation2 + $0x128] sm:$0xff]  ;;  %v987_v11 = vld [vmem:[#allocation2 + $0x140] sm:$0xff]  ;;  %v4029_v63 = vld [vmem:[#allocation10 + $0x8e0] sm:$0xff] }
 0x25b   : > { %2253 = vmatmul.mubr.f32.gmra.mrb[60].mxu0 %v545_v4  ;;  %v965_v4 = vld [vmem:[#allocation2 + $0x38] sm:$0xff] }
 0x25c   : > { %2257 = vmatprep.mubr.f32.mxu0 %v930_v13  ;;  %v3906_v13 = vld [vmem:[#allocation10 + $0x508] sm:$0xff] }
 0x25d   : > { %v5954_v30 = vpack.c.bf16 %v3906_v13, %v3905_v20  ;;  %v1052_v20 = vld [vmem:[#allocation2 + $0x151] sm:$0xff] }
 0x25f   : > { %2258 = vmatmul.mubr.f32.gmra.mrb[62].mxu0 %v546_v9  ;;  %v3895_v9 = vld [vmem:[#allocation10 + $0x4b0] sm:$0xff] }
 0x260   : > { %2327 = vmatprep.mubr.f32.mxu0 %v7864_v43  ;;  %v3896_v43 = vld [vmem:[#allocation10 + $0x4b8] sm:$0xff] }
 0x261   : > { %v5939_v34 = vpack.c.bf16 %v3896_v43, %v3895_v9  ;;  %v3917_v43 = vld [vmem:[#allocation10 + $0x560] sm:$0xff] }
 0x263   : > { %2328 = vmatmul.mubr.f32.vlgmr.msra.gmra.mrb[0].mxu0 %v964_v7  ;;  %5940 = vmatpush1.bf16.msra.mxu1 %v5939_v34  ;;  %v1048_v7 = vld [vmem:[#allocation2 + $0x121] sm:$0xff]  ;;  %v1050_v34 = vld [vmem:[#allocation2 + $0x139] sm:$0xff] }
 0x264   : > { %2332 = vmatprep.mubr.f32.mxu0 %v7871_v1  ;;  %v967_v1 = vld [vmem:[#allocation2 + $0x50] sm:$0xff]  ;;  %5941 = vmatprep.subr.bf16.mxu1 %v9004_v0 }
 0x267   : > { %2333 = vmatmul.mubr.f32.gmra.mrb[2].mxu0 %v965_v4  ;;  %5943 = vmatpush1.bf16.msra.mxu1 %v5942_v12  ;;  %v5969_v4 = vpack.c.bf16 %v3916_v51, %v3915_v53  ;;  %v1058_v53 = vld [vmem:[#allocation2 + $0x199] sm:$0xff] }
 0x268   : > { %2337 = vmatprep.mubr.f32.mxu0 %v7878_v36  ;;  %v968_v36 = vld [vmem:[#allocation2 + $0x60] sm:$0xff]  ;;  %5944 = vmatprep.subr.bf16.mxu1 %v9004_v0 }
 0x26b   : > { %2338 = vmatmul.mubr.f32.gmra.mrb[4].mxu0 %v966_v39  ;;  %5946 = vmatpush1.bf16.msra.mxu1 %v5945_v46  ;;  %v3918_v39 = vld [vmem:[#allocation10 + $0x568] sm:$0xff]  ;;  %v3920_v46 = vld [vmem:[#allocation10 + $0x578] sm:$0xff] }
 0x26c   : > { %2342 = vmatprep.mubr.f32.mxu0 %v7885_v31  ;;  %v969_v31 = vld [vmem:[#allocation2 + $0x68] sm:$0xff]  ;;  %5947 = vmatprep.subr.bf16.mxu1 %v9004_v0  ;;  %v5972_v12 = vpack.c.bf16 %v3918_v39, %v3917_v43 }
 0x26d   : > { %v1059_v43 = vld [vmem:[#allocation2 + $0x1a1] sm:$0xff] }
 0x26f   : > { %2343 = vmatmul.mubr.f32.gmra.mrb[6].mxu0 %v967_v1  ;;  %5949 = vmatpush1.bf16.msra.mxu1 %v5948_v62  ;;  %v4018_v1 = vld [vmem:[#allocation10 + $0x888] sm:$0xff] }
 0x270   : > { %2347 = vmatprep.mubr.f32.mxu0 %v7892_v35  ;;  %v970_v35 = vld [vmem:[#allocation2 + $0x78] sm:$0xff]  ;;  %5950 = vmatprep.subr.bf16.mxu1 %v9004_v0  ;;  %v8010_v18 = vpack.c.bf16 %v4018_v1, %v4017_v10  ;;  %v3924_v10 = vld [vmem:[#allocation10 + $0x598] sm:$0xff] }
 0x272   : > { %9054 = vst [vmem:[#allocation18_spill] sm:$0xff] %v8010_v18  ;;  %6122 = vmatprep.subr.bf16.mxu0 %v8010_v18 }
 0x273   : > { %2348 = vmatmul.mubr.f32.gmra.mrb[8].mxu0 %v968_v36  ;;  %5952 = vmatpush1.bf16.msra.mxu1 %v5951_v41  ;;  %v3919_v36 = vld [vmem:[#allocation10 + $0x570] sm:$0xff] }
 0x274   : > { %2352 = vmatprep.mubr.f32.mxu0 %v7899_v19  ;;  %v971_v19 = vld [vmem:[#allocation2 + $0x80] sm:$0xff]  ;;  %5953 = vmatprep.subr.bf16.mxu1 %v9004_v0  ;;  %v5975_v62 = vpack.c.bf16 %v3920_v46, %v3919_v36 }
 0x275   : > { %6124 = vmatpush3.bf16.msra.mxu0 %v8010_v18  ;;  %v3088_v41 = vld [vmem:[#allocation2 + $0x1] sm:$0xff] }
 0x276   : > { %4097 = vmatprep.mubr.f32.mxu1 %v3088_v41  ;;  %v3926_v36 = vld [vmem:[#allocation10 + $0x5a8] sm:$0xff] }
 0x277   : > { %2353 = vmatmul.mubr.f32.gmra.mrb[10].mxu0 %v969_v31  ;;  %5955 = vmatpush1.bf16.msra.mxu1 %v5954_v30  ;;  %v4020_v31 = vld [vmem:[#allocation10 + $0x898] sm:$0xff]  ;;  %v4022_v30 = vld [vmem:[#allocation10 + $0x8a8] sm:$0xff] }
 0x278   : > { %2357 = vmatprep.mubr.f32.mxu0 %v7906_v17  ;;  %v972_v17 = vld [vmem:[#allocation2 + $0x90] sm:$0xff]  ;;  %5956 = vmatprep.subr.bf16.mxu1 %v9004_v0  ;;  %v8015_v58 = vpack.c.bf16 %v4020_v31, %v4019_v15  ;;  %v3927_v31 = vld [vmem:[#allocation10 + $0x5b0] sm:$0xff] }
 0x27a   : > { %9055 = vst [vmem:[#allocation19_spill] sm:$0xff] %v8015_v58  ;;  %6126 = vmatprep.subr.bf16.mxu0 %v8015_v58 }
 0x27b   : > { %2358 = vmatmul.mubr.f32.gmra.mrb[12].mxu0 %v970_v35  ;;  %5958 = vmatpush1.bf16.msra.mxu1 %v5957_v23  ;;  %v3089_v23 = vld [vmem:[#allocation2 + $0x9] sm:$0xff] }
 0x27c   : > { %2362 = vmatprep.mubr.f32.mxu0 %v7913_v33  ;;  %v973_v33 = vld [vmem:[#allocation2 + $0x98] sm:$0xff]  ;;  %5959 = vmatprep.subr.bf16.mxu1 %v9004_v0 }
 0x27d   : > { %6128 = vmatpush3.bf16.msra.mxu0 %v8015_v58 }
 0x27f   : > { %2363 = vmatmul.mubr.f32.gmra.mrb[14].mxu0 %v971_v19  ;;  %5961 = vmatpush1.bf16.msra.mxu1 %v5960_v16  ;;  %v4021_v19 = vld [vmem:[#allocation10 + $0x8a0] sm:$0xff] }
 0x280   : > { %2367 = vmatprep.mubr.f32.mxu0 %v7920_v59  ;;  %5962 = vmatprep.subr.bf16.mxu1 %v9004_v0  ;;  %v975_v59 = vld [vmem:[#allocation2 + $0xb0] sm:$0xff]  ;;  %v8023_v57 = vpack.c.bf16 %v4022_v30, %v4021_v19  ;;  %v3930_v30 = vld [vmem:[#allocation10 + $0x5c8] sm:$0xff] }
 0x281   : > { %v3929_v19 = vld [vmem:[#allocation10 + $0x5c0] sm:$0xff] }
 0x282   : > { %9056 = vst [vmem:[#allocation20_spill] sm:$0xff] %v8023_v57  ;;  %6130 = vmatprep.subr.bf16.mxu0 %v8023_v57 }
 0x283   : > { %2368 = vmatmul.mubr.f32.gmra.mrb[16].mxu0 %v972_v17  ;;  %5964 = vmatpush1.bf16.msra.mxu1 %v5963_v28  ;;  %v988_v17 = vld [vmem:[#allocation2 + $0x150] sm:$0xff] }
 0x284   : > { %2372 = vmatprep.mubr.f32.mxu0 %v7927_v5  ;;  %v976_v5 = vld [vmem:[#allocation2 + $0xc0] sm:$0xff]  ;;  %5965 = vmatprep.subr.bf16.mxu1 %v9004_v0 }
 0x285   : > { %6132 = vmatpush3.bf16.msra.mxu0 %v8023_v57 }
 0x287   : > { %2373 = vmatmul.mubr.f32.gmra.mrb[18].mxu0 %v973_v33  ;;  %5967 = vmatpush1.bf16.msra.mxu1 %v5966_v24  ;;  %v4024_v33 = vld [vmem:[#allocation10 + $0x8b8] sm:$0xff] }
 0x288   : > { %2377 = vmatprep.mubr.f32.mxu0 %v7934_v55  ;;  %v978_v55 = vld [vmem:[#allocation2 + $0xd8] sm:$0xff]  ;;  %5968 = vmatprep.subr.bf16.mxu1 %v9004_v0  ;;  %v8031_v16 = vpack.c.bf16 %v4024_v33, %v4023_v29  ;;  %v6664_v24 = vld [vmem:[#allocation2 + $0x189] sm:$0xff] }
 0x289   : > { %v3932_v29 = vld [vmem:[#allocation10 + $0x5d8] sm:$0xff] }
 0x28a   : > { %9057 = vst [vmem:[#allocation21_spill] sm:$0xff] %v8031_v16  ;;  %6134 = vmatprep.subr.bf16.mxu0 %v8031_v16 }
 0x28b   : > { %2378 = vmatmul.mubr.f32.gmra.mrb[20].mxu0 %v974_v42  ;;  %5970 = vmatpush1.bf16.msra.mxu1 %v5969_v4  ;;  %v989_v42 = vld [vmem:[#allocation2 + $0x158] sm:$0xff] }
 0x28c   : > { %2382 = vmatprep.mubr.f32.mxu0 %v7941_v25  ;;  %v980_v25 = vld [vmem:[#allocation2 + $0xf0] sm:$0xff]  ;;  %5971 = vmatprep.subr.bf16.mxu1 %v9004_v0  ;;  %v3922_v4 = vld [vmem:[#allocation10 + $0x588] sm:$0xff] }
 0x28d   : > { %6136 = vmatpush3.bf16.msra.mxu0 %v8031_v16 }
 0x28f   : > { %2383 = vmatmul.mubr.f32.gmra.mrb[22].mxu0 %v975_v59  ;;  %5973 = vmatpush1.bf16.msra.mxu1 %v5972_v12 }
 0x290   : > { %2387 = vmatprep.mubr.f32.mxu0 %v7950_v44  ;;  %v981_v44 = vld [vmem:[#allocation2 + $0xf8] sm:$0xff]  ;;  %5974 = vmatprep.subr.bf16.mxu1 %v9004_v0 }
 0x293   : > { %2388 = vmatmul.mubr.f32.gmra.mrb[24].mxu0 %v976_v5  ;;  %5976 = vmatpush1.bf16.msra.mxu1 %v5975_v62  ;;  %v1054_v5 = vld [vmem:[#allocation2 + $0x169] sm:$0xff] }
 0x294   : > { %2392 = vmatprep.mubr.f32.mxu0 %v7955_v38  ;;  %v982_v38 = vld [vmem:[#allocation2 + $0x108] sm:$0xff]  ;;  %5977 = vmatprep.subr.bf16.mxu1 %v9004_v0 }
 0x295   : > { %v3928_v62 = vld [vmem:[#allocation10 + $0x5b8] sm:$0xff] }
 0x296   : > { %4098 = vmatmul.mubr.f32.vlgmr.msra.gmra.mrb[32].mxu1 %v8025_v21 }
 0x297   : > { %2393 = vmatmul.mubr.f32.gmra.mrb[26].mxu0 %v977_v40  ;;  %4102 = vmatprep.mubr.f32.mxu1 %v3089_v23 }
 0x298   : > { %2397 = vmatprep.mubr.f32.mxu0 %v1042_v45  ;;  %v4025_v45 = vld [vmem:[#allocation10 + $0x8c0] sm:$0xff] }
 0x29a   : > { %4103 = vmatmul.mubr.f32.gmra.mrb[34].mxu1 %v8025_v21 }
 0x29b   : > { %2398 = vmatmul.mubr.f32.gmra.mrb[28].mxu0 %v978_v55  ;;  %v4026_v55 = vld [vmem:[#allocation10 + $0x8c8] sm:$0xff] }
 0x29c   : > { %2402 = vmatprep.mubr.f32.mxu0 %v1043_v3  ;;  %v8040_v3 = vpack.c.bf16 %v4026_v55, %v4025_v45  ;;  %v3933_v45 = vld [vmem:[#allocation10 + $0x5e0] sm:$0xff]  ;;  %v3934_v55 = vld [vmem:[#allocation10 + $0x5e8] sm:$0xff] }
 0x29e   : > { %9058 = vst [vmem:[#allocation22_spill] sm:$0xff] %v8040_v3  ;;  %6138 = vmatprep.subr.bf16.mxu0 %v8040_v3 }
 0x29f   : > { %2403 = vmatmul.mubr.f32.gmra.mrb[30].mxu0 %v979_v52  ;;  %v990_v52 = vld [vmem:[#allocation2 + $0x168] sm:$0xff] }
 0x2a0   : > { %2407 = vmatprep.mubr.f32.mxu0 %v1044_v61  ;;  %v1055_v61 = vld [vmem:[#allocation2 + $0x171] sm:$0xff]  ;;  %6140 = vmatpush3.bf16.msra.mxu0 %v8040_v3 }
 0x2a3   : > { %2408 = vmatmul.mubr.f32.gmra.mrb[32].mxu0 %v980_v25  ;;  %v4027_v25 = vld [vmem:[#allocation10 + $0x8d0] sm:$0xff] }
 0x2a4   : > { %2412 = vmatprep.mubr.f32.mxu0 %v1045_v54  ;;  %v4028_v54 = vld [vmem:[#allocation10 + $0x8d8] sm:$0xff] }
 0x2a7   : > { %2413 = vmatmul.mubr.f32.gmra.mrb[34].mxu0 %v981_v44  ;;  %v8044_v44 = vpack.c.bf16 %v4028_v54, %v4027_v25  ;;  %v3935_v54 = vld [vmem:[#allocation10 + $0x5f0] sm:$0xff] }
 0x2a8   : > { %2417 = vmatprep.mubr.f32.mxu0 %v1046_v49  ;;  %v991_v49 = vld [vmem:[#allocation2 + $0x170] sm:$0xff] }
 0x2a9   : > { %9059 = vst [vmem:[#allocation23_spill] sm:$0xff] %v8044_v44  ;;  %6142 = vmatprep.subr.bf16.mxu0 %v8044_v44 }
 0x2aa   : > { %6144 = vmatpush3.bf16.msra.mxu0 %v8044_v44 }
 0x2ab   : > { %2418 = vmatmul.mubr.f32.gmra.mrb[36].mxu0 %v982_v38 }
 0x2ac   : > { %2422 = vmatprep.mubr.f32.mxu0 %v1047_v50  ;;  %v4030_v50 = vld [vmem:[#allocation10 + $0x8e8] sm:$0xff] }
 0x2ad   : > { %v8052_v28 = vpack.c.bf16 %v4030_v50, %v4029_v63 }
 0x2ae   : > { %v8005_v9 = vpop.f32.mrb[0].mxu1 }
 0x2af   : > { %2423 = vmatmul.mubr.f32.gmra.mrb[38].mxu0 %v983_v22  ;;  %v8008_v8 = vpop.f32.mrb[1].mxu1  ;;  %9060 = vst [vmem:[#allocation24_spill] sm:$0xff] %v8052_v28  ;;  %v6663_v22 = vld [vmem:[#allocation2 + $0x181] sm:$0xff]  ;;  %6146 = vmatprep.subr.bf16.mxu0 %v8052_v28 }
 0x2b0   : > { %2427 = vmatprep.mubr.f32.mxu0 %v1048_v7  ;;  %6148 = vmatpush3.bf16.msra.mxu0 %v8052_v28  ;;  %v8056_v7 = vpack.c.bf16 %v4032_v47, %v4031_v2  ;;  %v3937_v2 = vld [vmem:[#allocation10 + $0x600] sm:$0xff]  ;;  %v3938_v47 = vld [vmem:[#allocation10 + $0x608] sm:$0xff] }
 0x2b2   : > { %v8017_v35 = vpop.f32.mrb[2].mxu1  ;;  %9061 = vst [vmem:[#allocation25_spill] sm:$0xff] %v8056_v7  ;;  %6150 = vmatprep.subr.bf16.mxu0 %v8056_v7 }
 0x2b3   : > { %2428 = vmatmul.mubr.f32.gmra.mrb[40].mxu0 %v984_v27  ;;  %v8020_v13 = vpop.f32.mrb[3].mxu1 }
 0x2b4   : > { %2432 = vmatprep.mubr.f32.mxu0 %v1049_v60  ;;  %6152 = vmatpush3.bf16.msra.mxu0 %v8056_v7  ;;  %v3921_v60 = vld [vmem:[#allocation10 + $0x580] sm:$0xff] }
 0x2b6   : > { %v8034_v59 = vpop.f32.mrb[4].mxu1 }
 0x2b7   : > { %2433 = vmatmul.mubr.f32.gmra.mrb[42].mxu0 %v985_v14  ;;  %v8037_v40 = vpop.f32.mrb[5].mxu1  ;;  %v5978_v14 = vpack.c.bf16 %v3922_v4, %v3921_v60  ;;  %v3939_v4 = vld [vmem:[#allocation10 + $0x610] sm:$0xff] }
 0x2b8   : > { %2437 = vmatprep.mubr.f32.mxu0 %v1050_v34  ;;  %v3923_v34 = vld [vmem:[#allocation10 + $0x590] sm:$0xff] }
 0x2b9   : > { %5979 = vmatpush1.bf16.msra.mxu1 %v5978_v14  ;;  %v3940_v14 = vld [vmem:[#allocation10 + $0x618] sm:$0xff] }
 0x2ba   : > { %v8046_v38 = vpop.f32.mrb[6].mxu1  ;;  %5980 = vmatprep.subr.bf16.mxu1 %v9004_v0 }
 0x2bb   : > { %2438 = vmatmul.mubr.f32.gmra.mrb[44].mxu0 %v986_v6  ;;  %v8049_v26 = vpop.f32.mrb[7].mxu1  ;;  %v3925_v6 = vld [vmem:[#allocation10 + $0x5a0] sm:$0xff] }
 0x2bc   : > { %2442 = vmatprep.mubr.f32.mxu0 %v1051_v32  ;;  %v5984_v46 = vpack.c.bf16 %v3926_v36, %v3925_v6  ;;  %v3942_v6 = vld [vmem:[#allocation10 + $0x628] sm:$0xff] }
 0x2be   : > { %v8059_v27 = vpop.f32.mrb[8].mxu1 }
 0x2bf   : > { %2443 = vmatmul.mubr.f32.gmra.mrb[46].mxu0 %v987_v11  ;;  %v8062_v51 = vpop.f32.mrb[9].mxu1  ;;  %v5987_v11 = vpack.c.bf16 %v3928_v62, %v3927_v31  ;;  %v3944_v31 = vld [vmem:[#allocation10 + $0x638] sm:$0xff] }
 0x2c0   : > { %2447 = vmatprep.mubr.f32.mxu0 %v1052_v20 }
 0x2c3   : > { %2448 = vmatmul.mubr.f32.gmra.mrb[48].mxu0 %v988_v17 }
 0x2c4   : > { %2452 = vmatprep.mubr.f32.mxu0 %v1053_v48  ;;  %v3931_v48 = vld [vmem:[#allocation10 + $0x5d0] sm:$0xff] }
 0x2c5   : > { %v5993_v33 = vpack.c.bf16 %v3932_v29, %v3931_v48  ;;  %v3947_v29 = vld [vmem:[#allocation10 + $0x650] sm:$0xff] }
 0x2c7   : > { %2453 = vmatmul.mubr.f32.gmra.mrb[50].mxu0 %v989_v42 }
 0x2c8   : > { %2457 = vmatprep.mubr.f32.mxu0 %v1054_v5 }
 0x2cb   : > { %2458 = vmatmul.mubr.f32.gmra.mrb[52].mxu0 %v990_v52  ;;  %v5996_v52 = vpack.c.bf16 %v3934_v55, %v3933_v45  ;;  %v2713_v55 = vld [vmem:[%s7227_s24] sm:$0xff] }
 0x2cc   : > { %2462 = vmatprep.mubr.f32.mxu0 %v1055_v61 }
 0x2cf   : > { %2463 = vmatmul.mubr.f32.gmra.mrb[54].mxu0 %v991_v49  ;;  %v3936_v49 = vld [vmem:[#allocation10 + $0x5f8] sm:$0xff] }
 0x2d0   : > { %2467 = vmatprep.mubr.f32.mxu0 %v6663_v22  ;;  %v5999_v63 = vpack.c.bf16 %v3936_v49, %v3935_v54 }
 0x2d3   : > { %2468 = vmatmul.mubr.f32.gmra.mrb[56].mxu0 %v7842_v37  ;;  %v8068_v37 = vpop.f32.mrb[10].mxu1 }
 0x2d4   : > { %2472 = vmatprep.mubr.f32.mxu0 %v6664_v24  ;;  %v8070_v39 = vpop.f32.mrb[11].mxu1  ;;  %v6002_v24 = vpack.c.bf16 %v3938_v47, %v3937_v2  ;;  %v3949_v47 = vld [vmem:[#allocation10 + $0x660] sm:$0xff] }
 0x2d5   : > { %v8074_v1 = vpop.f32.mrb[12].mxu1 }
 0x2d6   : > { %v8076_v12 = vpop.f32.mrb[13].mxu1 }
 0x2d7   : > { %2473 = vmatmul.mubr.f32.gmra.mrb[58].mxu0 %v7848_v56  ;;  %v5981_v56 = vpack.c.bf16 %v3924_v10, %v3923_v34  ;;  %v8079_v32 = vpop.f32.mrb[14].mxu1 }
 0x2d8   : > { %2477 = vmatprep.mubr.f32.mxu0 %v1058_v53  ;;  %v8081_v15 = vpop.f32.mrb[15].mxu1 }
 0x2d9   : > { %5982 = vmatpush1.bf16.msra.mxu1 %v5981_v56  ;;  %v8084_v41 = vpop.f32.mrb[16].mxu1  ;;  %v3941_v56 = vld [vmem:[#allocation10 + $0x620] sm:$0xff] }
 0x2da   : > { %5983 = vmatprep.subr.bf16.mxu1 %v9004_v0  ;;  %v8086_v20 = vpop.f32.mrb[17].mxu1  ;;  %v6008_v36 = vpack.c.bf16 %v3942_v6, %v3941_v56 }
 0x2db   : > { %2478 = vmatmul.mubr.f32.gmra.mrb[60].mxu0 %v8025_v21  ;;  %v8089_v17 = vpop.f32.mrb[18].mxu1 }
 0x2dc   : > { %2482 = vmatprep.mubr.f32.mxu0 %v1059_v43  ;;  %v8091_v23 = vpop.f32.mrb[19].mxu1  ;;  %v6005_v43 = vpack.c.bf16 %v3940_v14, %v3939_v4  ;;  %v8130_v4 = vld [vmem:[#allocation7 + $0x1] ss:$0 sm:$0xff] }
 0x2dd   : > { %5985 = vmatpush1.bf16.msra.mxu1 %v5984_v46  ;;  %v8094_v42 = vpop.f32.mrb[20].mxu1  ;;  %v3943_v46 = vld [vmem:[#allocation10 + $0x630] sm:$0xff] }
 0x2de   : > { %5986 = vmatprep.subr.bf16.mxu1 %v9004_v0  ;;  %v8096_v5 = vpop.f32.mrb[21].mxu1 }
 0x2df   : > { %2483 = vmatmul.mubr.f32.gmra.mrb[62].mxu0 %v8025_v21  ;;  %v5990_v21 = vpack.c.bf16 %v3930_v30, %v3929_v19  ;;  %v8099_v61 = vpop.f32.mrb[22].mxu1  ;;  %v3945_v30 = vld [vmem:[#allocation10 + $0x640] sm:$0xff] }
 0x2e0   : > { %v8101_v25 = vpop.f32.mrb[23].mxu1 }
 0x2e1   : > { %5988 = vmatpush1.bf16.msra.mxu1 %v5987_v11  ;;  %v8104_v50 = vpop.f32.mrb[24].mxu1  ;;  %v6011_v11 = vpack.c.bf16 %v3944_v31, %v3943_v46  ;;  %v8135_v46 = vld [vmem:[#allocation9 + $0x1] ss:$0 sm:$0xff] }
 0x2e2   : > { %5989 = vmatprep.subr.bf16.mxu1 %v9004_v0  ;;  %v8106_v22 = vpop.f32.mrb[25].mxu1 }
 0x2e3   : > { %v8109_v53 = vpop.f32.mrb[26].mxu1 }
 0x2e4   : > { %v8111_v60 = vpop.f32.mrb[27].mxu1 }
 0x2e5   : > { %5991 = vmatpush1.bf16.msra.mxu1 %v5990_v21  ;;  %v3946_v21 = vld [vmem:[#allocation10 + $0x648] sm:$0xff] }
 0x2e6   : > { %5992 = vmatprep.subr.bf16.mxu1 %v9004_v0  ;;  %v8114_v34 = vpop.f32.mrb[28].mxu1  ;;  %v6014_v48 = vpack.c.bf16 %v3946_v21, %v3945_v30  ;;  %v3951_v30 = vld [vmem:[#allocation10 + $0x670] sm:$0xff]  ;;  %v3952_v21 = vld [vmem:[#allocation10 + $0x678] sm:$0xff] }
 0x2e7   : > { %v8116_v10 = vpop.f32.mrb[29].mxu1 }
 0x2e9   : > { %5994 = vmatpush1.bf16.msra.mxu1 %v5993_v33  ;;  %v3948_v33 = vld [vmem:[#allocation10 + $0x658] sm:$0xff] }
 0x2ea   : > { %5995 = vmatprep.subr.bf16.mxu1 %v9004_v0 }
 0x2ed   : > { %5997 = vmatpush1.bf16.msra.mxu1 %v5996_v52  ;;  %v6017_v52 = vpack.c.bf16 %v3948_v33, %v3947_v29  ;;  %v2715_v29 = vld [vmem:[%s7227_s24 + $0x10] sm:$0xff]  ;;  %v6023_v33 = vpack.c.bf16 %v3952_v21, %v3951_v30 }
 0x2ee   : > { %5998 = vmatprep.subr.bf16.mxu1 %v9004_v0 }
 0x2f1   : > { %6000 = vmatpush1.bf16.msra.mxu1 %v5999_v63  ;;  %v8127_v63 = vld [vmem:[#allocation12] ss:$0 sm:$0xff] }
 0x2f2   : > { %6001 = vmatprep.subr.bf16.mxu1 %v9004_v0 }
 0x2f5   : > { %6003 = vmatpush1.bf16.msra.mxu1 %v6002_v24  ;;  %v3950_v24 = vld [vmem:[#allocation10 + $0x668] sm:$0xff] }
 0x2f6   : > { %6004 = vmatprep.subr.bf16.mxu1 %v9004_v0  ;;  %v6020_v56 = vpack.c.bf16 %v3950_v24, %v3949_v47  ;;  %v2716_v24 = vld [vmem:[%s7227_s24 + $0x18] sm:$0xff] }
 0x2f9   : > { %6006 = vmatpush1.bf16.msra.mxu1 %v6005_v43  ;;  %v2714_v43 = vld [vmem:[%s7227_s24 + $0x8] sm:$0xff] }
 0x2fa   : > { %6007 = vmatprep.subr.bf16.mxu1 %v9004_v0 }
 0x2fd   : > { %6009 = vmatpush1.bf16.msra.mxu1 %v6008_v36 }
 0x2fe   : > { %6010 = vmatprep.subr.bf16.mxu1 %v9004_v0 }
 0x301   : > { %6012 = vmatpush1.bf16.msra.mxu1 %v6011_v11 }
 0x302   : > { %6013 = vmatprep.subr.bf16.mxu1 %v9004_v0 }
 0x305   : > { %6015 = vmatpush1.bf16.msra.mxu1 %v6014_v48 }
 0x306   : > { %6016 = vmatprep.subr.bf16.mxu1 %v9004_v0 }
 0x309   : > { %6018 = vmatpush1.bf16.msra.mxu1 %v6017_v52 }
 0x30a   : > { %6019 = vmatprep.subr.bf16.mxu1 %v9004_v0 }
 0x30d   : > { %6021 = vmatpush1.bf16.msra.mxu1 %v6020_v56 }
 0x30e   : > { %6022 = vmatprep.subr.bf16.mxu1 %v9004_v0 }
 0x311   : > { %6024 = vmatpush1.bf16.msra.mxu1 %v6023_v33 }
 0x312   : > { %6025 = vmatprep.subr.bf16.mxu1 %v9004_v0 }
 0x318   : > { %v8119_v62 = vpop.f32.mrb[30].mxu1 }
 0x319   : > { %v8121_v19 = vpop.f32.mrb[31].mxu1 }
 0x336   : > { %v2329_v45 = vpop.f32.mrb[0].mxu0 }
 0x337   : > { %v2555_v54 = vadd.f32 %v8008_v8, %v2329_v45  ;;  %v2331_v49 = vpop.f32.mrb[1].mxu0 }
 0x339   : > { %v2745_v2 = vadd.f32 %v2713_v55, %v2555_v54 }
 0x33a   : > { %v2334_v14 = vpop.f32.mrb[2].mxu0 }
 0x33b   : > { %v2784_v6 = vadd.f32 %v8127_v63, %v2745_v2  ;;  %v2560_v8 = vadd.f32 %v8005_v9, %v2334_v14  ;;  %v2336_v36 = vpop.f32.mrb[3].mxu0 }
 0x33d   : > { %2816 = vst [vmem:[%s7227_s24] sm:$0xff] %v2784_v6  ;;  %v2888_v31 = vmul.f32 %v8130_v4, %v2784_v6  ;;  %v2746_v11 = vadd.f32 %v2714_v43, %v2560_v8 }
 0x33e   : > { %v2339_v48 = vpop.f32.mrb[4].mxu0 }
 0x33f   : > { %v2928_v45 = vadd.f32 %v8135_v46, %v2888_v31  ;;  %v2785_v9 = vadd.f32 %v8127_v63, %v2746_v11  ;;  %v2565_v55 = vadd.f32 %v8020_v13, %v2339_v48  ;;  %v2341_v52 = vpop.f32.mrb[5].mxu0  ;;  %v2717_v11 = vld [vmem:[%s7227_s24 + $0x20] sm:$0xff] }
 0x341   : > { %v2960_v54 = vmax.f32 %v2928_v45, 0.0  ;;  %2817 = vst [vmem:[%s7227_s24 + $0x8] sm:$0xff] %v2785_v9  ;;  %v2889_v49 = vmul.f32 %v8130_v4, %v2785_v9  ;;  %v2747_v2 = vadd.f32 %v2715_v29, %v2565_v55  ;;  %v2718_v55 = vld [vmem:[%s7227_s24 + $0x28] sm:$0xff] }
 0x342   : > { %v2344_v47 = vpop.f32.mrb[6].mxu0 }
 0x343   : > { %2992 = vst [vmem:[#allocation2 + $0x19] sm:$0xff] %v2960_v54  ;;  %v2929_v14 = vadd.f32 %v8135_v46, %v2889_v49  ;;  %v2786_v43 = vadd.f32 %v8127_v63, %v2747_v2  ;;  %v2570_v13 = vadd.f32 %v8017_v35, %v2344_v47  ;;  %v2346_v56 = vpop.f32.mrb[7].mxu0  ;;  %4107 = vmatprep.mubr.f32.mxu1 %v2960_v54 }
 0x345   : > { %v2961_v6 = vmax.f32 %v2929_v14, 0.0  ;;  %2818 = vst [vmem:[%s7227_s24 + $0x10] sm:$0xff] %v2786_v43  ;;  %v2890_v8 = vmul.f32 %v8130_v4, %v2786_v43  ;;  %v2748_v36 = vadd.f32 %v2716_v24, %v2570_v13  ;;  %v2719_v13 = vld [vmem:[%s7227_s24 + $0x30] sm:$0xff] }
 0x346   : > { %v2349_v31 = vpop.f32.mrb[8].mxu0 }
 0x347   : > { %2993 = vst [vmem:[#allocation2 + $0x21] sm:$0xff] %v2961_v6  ;;  %v2930_v30 = vadd.f32 %v8135_v46, %v2890_v8  ;;  %v2787_v21 = vadd.f32 %v8127_v63, %v2748_v36  ;;  %v2575_v48 = vadd.f32 %v8037_v40, %v2349_v31  ;;  %v2351_v29 = vpop.f32.mrb[9].mxu0 }
 0x349   : > { %v2962_v35 = vmax.f32 %v2930_v30, 0.0  ;;  %2819 = vst [vmem:[%s7227_s24 + $0x18] sm:$0xff] %v2787_v21  ;;  %v2891_v33 = vmul.f32 %v8130_v4, %v2787_v21  ;;  %v2749_v45 = vadd.f32 %v2717_v11, %v2575_v48  ;;  %v2720_v48 = vld [vmem:[%s7227_s24 + $0x38] sm:$0xff] }
 0x34a   : > { %v2354_v9 = vpop.f32.mrb[10].mxu0  ;;  %v3026_v52 = vld [vmem:[#allocation2 + $0x18] sm:$0xff] }
 0x34b   : > { %2994 = vst [vmem:[#allocation2 + $0x31] sm:$0xff] %v2962_v35  ;;  %v2931_v54 = vadd.f32 %v8135_v46, %v2891_v33  ;;  %v2788_v49 = vadd.f32 %v8127_v63, %v2749_v45  ;;  %v2580_v2 = vadd.f32 %v8034_v59, %v2354_v9  ;;  %v2356_v47 = vpop.f32.mrb[11].mxu0  ;;  %4108 = vmatmul.mubr.f32.gmra.mrb[36].mxu1 %v3026_v52 }
 0x34c   : > { %4112 = vmatprep.mubr.f32.mxu1 %v2961_v6 }
 0x34d   : > { %v2963_v40 = vmax.f32 %v2931_v54, 0.0  ;;  %2820 = vst [vmem:[%s7227_s24 + $0x20] sm:$0xff] %v2788_v49  ;;  %v2892_v24 = vmul.f32 %v8130_v4, %v2788_v49  ;;  %v2750_v14 = vadd.f32 %v2718_v55, %v2580_v2  ;;  %v2721_v54 = vld [vmem:[%s7227_s24 + $0x40] sm:$0xff] }
 0x34e   : > { %v2359_v43 = vpop.f32.mrb[12].mxu0  ;;  %v3027_v56 = vld [vmem:[#allocation2 + $0x20] sm:$0xff] }
 0x34f   : > { %2995 = vst [vmem:[#allocation2 + $0x39] sm:$0xff] %v2963_v40  ;;  %v2932_v8 = vadd.f32 %v8135_v46, %v2892_v24  ;;  %v2789_v36 = vadd.f32 %v8127_v63, %v2750_v14  ;;  %v2585_v59 = vadd.f32 %v8049_v26, %v2359_v43  ;;  %v2361_v31 = vpop.f32.mrb[13].mxu0  ;;  %4113 = vmatmul.mubr.f32.gmra.mrb[38].mxu1 %v3027_v56 }
 0x350   : > { %4117 = vmatprep.mubr.f32.mxu1 %v2962_v35 }
 0x351   : > { %v2964_v6 = vmax.f32 %v2932_v8, 0.0  ;;  %2821 = vst [vmem:[%s7227_s24 + $0x28] sm:$0xff] %v2789_v36  ;;  %v2893_v11 = vmul.f32 %v8130_v4, %v2789_v36  ;;  %v2751_v30 = vadd.f32 %v2719_v13, %v2585_v59  ;;  %v2722_v59 = vld [vmem:[%s7227_s24 + $0x48] sm:$0xff] }
 0x352   : > { %v2364_v21 = vpop.f32.mrb[14].mxu0  ;;  %v3028_v29 = vld [vmem:[#allocation2 + $0x30] sm:$0xff] }
 0x353   : > { %2996 = vst [vmem:[#allocation2 + $0x49] sm:$0xff] %v2964_v6  ;;  %v2933_v33 = vadd.f32 %v8135_v46, %v2893_v11  ;;  %v2790_v45 = vadd.f32 %v8127_v63, %v2751_v30  ;;  %v2590_v26 = vadd.f32 %v8046_v38, %v2364_v21  ;;  %v2366_v9 = vpop.f32.mrb[15].mxu0  ;;  %4118 = vmatmul.mubr.f32.gmra.mrb[40].mxu1 %v3028_v29 }
 0x354   : > { %4122 = vmatprep.mubr.f32.mxu1 %v2963_v40 }
 0x355   : > { %v2965_v35 = vmax.f32 %v2933_v33, 0.0  ;;  %2822 = vst [vmem:[%s7227_s24 + $0x30] sm:$0xff] %v2790_v45  ;;  %v2894_v55 = vmul.f32 %v8130_v4, %v2790_v45  ;;  %v2752_v52 = vadd.f32 %v2720_v48, %v2590_v26  ;;  %v2723_v33 = vld [vmem:[%s7227_s24 + $0x50] sm:$0xff] }
 0x356   : > { %v2369_v49 = vpop.f32.mrb[16].mxu0  ;;  %v3536_v2 = vld [vmem:[#allocation2 + $0x32] sm:$0xff]  ;;  %v3537_v24 = vld [vmem:[#allocation2 + $0x3a] sm:$0xff] }
 0x357   : > { %v8178_v47 = vld [vmem:[#allocation2 + $0x38] sm:$0xff]  ;;  %2997 = vst [vmem:[#allocation2 + $0x51] sm:$0xff] %v2965_v35  ;;  %v2934_v14 = vadd.f32 %v8135_v46, %v2894_v55  ;;  %v2791_v38 = vadd.f32 %v8127_v63, %v2752_v52  ;;  %v2595_v40 = vadd.f32 %v8062_v51, %v2369_v49  ;;  %v2371_v43 = vpop.f32.mrb[17].mxu0  ;;  %5657 = vmatprep.mubr.f32.mxu0 %v3536_v2 }
 0x358   : > { %4123 = vmatmul.mubr.f32.gmra.mrb[42].mxu1 %v8178_v47  ;;  %5658 = vmatmul.mubr.f32.vlgmr.msra.gmra.mrb[64].mxu0 %v3537_v24 }
 0x359   : > { %4127 = vmatprep.mubr.f32.mxu1 %v2964_v6  ;;  %v2966_v13 = vmax.f32 %v2934_v14, 0.0  ;;  %2823 = vst [vmem:[%s7227_s24 + $0x38] sm:$0xff] %v2791_v38  ;;  %v2895_v56 = vmul.f32 %v8130_v4, %v2791_v38  ;;  %v2753_v8 = vadd.f32 %v2721_v54, %v2595_v40  ;;  %v2724_v38 = vld [vmem:[%s7227_s24 + $0x58] sm:$0xff] }
 0x35a   : > { %v2374_v36 = vpop.f32.mrb[18].mxu0  ;;  %v8187_v31 = vld [vmem:[#allocation2 + $0x48] sm:$0xff] }
 0x35b   : > { %2998 = vst [vmem:[#allocation2 + $0x61] sm:$0xff] %v2966_v13  ;;  %v2935_v51 = vadd.f32 %v8135_v46, %v2895_v56  ;;  %v2792_v11 = vadd.f32 %v8127_v63, %v2753_v8  ;;  %v2600_v30 = vadd.f32 %v8059_v27, %v2374_v36  ;;  %v2376_v21 = vpop.f32.mrb[19].mxu0 }
 0x35c   : > { %4128 = vmatmul.mubr.f32.gmra.mrb[44].mxu1 %v8187_v31 }
 0x35d   : > { %4132 = vmatprep.mubr.f32.mxu1 %v2965_v35  ;;  %v2967_v6 = vmax.f32 %v2935_v51, 0.0  ;;  %2824 = vst [vmem:[%s7227_s24 + $0x40] sm:$0xff] %v2792_v11  ;;  %v2896_v48 = vmul.f32 %v8130_v4, %v2792_v11  ;;  %v2754_v29 = vadd.f32 %v2722_v59, %v2600_v30  ;;  %v2725_v51 = vld [vmem:[%s7227_s24 + $0x60] sm:$0xff] }
 0x35e   : > { %v2379_v45 = vpop.f32.mrb[20].mxu0  ;;  %v8196_v26 = vld [vmem:[#allocation2 + $0x4a] sm:$0xff]  ;;  %v8200_v55 = vld [vmem:[#allocation2 + $0x52] sm:$0xff] }
 0x35f   : > { %v8198_v9 = vld [vmem:[#allocation2 + $0x50] sm:$0xff]  ;;  %2999 = vst [vmem:[#allocation2 + $0x69] sm:$0xff] %v2967_v6  ;;  %v2936_v27 = vadd.f32 %v8135_v46, %v2896_v48  ;;  %v2793_v35 = vadd.f32 %v8127_v63, %v2754_v29  ;;  %v2605_v52 = vadd.f32 %v8070_v39, %v2379_v45  ;;  %v2381_v54 = vpop.f32.mrb[21].mxu0  ;;  %5660 = vmatprep.mubr.f32.mxu0 %v8196_v26 }
 0x360   : > { %4133 = vmatmul.mubr.f32.gmra.mrb[46].mxu1 %v8198_v9  ;;  %5661 = vmatmul.mubr.f32.gmra.mrb[66].mxu0 %v8200_v55  ;;  %v2726_v54 = vld [vmem:[%s7227_s24 + $0x68] sm:$0xff] }
 0x361   : > { %4137 = vmatprep.mubr.f32.mxu1 %v2966_v13  ;;  %v2968_v49 = vmax.f32 %v2936_v27, 0.0  ;;  %2825 = vst [vmem:[%s7227_s24 + $0x48] sm:$0xff] %v2793_v35  ;;  %v2897_v2 = vmul.f32 %v8130_v4, %v2793_v35  ;;  %v2755_v24 = vadd.f32 %v2723_v33, %v2605_v52 }
 0x362   : > { %v2384_v14 = vpop.f32.mrb[22].mxu0  ;;  %v8211_v40 = vld [vmem:[#allocation2 + $0x60] sm:$0xff] }
 0x363   : > { %3000 = vst [vmem:[#allocation2 + $0x79] sm:$0xff] %v2968_v49  ;;  %v2937_v39 = vadd.f32 %v8135_v46, %v2897_v2  ;;  %v2794_v43 = vadd.f32 %v8127_v63, %v2755_v24  ;;  %v2610_v56 = vadd.f32 %v8068_v37, %v2384_v14  ;;  %v2386_v8 = vpop.f32.mrb[23].mxu0 }
 0x364   : > { %4138 = vmatmul.mubr.f32.gmra.mrb[48].mxu1 %v8211_v40 }
 0x365   : > { %4142 = vmatprep.mubr.f32.mxu1 %v2967_v6  ;;  %v2969_v13 = vmax.f32 %v2937_v39, 0.0  ;;  %2826 = vst [vmem:[%s7227_s24 + $0x50] sm:$0xff] %v2794_v43  ;;  %v2898_v36 = vmul.f32 %v8130_v4, %v2794_v43  ;;  %v2756_v59 = vadd.f32 %v2724_v38, %v2610_v56  ;;  %v2727_v56 = vld [vmem:[%s7227_s24 + $0x70] sm:$0xff] }
 0x366   : > { %v2389_v11 = vpop.f32.mrb[24].mxu0  ;;  %v8220_v30 = vld [vmem:[#allocation2 + $0x62] sm:$0xff]  ;;  %v8224_v48 = vld [vmem:[#allocation2 + $0x6a] sm:$0xff] }
 0x367   : > { %v8222_v21 = vld [vmem:[#allocation2 + $0x68] sm:$0xff]  ;;  %3001 = vst [vmem:[#allocation2 + $0x81] sm:$0xff] %v2969_v13  ;;  %v2938_v37 = vadd.f32 %v8135_v46, %v2898_v36  ;;  %v2795_v6 = vadd.f32 %v8127_v63, %v2756_v59  ;;  %v2615_v29 = vadd.f32 %v8076_v12, %v2389_v11  ;;  %v2391_v33 = vpop.f32.mrb[25].mxu0  ;;  %5663 = vmatprep.mubr.f32.mxu0 %v8220_v30 }
 0x368   : > { %4143 = vmatmul.mubr.f32.gmra.mrb[50].mxu1 %v8222_v21  ;;  %5664 = vmatmul.mubr.f32.gmra.mrb[68].mxu0 %v8224_v48 }
 0x369   : > { %4147 = vmatprep.mubr.f32.mxu1 %v2968_v49  ;;  %v2970_v45 = vmax.f32 %v2938_v37, 0.0  ;;  %2827 = vst [vmem:[%s7227_s24 + $0x58] sm:$0xff] %v2795_v6  ;;  %v2899_v27 = vmul.f32 %v8130_v4, %v2795_v6  ;;  %v2757_v35 = vadd.f32 %v2725_v51, %v2615_v29 }
 0x36a   : > { %v2394_v52 = vpop.f32.mrb[26].mxu0  ;;  %v8235_v2 = vld [vmem:[#allocation2 + $0x78] sm:$0xff] }
 0x36b   : > { %3002 = vst [vmem:[#allocation2 + $0x91] sm:$0xff] %v2970_v45  ;;  %v2939_v12 = vadd.f32 %v8135_v46, %v2899_v27  ;;  %v2796_v24 = vadd.f32 %v8127_v63, %v2757_v35  ;;  %v2620_v14 = vadd.f32 %v8074_v1, %v2394_v52  ;;  %v2396_v38 = vpop.f32.mrb[27].mxu0  ;;  %v2728_v35 = vld [vmem:[%s7227_s24 + $0x78] sm:$0xff] }
 0x36c   : > { %4148 = vmatmul.mubr.f32.gmra.mrb[52].mxu1 %v8235_v2 }
 0x36d   : > { %4152 = vmatprep.mubr.f32.mxu1 %v2969_v13  ;;  %v2971_v49 = vmax.f32 %v2939_v12, 0.0  ;;  %2828 = vst [vmem:[%s7227_s24 + $0x60] sm:$0xff] %v2796_v24  ;;  %v2900_v39 = vmul.f32 %v8130_v4, %v2796_v24  ;;  %v2758_v43 = vadd.f32 %v2726_v54, %v2620_v14 }
 0x36e   : > { %v2399_v8 = vpop.f32.mrb[28].mxu0  ;;  %v8244_v36 = vld [vmem:[#allocation2 + $0x7a] sm:$0xff]  ;;  %v8248_v51 = vld [vmem:[#allocation2 + $0x82] sm:$0xff] }
 0x36f   : > { %v8246_v59 = vld [vmem:[#allocation2 + $0x80] sm:$0xff]  ;;  %3003 = vst [vmem:[#allocation2 + $0x99] sm:$0xff] %v2971_v49  ;;  %v2940_v1 = vadd.f32 %v8135_v46, %v2900_v39  ;;  %v2797_v13 = vadd.f32 %v8127_v63, %v2758_v43  ;;  %v2625_v11 = vadd.f32 %v8081_v15, %v2399_v8  ;;  %v2401_v37 = vpop.f32.mrb[29].mxu0  ;;  %5666 = vmatprep.mubr.f32.mxu0 %v8244_v36  ;;  %v2729_v39 = vld [vmem:[%s7227_s24 + $0x80] sm:$0xff] }
 0x370   : > { %4153 = vmatmul.mubr.f32.gmra.mrb[54].mxu1 %v8246_v59  ;;  %5667 = vmatmul.mubr.f32.gmra.mrb[70].mxu0 %v8248_v51 }
 0x371   : > { %4157 = vmatprep.mubr.f32.mxu1 %v2970_v45  ;;  %v2972_v6 = vmax.f32 %v2940_v1, 0.0  ;;  %2829 = vst [vmem:[%s7227_s24 + $0x68] sm:$0xff] %v2797_v13  ;;  %v2901_v29 = vmul.f32 %v8130_v4, %v2797_v13  ;;  %v2759_v33 = vadd.f32 %v2727_v56, %v2625_v11 }
 0x372   : > { %v2404_v27 = vpop.f32.mrb[30].mxu0  ;;  %v8259_v52 = vld [vmem:[#allocation2 + $0x90] sm:$0xff] }
 0x373   : > { %3004 = vst [vmem:[#allocation2 + $0xa9] sm:$0xff] %v2972_v6  ;;  %v2941_v15 = vadd.f32 %v8135_v46, %v2901_v29  ;;  %v2798_v54 = vadd.f32 %v8127_v63, %v2759_v33  ;;  %v2630_v12 = vadd.f32 %v8079_v32, %v2404_v27  ;;  %v2406_v24 = vpop.f32.mrb[31].mxu0 }
 0x374   : > { %4158 = vmatmul.mubr.f32.gmra.mrb[56].mxu1 %v8259_v52 }
 0x375   : > { %4162 = vmatprep.mubr.f32.mxu1 %v2971_v49  ;;  %v2973_v45 = vmax.f32 %v2941_v15, 0.0  ;;  %2830 = vst [vmem:[%s7227_s24 + $0x70] sm:$0xff] %v2798_v54  ;;  %v2902_v14 = vmul.f32 %v8130_v4, %v2798_v54  ;;  %v2760_v38 = vadd.f32 %v2728_v35, %v2630_v12  ;;  %v2730_v35 = vld [vmem:[%s7227_s24 + $0x88] sm:$0xff] }
 0x376   : > { %v2409_v43 = vpop.f32.mrb[32].mxu0  ;;  %v8268_v56 = vld [vmem:[#allocation2 + $0x92] sm:$0xff]  ;;  %v8272_v1 = vld [vmem:[#allocation2 + $0x9a] sm:$0xff] }
 0x377   : > { %v8270_v8 = vld [vmem:[#allocation2 + $0x98] sm:$0xff]  ;;  %3005 = vst [vmem:[#allocation2 + $0xb1] sm:$0xff] %v2973_v45  ;;  %v2942_v32 = vadd.f32 %v8135_v46, %v2902_v14  ;;  %v2799_v49 = vadd.f32 %v8127_v63, %v2760_v38  ;;  %v2635_v13 = vadd.f32 %v8086_v20, %v2409_v43  ;;  %v2411_v11 = vpop.f32.mrb[33].mxu0  ;;  %5669 = vmatprep.mubr.f32.mxu0 %v8268_v56 }
 0x378   : > { %4163 = vmatmul.mubr.f32.gmra.mrb[58].mxu1 %v8270_v8  ;;  %5670 = vmatmul.mubr.f32.gmra.mrb[72].mxu0 %v8272_v1 }
 0x379   : > { %4167 = vmatprep.mubr.f32.mxu1 %v2972_v6  ;;  %v2974_v37 = vmax.f32 %v2942_v32, 0.0  ;;  %2831 = vst [vmem:[%s7227_s24 + $0x78] sm:$0xff] %v2799_v49  ;;  %v2903_v29 = vmul.f32 %v8130_v4, %v2799_v49  ;;  %v2761_v33 = vadd.f32 %v2729_v39, %v2635_v13  ;;  %v2731_v39 = vld [vmem:[%s7227_s24 + $0x90] sm:$0xff] }
 0x37a   : > { %v2414_v27 = vpop.f32.mrb[34].mxu0  ;;  %v8283_v15 = vld [vmem:[#allocation2 + $0xa8] sm:$0xff] }
 0x37b   : > { %3006 = vst [vmem:[#allocation2 + $0xc1] sm:$0xff] %v2974_v37  ;;  %v2943_v20 = vadd.f32 %v8135_v46, %v2903_v29  ;;  %v2800_v54 = vadd.f32 %v8127_v63, %v2761_v33  ;;  %v2640_v12 = vadd.f32 %v8084_v41, %v2414_v27  ;;  %v2416_v24 = vpop.f32.mrb[35].mxu0 }
 0x37c   : > { %4168 = vmatmul.mubr.f32.gmra.mrb[60].mxu1 %v8283_v15 }
 0x37d   : > { %4172 = vmatprep.mubr.f32.mxu1 %v2973_v45  ;;  %v2975_v6 = vmax.f32 %v2943_v20, 0.0  ;;  %2832 = vst [vmem:[%s7227_s24 + $0x80] sm:$0xff] %v2800_v54  ;;  %v2904_v14 = vmul.f32 %v8130_v4, %v2800_v54  ;;  %v2762_v38 = vadd.f32 %v2730_v35, %v2640_v12  ;;  %v2732_v54 = vld [vmem:[%s7227_s24 + $0x98] sm:$0xff] }
 0x37e   : > { %v2419_v43 = vpop.f32.mrb[36].mxu0  ;;  %v8292_v32 = vld [vmem:[#allocation2 + $0xaa] sm:$0xff]  ;;  %v8296_v13 = vld [vmem:[#allocation2 + $0xb2] sm:$0xff] }
 0x37f   : > { %v8294_v49 = vld [vmem:[#allocation2 + $0xb0] sm:$0xff]  ;;  %3007 = vst [vmem:[#allocation2 + $0xc9] sm:$0xff] %v2975_v6  ;;  %v2944_v41 = vadd.f32 %v8135_v46, %v2904_v14  ;;  %v2801_v45 = vadd.f32 %v8127_v63, %v2762_v38  ;;  %v2645_v11 = vadd.f32 %v8091_v23, %v2419_v43  ;;  %v2421_v29 = vpop.f32.mrb[37].mxu0  ;;  %5672 = vmatprep.mubr.f32.mxu0 %v8292_v32 }
 0x380   : > { %4173 = vmatmul.mubr.f32.gmra.mrb[62].mxu1 %v8294_v49  ;;  %5673 = vmatmul.mubr.f32.gmra.mrb[74].mxu0 %v8296_v13 }
 0x381   : > { %4177 = vmatprep.mubr.f32.mxu1 %v2974_v37  ;;  %v2976_v33 = vmax.f32 %v2944_v41, 0.0  ;;  %2833 = vst [vmem:[%s7227_s24 + $0x88] sm:$0xff] %v2801_v45  ;;  %v2905_v27 = vmul.f32 %v8130_v4, %v2801_v45  ;;  %v2763_v35 = vadd.f32 %v2731_v39, %v2645_v11  ;;  %v2733_v41 = vld [vmem:[%s7227_s24 + $0xa0] sm:$0xff] }
 0x382   : > { %v2424_v20 = vpop.f32.mrb[38].mxu0  ;;  %v8307_v12 = vld [vmem:[#allocation2 + $0xc0] sm:$0xff] }
 0x383   : > { %3008 = vst [vmem:[#allocation2 + $0xd9] sm:$0xff] %v2976_v33  ;;  %v2945_v23 = vadd.f32 %v8135_v46, %v2905_v27  ;;  %v2802_v24 = vadd.f32 %v8127_v63, %v2763_v35  ;;  %v2650_v14 = vadd.f32 %v8089_v17, %v2424_v20  ;;  %v2426_v38 = vpop.f32.mrb[39].mxu0 }
 0x384   : > { %4178 = vmatmul.mubr.f32.gmra.mrb[64].mxu1 %v8307_v12  ;;  %v2734_v38 = vld [vmem:[%s7227_s24 + $0xa8] sm:$0xff] }
 0x385   : > { %4182 = vmatprep.mubr.f32.mxu1 %v2975_v6  ;;  %v2977_v37 = vmax.f32 %v2945_v23, 0.0  ;;  %2834 = vst [vmem:[%s7227_s24 + $0x90] sm:$0xff] %v2802_v24  ;;  %v2906_v43 = vmul.f32 %v8130_v4, %v2802_v24  ;;  %v2764_v39 = vadd.f32 %v2732_v54, %v2650_v14 }
 0x386   : > { %v2429_v45 = vpop.f32.mrb[40].mxu0  ;;  %v8316_v11 = vld [vmem:[#allocation2 + $0xc2] sm:$0xff]  ;;  %v8320_v27 = vld [vmem:[#allocation2 + $0xca] sm:$0xff] }
 0x387   : > { %v8318_v29 = vld [vmem:[#allocation2 + $0xc8] sm:$0xff]  ;;  %3009 = vst [vmem:[#allocation2 + $0xe1] sm:$0xff] %v2977_v37  ;;  %v2946_v17 = vadd.f32 %v8135_v46, %v2906_v43  ;;  %v2803_v6 = vadd.f32 %v8127_v63, %v2764_v39  ;;  %v2655_v35 = vadd.f32 %v8096_v5, %v2429_v45  ;;  %v2431_v20 = vpop.f32.mrb[41].mxu0  ;;  %5675 = vmatprep.mubr.f32.mxu0 %v8316_v11 }
 0x388   : > { %4183 = vmatmul.mubr.f32.gmra.mrb[66].mxu1 %v8318_v29  ;;  %5676 = vmatmul.mubr.f32.gmra.mrb[76].mxu0 %v8320_v27 }
 0x389   : > { %4187 = vmatprep.mubr.f32.mxu1 %v2976_v33  ;;  %v2978_v54 = vmax.f32 %v2946_v17, 0.0  ;;  %2835 = vst [vmem:[%s7227_s24 + $0x98] sm:$0xff] %v2803_v6  ;;  %v2907_v23 = vmul.f32 %v8130_v4, %v2803_v6  ;;  %v2765_v24 = vadd.f32 %v2733_v41, %v2655_v35  ;;  %v2735_v6 = vld [vmem:[%s7227_s24 + $0xb0] sm:$0xff] }
 0x38a   : > { %v2434_v14 = vpop.f32.mrb[42].mxu0  ;;  %v8331_v43 = vld [vmem:[#allocation2 + $0xd8] sm:$0xff] }
 0x38b   : > { %3010 = vst [vmem:[#allocation2 + $0xf1] sm:$0xff] %v2978_v54  ;;  %v2947_v5 = vadd.f32 %v8135_v46, %v2907_v23  ;;  %v2804_v39 = vadd.f32 %v8127_v63, %v2765_v24  ;;  %v2660_v45 = vadd.f32 %v8094_v42, %v2434_v14  ;;  %v2436_v20 = vpop.f32.mrb[43].mxu0 }
 0x38c   : > { %4188 = vmatmul.mubr.f32.gmra.mrb[68].mxu1 %v8331_v43  ;;  %v2736_v20 = vld [vmem:[%s7227_s24 + $0xb8] sm:$0xff] }
 0x38d   : > { %4192 = vmatprep.mubr.f32.mxu1 %v2977_v37  ;;  %v2979_v33 = vmax.f32 %v2947_v5, 0.0  ;;  %2836 = vst [vmem:[%s7227_s24 + $0xa0] sm:$0xff] %v2804_v39  ;;  %v2908_v17 = vmul.f32 %v8130_v4, %v2804_v39  ;;  %v2766_v41 = vadd.f32 %v2734_v38, %v2660_v45 }
 0x38e   : > { %v2439_v35 = vpop.f32.mrb[44].mxu0  ;;  %v8340_v0 = vld [vmem:[#allocation2 + $0xda] sm:$0xff]  ;;  %v8344_v23 = vld [vmem:[#allocation2 + $0xe2] sm:$0xff] }
 0x38f   : > { %v8342_v7 = vld [vmem:[#allocation2 + $0xe0] sm:$0xff]  ;;  %3011 = vst [vmem:[#allocation2 + $0xf9] sm:$0xff] %v2979_v33  ;;  %v2948_v42 = vadd.f32 %v8135_v46, %v2908_v17  ;;  %v2805_v37 = vadd.f32 %v8127_v63, %v2766_v41  ;;  %v2665_v24 = vadd.f32 %v8101_v25, %v2439_v35  ;;  %v2441_v14 = vpop.f32.mrb[45].mxu0  ;;  %5678 = vmatprep.mubr.f32.mxu0 %v8340_v0 }
 0x390   : > { %4193 = vmatmul.mubr.f32.gmra.mrb[70].mxu1 %v8342_v7  ;;  %5679 = vmatmul.mubr.f32.gmra.mrb[78].mxu0 %v8344_v23 }
 0x391   : > { %4197 = vmatprep.mubr.f32.mxu1 %v2978_v54  ;;  %v2980_v38 = vmax.f32 %v2948_v42, 0.0  ;;  %2837 = vst [vmem:[%s7227_s24 + $0xa8] sm:$0xff] %v2805_v37  ;;  %v2909_v5 = vmul.f32 %v8130_v4, %v2805_v37  ;;  %v2767_v39 = vadd.f32 %v2735_v6, %v2665_v24  ;;  %v2737_v37 = vld [vmem:[%s7227_s24 + $0xc0] sm:$0xff] }
 0x392   : > { %v2444_v45 = vpop.f32.mrb[46].mxu0  ;;  %v8355_v17 = vld [vmem:[#allocation2 + $0xf0] sm:$0xff] }
 0x393   : > { %3012 = vst [vmem:[#allocation2 + $0x109] sm:$0xff] %v2980_v38  ;;  %v2949_v25 = vadd.f32 %v8135_v46, %v2909_v5  ;;  %v2806_v41 = vadd.f32 %v8127_v63, %v2767_v39  ;;  %v2670_v35 = vadd.f32 %v8099_v61, %v2444_v45  ;;  %v2446_v14 = vpop.f32.mrb[47].mxu0 }
 0x394   : > { %4198 = vmatmul.mubr.f32.gmra.mrb[72].mxu1 %v8355_v17  ;;  %v2738_v14 = vld [vmem:[%s7227_s24 + $0xc8] sm:$0xff] }
 0x395   : > { %4202 = vmatprep.mubr.f32.mxu1 %v2979_v33  ;;  %v2981_v54 = vmax.f32 %v2949_v25, 0.0  ;;  %2838 = vst [vmem:[%s7227_s24 + $0xb0] sm:$0xff] %v2806_v41  ;;  %v2910_v42 = vmul.f32 %v8130_v4, %v2806_v41  ;;  %v2768_v6 = vadd.f32 %v2736_v20, %v2670_v35 }
 0x396   : > { %v2449_v24 = vpop.f32.mrb[48].mxu0  ;;  %v8364_v28 = vld [vmem:[#allocation2 + $0xf2] sm:$0xff]  ;;  %v8368_v5 = vld [vmem:[#allocation2 + $0xfa] sm:$0xff] }
 0x397   : > { %v8366_v44 = vld [vmem:[#allocation2 + $0xf8] sm:$0xff]  ;;  %3013 = vst [vmem:[#allocation2 + $0x111] sm:$0xff] %v2981_v54  ;;  %v2950_v61 = vadd.f32 %v8135_v46, %v2910_v42  ;;  %v2807_v33 = vadd.f32 %v8127_v63, %v2768_v6  ;;  %v2675_v39 = vadd.f32 %v8106_v22, %v2449_v24  ;;  %v2451_v45 = vpop.f32.mrb[49].mxu0  ;;  %5681 = vmatprep.mubr.f32.mxu0 %v8364_v28 }
 0x398   : > { %4203 = vmatmul.mubr.f32.gmra.mrb[74].mxu1 %v8366_v44  ;;  %5682 = vmatmul.mubr.f32.gmra.mrb[80].mxu0 %v8368_v5 }
 0x399   : > { %4207 = vmatprep.mubr.f32.mxu1 %v2980_v38  ;;  %v2982_v20 = vmax.f32 %v2950_v61, 0.0  ;;  %2839 = vst [vmem:[%s7227_s24 + $0xb8] sm:$0xff] %v2807_v33  ;;  %v2911_v25 = vmul.f32 %v8130_v4, %v2807_v33  ;;  %v2769_v41 = vadd.f32 %v2737_v37, %v2675_v39  ;;  %v2739_v33 = vld [vmem:[%s7227_s24 + $0xd0] sm:$0xff] }
 0x39a   : > { %v2454_v35 = vpop.f32.mrb[50].mxu0  ;;  %v8379_v42 = vld [vmem:[#allocation2 + $0x108] sm:$0xff] }
 0x39b   : > { %3014 = vst [vmem:[#allocation2 + $0x121] sm:$0xff] %v2982_v20  ;;  %v2951_v22 = vadd.f32 %v8135_v46, %v2911_v25  ;;  %v2808_v6 = vadd.f32 %v8127_v63, %v2769_v41  ;;  %v2680_v24 = vadd.f32 %v8104_v50, %v2454_v35  ;;  %v2456_v45 = vpop.f32.mrb[51].mxu0 }
 0x39c   : > { %4208 = vmatmul.mubr.f32.gmra.mrb[76].mxu1 %v8379_v42  ;;  %v2740_v45 = vld [vmem:[%s7227_s24 + $0xd8] sm:$0xff] }
 0x39d   : > { %4212 = vmatprep.mubr.f32.mxu1 %v2981_v54  ;;  %v2983_v38 = vmax.f32 %v2951_v22, 0.0  ;;  %2840 = vst [vmem:[%s7227_s24 + $0xc0] sm:$0xff] %v2808_v6  ;;  %v2912_v61 = vmul.f32 %v8130_v4, %v2808_v6  ;;  %v2770_v37 = vadd.f32 %v2738_v14, %v2680_v24 }
 0x39e   : > { %v2459_v39 = vpop.f32.mrb[52].mxu0  ;;  %v8388_v3 = vld [vmem:[#allocation2 + $0x10a] sm:$0xff]  ;;  %v8392_v25 = vld [vmem:[#allocation2 + $0x112] sm:$0xff] }
 0x39f   : > { %v8390_v16 = vld [vmem:[#allocation2 + $0x110] sm:$0xff]  ;;  %3015 = vst [vmem:[#allocation2 + $0x129] sm:$0xff] %v2983_v38  ;;  %v2952_v50 = vadd.f32 %v8135_v46, %v2912_v61  ;;  %v2809_v54 = vadd.f32 %v8127_v63, %v2770_v37  ;;  %v2685_v41 = vadd.f32 %v8111_v60, %v2459_v39  ;;  %v2461_v35 = vpop.f32.mrb[53].mxu0  ;;  %5684 = vmatprep.mubr.f32.mxu0 %v8388_v3 }
 0x3a0   : > { %4213 = vmatmul.mubr.f32.gmra.mrb[78].mxu1 %v8390_v16  ;;  %5685 = vmatmul.mubr.f32.gmra.mrb[82].mxu0 %v8392_v25 }
 0x3a1   : > { %4217 = vmatprep.mubr.f32.mxu1 %v2982_v20  ;;  %v2984_v14 = vmax.f32 %v2952_v50, 0.0  ;;  %2841 = vst [vmem:[%s7227_s24 + $0xc8] sm:$0xff] %v2809_v54  ;;  %v2913_v22 = vmul.f32 %v8130_v4, %v2809_v54  ;;  %v2771_v6 = vadd.f32 %v2739_v33, %v2685_v41  ;;  %v2741_v54 = vld [vmem:[%s7227_s24 + $0xe0] sm:$0xff] }
 0x3a2   : > { %v2464_v24 = vpop.f32.mrb[54].mxu0  ;;  %v8403_v61 = vld [vmem:[#allocation2 + $0x120] sm:$0xff] }
 0x3a3   : > { %3016 = vst [vmem:[#allocation2 + $0x139] sm:$0xff] %v2984_v14  ;;  %v2953_v60 = vadd.f32 %v8135_v46, %v2913_v22  ;;  %v2810_v37 = vadd.f32 %v8127_v63, %v2771_v6  ;;  %v2690_v39 = vadd.f32 %v8109_v53, %v2464_v24  ;;  %v2466_v35 = vpop.f32.mrb[55].mxu0 }
 0x3a4   : > { %4218 = vmatmul.mubr.f32.gmra.mrb[80].mxu1 %v8403_v61  ;;  %v2742_v35 = vld [vmem:[%s7227_s24 + $0xe8] sm:$0xff] }
 0x3a5   : > { %4222 = vmatprep.mubr.f32.mxu1 %v2983_v38  ;;  %v2985_v20 = vmax.f32 %v2953_v60, 0.0  ;;  %2842 = vst [vmem:[%s7227_s24 + $0xd0] sm:$0xff] %v2810_v37  ;;  %v2914_v50 = vmul.f32 %v8130_v4, %v2810_v37  ;;  %v2772_v33 = vadd.f32 %v2740_v45, %v2690_v39 }
 0x3a6   : > { %v2469_v41 = vpop.f32.mrb[56].mxu0  ;;  %v8412_v57 = vld [vmem:[#allocation2 + $0x122] sm:$0xff]  ;;  %v8416_v22 = vld [vmem:[#allocation2 + $0x12a] sm:$0xff] }
 0x3a7   : > { %v8414_v58 = vld [vmem:[#allocation2 + $0x128] sm:$0xff]  ;;  %9062 = vst [vmem:[#allocation26_spill] sm:$0xff] %v8416_v22  ;;  %3017 = vst [vmem:[#allocation2 + $0x141] sm:$0xff] %v2985_v20  ;;  %v2954_v53 = vadd.f32 %v8135_v46, %v2914_v50  ;;  %v2811_v38 = vadd.f32 %v8127_v63, %v2772_v33  ;;  %v2695_v6 = vadd.f32 %v8116_v10, %v2469_v41  ;;  %v2471_v24 = vpop.f32.mrb[57].mxu0  ;;  %5687 = vmatprep.mubr.f32.mxu0 %v8412_v57 }
 0x3a8   : > { %4223 = vmatmul.mubr.f32.gmra.mrb[82].mxu1 %v8414_v58  ;;  %5688 = vmatmul.mubr.f32.gmra.mrb[84].mxu0 %v8416_v22 }
 0x3a9   : > { %4227 = vmatprep.mubr.f32.mxu1 %v2984_v14  ;;  %v2986_v45 = vmax.f32 %v2954_v53, 0.0  ;;  %2843 = vst [vmem:[%s7227_s24 + $0xd8] sm:$0xff] %v2811_v38  ;;  %v2915_v60 = vmul.f32 %v8130_v4, %v2811_v38  ;;  %v2773_v37 = vadd.f32 %v2741_v54, %v2695_v6  ;;  %v2743_v38 = vld [vmem:[%s7227_s24 + $0xf0] sm:$0xff] }
 0x3aa   : > { %v2474_v39 = vpop.f32.mrb[58].mxu0  ;;  %v8427_v50 = vld [vmem:[#allocation2 + $0x138] sm:$0xff] }
 0x3ab   : > { %3018 = vst [vmem:[#allocation2 + $0x151] sm:$0xff] %v2986_v45  ;;  %v2955_v10 = vadd.f32 %v8135_v46, %v2915_v60  ;;  %v2812_v33 = vadd.f32 %v8127_v63, %v2773_v37  ;;  %v2700_v41 = vadd.f32 %v8114_v34, %v2474_v39  ;;  %v2476_v24 = vpop.f32.mrb[59].mxu0 }
 0x3ac   : > { %4228 = vmatmul.mubr.f32.gmra.mrb[84].mxu1 %v8427_v50  ;;  %v2744_v24 = vld [vmem:[%s7227_s24 + $0xf8] sm:$0xff] }
 0x3ad   : > { %4232 = vmatprep.mubr.f32.mxu1 %v2985_v20  ;;  %v2987_v14 = vmax.f32 %v2955_v10, 0.0  ;;  %2844 = vst [vmem:[%s7227_s24 + $0xe0] sm:$0xff] %v2812_v33  ;;  %v2916_v53 = vmul.f32 %v8130_v4, %v2812_v33  ;;  %v2774_v54 = vadd.f32 %v2742_v35, %v2700_v41 }
 0x3ae   : > { %v2479_v6 = vpop.f32.mrb[60].mxu0  ;;  %v8436_v18 = vld [vmem:[#allocation2 + $0x13a] sm:$0xff]  ;;  %v8440_v60 = vld [vmem:[#allocation2 + $0x142] sm:$0xff] }
 0x3af   : > { %v8438_v22 = vld [vmem:[#allocation2 + $0x140] sm:$0xff]  ;;  %3019 = vst [vmem:[#allocation2 + $0x159] sm:$0xff] %v2987_v14  ;;  %v2956_v34 = vadd.f32 %v8135_v46, %v2916_v53  ;;  %v2813_v20 = vadd.f32 %v8127_v63, %v2774_v54  ;;  %v2705_v37 = vadd.f32 %v8121_v19, %v2479_v6  ;;  %v2481_v39 = vpop.f32.mrb[61].mxu0  ;;  %5690 = vmatprep.mubr.f32.mxu0 %v8436_v18 }
 0x3b0   : > { %4233 = vmatmul.mubr.f32.gmra.mrb[86].mxu1 %v8438_v22  ;;  %5691 = vmatmul.mubr.f32.gmra.mrb[86].mxu0 %v8440_v60 }
 0x3b1   : > { %4237 = vmatprep.mubr.f32.mxu1 %v2986_v45  ;;  %v2988_v35 = vmax.f32 %v2956_v34, 0.0  ;;  %2845 = vst [vmem:[%s7227_s24 + $0xe8] sm:$0xff] %v2813_v20  ;;  %v2917_v10 = vmul.f32 %v8130_v4, %v2813_v20  ;;  %v2775_v33 = vadd.f32 %v2743_v38, %v2705_v37 }
 0x3b2   : > { %v2484_v41 = vpop.f32.mrb[62].mxu0  ;;  %v8451_v53 = vld [vmem:[#allocation2 + $0x150] sm:$0xff] }
 0x3b3   : > { %3020 = vst [vmem:[#allocation2 + $0x169] sm:$0xff] %v2988_v35  ;;  %v2957_v19 = vadd.f32 %v8135_v46, %v2917_v10  ;;  %v2814_v54 = vadd.f32 %v8127_v63, %v2775_v33  ;;  %v2710_v6 = vadd.f32 %v8119_v62, %v2484_v41  ;;  %v2486_v39 = vpop.f32.mrb[63].mxu0 }
 0x3b4   : > { %4238 = vmatmul.mubr.f32.gmra.mrb[88].mxu1 %v8451_v53  ;;  %v3956_v39 = vld [vmem:[#allocation10 + $0x698] sm:$0xff] }
 0x3b5   : > { %4242 = vmatprep.mubr.f32.mxu1 %v2987_v14  ;;  %v2989_v45 = vmax.f32 %v2957_v19, 0.0  ;;  %2846 = vst [vmem:[%s7227_s24 + $0xf0] sm:$0xff] %v2814_v54  ;;  %v2918_v38 = vmul.f32 %v8130_v4, %v2814_v54  ;;  %v2776_v34 = vadd.f32 %v2744_v24, %v2710_v6  ;;  %v3953_v24 = vld [vmem:[#allocation10 + $0x680] sm:$0xff]  ;;  %v3152_v54 = vld [vmem:[#allocation2 + $0x2] sm:$0xff] }
 0x3b6   : > { %v8459_v20 = vld [vmem:[#allocation2 + $0x158] sm:$0xff] }
 0x3b7   : > { %3021 = vst [vmem:[#allocation2 + $0x171] sm:$0xff] %v2989_v45  ;;  %v8462_v37 = vadd.f32 %v8135_v46, %v2918_v38  ;;  %v2815_v10 = vadd.f32 %v8127_v63, %v2776_v34  ;;  %v3217_v38 = vld [vmem:[#allocation2 + $0x20] sm:$0xff] }
 0x3b8   : > { %4243 = vmatmul.mubr.f32.gmra.mrb[90].mxu1 %v8459_v20 }
 0x3b9   : > { %4247 = vmatprep.mubr.f32.mxu1 %v2988_v35  ;;  %v9024_v62 = vmax.f32 %v8462_v37, 0.0  ;;  %2847 = vst [vmem:[%s7227_s24 + $0xf8] sm:$0xff] %v2815_v10  ;;  %v2919_v14 = vmul.f32 %v8130_v4, %v2815_v10  ;;  %v3954_v35 = vld [vmem:[#allocation10 + $0x688] sm:$0xff]  ;;  %v9063_v10 = vmov 0.0|0.0  }
 0x3ba   : > { %v8469_v33 = vld [vmem:[#allocation2 + $0x168] sm:$0xff]  ;;  %v3216_v4 = vld [vmem:[#allocation2 + $0x18] sm:$0xff]  ;;  %v6026_v6 = vpack.c.bf16 %v3954_v35, %v3953_v24 }
 0x3bb   : > { %3022 = vst [vmem:[#allocation2 + $0x181] sm:$0xff] %v9024_v62  ;;  %v8474_v41 = vadd.f32 %v8135_v46, %v2919_v14  ;;  %v3955_v46 = vld [vmem:[#allocation10 + $0x690] sm:$0xff]  ;;  %v3957_v14 = vld [vmem:[#allocation10 + $0x6a0] sm:$0xff]  ;;  %v3958_v62 = vld [vmem:[#allocation10 + $0x6a8] sm:$0xff] }
 0x3bc   : > { %4248 = vmatmul.mubr.f32.gmra.mrb[92].mxu1 %v8469_v33  ;;  %v6029_v34 = vpack.c.bf16 %v3956_v39, %v3955_v46  ;;  %v3959_v24 = vld [vmem:[#allocation10 + $0x6b0] sm:$0xff]  ;;  %v3960_v35 = vld [vmem:[#allocation10 + $0x6b8] sm:$0xff]  ;;  %v3961_v46 = vld [vmem:[#allocation10 + $0x6c0] sm:$0xff] }
 0x3bd   : > { %4252 = vmatprep.mubr.f32.mxu1 %v2989_v45  ;;  %v9025_v63 = vmax.f32 %v8474_v41, 0.0  ;;  %v3153_v45 = vld [vmem:[#allocation2 + $0xa] sm:$0xff]  ;;  %v3962_v39 = vld [vmem:[#allocation10 + $0x6c8] sm:$0xff] }
 0x3be   : > { %v8478_v19 = vld [vmem:[#allocation2 + $0x170] sm:$0xff] }
 0x3bf   : > { %3023 = vst [vmem:[#allocation2 + $0x189] sm:$0xff] %v9025_v63  ;;  %v8484_v63 = vld [vmem:[#allocation2 + $0x30] sm:$0xff] }
 0x3c0   : > { %4253 = vmatmul.mubr.f32.gmra.mrb[94].mxu1 %v8478_v19 }
 0x3c1   : > { %4322 = vmatprep.mubr.f32.mxu1 %v3216_v4  ;;  %v6032_v4 = vpack.c.bf16 %v3958_v62, %v3957_v14  ;;  %v6038_v62 = vpack.c.bf16 %v3962_v39, %v3961_v46  ;;  %v8498_v14 = vld [vmem:[#allocation2 + $0x32] sm:$0xff] }
 0x3c2   : > { %v3968_v46 = vld [vmem:[#allocation10 + $0x6f8] sm:$0xff]  ;;  %v3969_v39 = vld [vmem:[#allocation10 + $0x700] sm:$0xff] }
 0x3c4   : > { %4323 = vmatmul.mubr.f32.vlgmr.msra.gmra.mrb[32].mxu1 %v3152_v54  ;;  %v8488_v54 = vld [vmem:[#allocation2 + $0x1a] sm:$0xff] }
 0x3c5   : > { %4327 = vmatprep.mubr.f32.mxu1 %v3217_v38  ;;  %6027 = vmatpush1.bf16.msra.mxu1 %v6026_v6  ;;  %v6035_v6 = vpack.c.bf16 %v3960_v35, %v3959_v24  ;;  %v8493_v38 = vld [vmem:[#allocation2 + $0x22] sm:$0xff]  ;;  %v8503_v35 = vld [vmem:[#allocation2 + $0x3a] sm:$0xff] }
 0x3c6   : > { %6028 = vmatprep.subr.bf16.mxu1 %v9063_v10  ;;  %v3966_v24 = vld [vmem:[#allocation10 + $0x6e8] sm:$0xff] }
 0x3c8   : > { %4328 = vmatmul.mubr.f32.gmra.mrb[34].mxu1 %v3153_v45  ;;  %v3963_v45 = vld [vmem:[#allocation10 + $0x6d0] sm:$0xff] }
 0x3c9   : > { %4332 = vmatprep.mubr.f32.mxu1 %v8484_v63  ;;  %6030 = vmatpush1.bf16.msra.mxu1 %v6029_v34  ;;  %v3964_v34 = vld [vmem:[#allocation10 + $0x6d8] sm:$0xff] }
 0x3ca   : > { %6031 = vmatprep.subr.bf16.mxu1 %v9063_v10 }
 0x3cc   : > { %4333 = vmatmul.mubr.f32.gmra.mrb[36].mxu1 %v8488_v54 }
 0x3cd   : > { %4337 = vmatprep.mubr.f32.mxu1 %v8178_v47  ;;  %6033 = vmatpush1.bf16.msra.mxu1 %v6032_v4  ;;  %v6041_v47 = vpack.c.bf16 %v3964_v34, %v3963_v45  ;;  %v3965_v4 = vld [vmem:[#allocation10 + $0x6e0] sm:$0xff]  ;;  %v3971_v45 = vld [vmem:[#allocation10 + $0x710] sm:$0xff]  ;;  %v3972_v34 = vld [vmem:[#allocation10 + $0x718] sm:$0xff] }
 0x3ce   : > { %6034 = vmatprep.subr.bf16.mxu1 %v9063_v10 }
 0x3d0   : > { %4338 = vmatmul.mubr.f32.gmra.mrb[38].mxu1 %v8493_v38 }
 0x3d1   : > { %4342 = vmatprep.mubr.f32.mxu1 %v8187_v31  ;;  %6036 = vmatpush1.bf16.msra.mxu1 %v6035_v6  ;;  %v6044_v31 = vpack.c.bf16 %v3966_v24, %v3965_v4  ;;  %v3967_v6 = vld [vmem:[#allocation10 + $0x6f0] sm:$0xff]  ;;  %v3976_v4 = vld [vmem:[#allocation10 + $0x738] sm:$0xff]  ;;  %v3978_v24 = vld [vmem:[#allocation10 + $0x748] sm:$0xff] }
 0x3d2   : > { %6037 = vmatprep.subr.bf16.mxu1 %v9063_v10 }
 0x3d4   : > { %4343 = vmatmul.mubr.f32.gmra.mrb[40].mxu1 %v8498_v14 }
 0x3d5   : > { %4347 = vmatprep.mubr.f32.mxu1 %v8198_v9  ;;  %6039 = vmatpush1.bf16.msra.mxu1 %v6038_v62  ;;  %v6047_v9 = vpack.c.bf16 %v3968_v46, %v3967_v6  ;;  %v3970_v62 = vld [vmem:[#allocation10 + $0x708] sm:$0xff]  ;;  %v3984_v46 = vld [vmem:[#allocation10 + $0x778] sm:$0xff] }
 0x3d6   : > { %6040 = vmatprep.subr.bf16.mxu1 %v9063_v10  ;;  %v3982_v6 = vld [vmem:[#allocation10 + $0x768] sm:$0xff] }
 0x3d8   : > { %4348 = vmatmul.mubr.f32.gmra.mrb[42].mxu1 %v8503_v35 }
 0x3d9   : > { %4352 = vmatprep.mubr.f32.mxu1 %v8211_v40  ;;  %6042 = vmatpush1.bf16.msra.mxu1 %v6041_v47  ;;  %v6050_v40 = vpack.c.bf16 %v3970_v62, %v3969_v39  ;;  %v3974_v47 = vld [vmem:[#allocation10 + $0x728] sm:$0xff]  ;;  %v3991_v39 = vld [vmem:[#allocation10 + $0x7b0] sm:$0xff]  ;;  %v3992_v62 = vld [vmem:[#allocation10 + $0x7b8] sm:$0xff] }
 0x3da   : > { %6043 = vmatprep.subr.bf16.mxu1 %v9063_v10 }
 0x3dc   : > { %4353 = vmatmul.mubr.f32.gmra.mrb[44].mxu1 %v8196_v26  ;;  %v6053_v26 = vpack.c.bf16 %v3972_v34, %v3971_v45  ;;  %v6083_v34 = vpack.c.bf16 %v3992_v62, %v3991_v39  ;;  %v3353_v62 = vld [vmem:[#allocation2 + $0x82] sm:$0xff] }
 0x3dd   : > { %4357 = vmatprep.mubr.f32.mxu1 %v8222_v21  ;;  %6045 = vmatpush1.bf16.msra.mxu1 %v6044_v31  ;;  %v3973_v21 = vld [vmem:[#allocation10 + $0x720] sm:$0xff]  ;;  %v3980_v31 = vld [vmem:[#allocation10 + $0x758] sm:$0xff] }
 0x3de   : > { %6046 = vmatprep.subr.bf16.mxu1 %v9063_v10 }
 0x3e0   : > { %4358 = vmatmul.mubr.f32.gmra.mrb[46].mxu1 %v8200_v55  ;;  %v6056_v55 = vpack.c.bf16 %v3974_v47, %v3973_v21  ;;  %v8611_v21 = vld [vmem:[#allocation2 + $0x39] sm:$0xff]  ;;  %v3348_v47 = vld [vmem:[#allocation2 + $0x4a] sm:$0xff] }
 0x3e1   : > { %4362 = vmatprep.mubr.f32.mxu1 %v8235_v2  ;;  %6048 = vmatpush1.bf16.msra.mxu1 %v6047_v9  ;;  %v3975_v2 = vld [vmem:[#allocation10 + $0x730] sm:$0xff] }
 0x3e2   : > { %6049 = vmatprep.subr.bf16.mxu1 %v9063_v10  ;;  %v3281_v9 = vld [vmem:[#allocation2 + $0x21] sm:$0xff] }
 0x3e4   : > { %4363 = vmatmul.mubr.f32.gmra.mrb[48].mxu1 %v8220_v30  ;;  %v6059_v30 = vpack.c.bf16 %v3976_v4, %v3975_v2  ;;  %v3995_v2 = vld [vmem:[#allocation10 + $0x7d0] sm:$0xff]  ;;  %v3996_v4 = vld [vmem:[#allocation10 + $0x7d8] sm:$0xff] }
 0x3e5   : > { %4367 = vmatprep.mubr.f32.mxu1 %v8246_v59  ;;  %6051 = vmatpush1.bf16.msra.mxu1 %v6050_v40  ;;  %v3977_v59 = vld [vmem:[#allocation10 + $0x740] sm:$0xff] }
 0x3e6   : > { %6052 = vmatprep.subr.bf16.mxu1 %v9063_v10  ;;  %v8602_v40 = vld [vmem:[#allocation2 + $0x31] sm:$0xff] }
 0x3e8   : > { %4368 = vmatmul.mubr.f32.gmra.mrb[50].mxu1 %v8224_v48  ;;  %v6062_v48 = vpack.c.bf16 %v3978_v24, %v3977_v59  ;;  %v3349_v59 = vld [vmem:[#allocation2 + $0x52] sm:$0xff] }
 0x3e9   : > { %4372 = vmatprep.mubr.f32.mxu1 %v8259_v52  ;;  %6054 = vmatpush1.bf16.msra.mxu1 %v6053_v26  ;;  %v3979_v52 = vld [vmem:[#allocation10 + $0x750] sm:$0xff]  ;;  %v3994_v26 = vld [vmem:[#allocation10 + $0x7c8] sm:$0xff] }
 0x3ea   : > { %6055 = vmatprep.subr.bf16.mxu1 %v9063_v10 }
 0x3ec   : > { %4373 = vmatmul.mubr.f32.gmra.mrb[52].mxu1 %v8244_v36  ;;  %v6065_v36 = vpack.c.bf16 %v3980_v31, %v3979_v52  ;;  %v3997_v52 = vld [vmem:[#allocation10 + $0x7e0] sm:$0xff]  ;;  %v3998_v31 = vld [vmem:[#allocation10 + $0x7e8] sm:$0xff] }
 0x3ed   : > { %4377 = vmatprep.mubr.f32.mxu1 %v8270_v8  ;;  %6057 = vmatpush1.bf16.msra.mxu1 %v6056_v55  ;;  %v3981_v8 = vld [vmem:[#allocation10 + $0x760] sm:$0xff] }
 0x3ee   : > { %6058 = vmatprep.subr.bf16.mxu1 %v9063_v10 }
 0x3f0   : > { %4378 = vmatmul.mubr.f32.gmra.mrb[54].mxu1 %v8248_v51  ;;  %v6068_v51 = vpack.c.bf16 %v3982_v6, %v3981_v8  ;;  %v3350_v8 = vld [vmem:[#allocation2 + $0x62] sm:$0xff]  ;;  %v6092_v6 = vpack.c.bf16 %v3998_v31, %v3997_v52  ;;  %v8651_v52 = vld [vmem:[#allocation2 + $0x91] sm:$0xff] }
 0x3f1   : > { %4382 = vmatprep.mubr.f32.mxu1 %v8283_v15  ;;  %6060 = vmatpush1.bf16.msra.mxu1 %v6059_v30  ;;  %v3983_v15 = vld [vmem:[#allocation10 + $0x770] sm:$0xff] }
 0x3f2   : > { %6061 = vmatprep.subr.bf16.mxu1 %v9063_v10  ;;  %v8615_v30 = vld [vmem:[#allocation2 + $0x49] sm:$0xff] }
 0x3f4   : > { %4383 = vmatmul.mubr.f32.gmra.mrb[56].mxu1 %v8268_v56  ;;  %v6071_v56 = vpack.c.bf16 %v3984_v46, %v3983_v15  ;;  %v4000_v15 = vld [vmem:[#allocation10 + $0x7f8] sm:$0xff]  ;;  %v8627_v46 = vld [vmem:[#allocation2 + $0x61] sm:$0xff] }
 0x3f5   : > { %4387 = vmatprep.mubr.f32.mxu1 %v8294_v49  ;;  %6063 = vmatpush1.bf16.msra.mxu1 %v6062_v48  ;;  %v8577_v49 = vld [vmem:[#allocation2 + $0x180] sm:$0xff]  ;;  %v6089_v48 = vpack.c.bf16 %v3996_v4, %v3995_v2  ;;  %v3354_v2 = vld [vmem:[#allocation2 + $0x92] sm:$0xff] }
 0x3f6   : > { %6064 = vmatprep.subr.bf16.mxu1 %v9063_v10 }
 0x3f8   : > { %4388 = vmatmul.mubr.f32.gmra.mrb[58].mxu1 %v8272_v1 }
 0x3f9   : > { %4392 = vmatprep.mubr.f32.mxu1 %v8307_v12  ;;  %6066 = vmatpush1.bf16.msra.mxu1 %v6065_v36  ;;  %v8623_v36 = vld [vmem:[#allocation2 + $0x51] sm:$0xff] }
 0x3fa   : > { %6067 = vmatprep.subr.bf16.mxu1 %v9063_v10 }
 0x3fc   : > { %4393 = vmatmul.mubr.f32.gmra.mrb[60].mxu1 %v8292_v32  ;;  %v8574_v32 = vld [vmem:[#allocation2 + $0x15a] sm:$0xff] }
 0x3fd   : > { %4397 = vmatprep.mubr.f32.mxu1 %v8318_v29  ;;  %6069 = vmatpush1.bf16.msra.mxu1 %v6068_v51  ;;  %v3999_v51 = vld [vmem:[#allocation10 + $0x7f0] sm:$0xff] }
 0x3fe   : > { %6070 = vmatprep.subr.bf16.mxu1 %v9063_v10 }
 0x400   : > { %4398 = vmatmul.mubr.f32.gmra.mrb[62].mxu1 %v8296_v13  ;;  %v8580_v13 = vld [vmem:[#allocation2 + $0x16a] sm:$0xff] }
 0x401   : > { %4402 = vmatprep.mubr.f32.mxu1 %v8331_v43  ;;  %6072 = vmatpush1.bf16.msra.mxu1 %v6071_v56  ;;  %v3986_v43 = vld [vmem:[#allocation10 + $0x788] sm:$0xff] }
 0x402   : > { %6073 = vmatprep.subr.bf16.mxu1 %v9063_v10 }
 0x404   : > { %4403 = vmatmul.mubr.f32.gmra.mrb[64].mxu1 %v8316_v11  ;;  %v8585_v11 = vld [vmem:[#allocation2 + $0x188] sm:$0xff] }
 0x405   : > { %4407 = vmatprep.mubr.f32.mxu1 %v8342_v7 }
 0x408   : > { %4408 = vmatmul.mubr.f32.gmra.mrb[66].mxu1 %v8320_v27  ;;  %v3985_v27 = vld [vmem:[#allocation10 + $0x780] sm:$0xff] }
 0x409   : > { %4412 = vmatprep.mubr.f32.mxu1 %v8355_v17  ;;  %v6074_v17 = vpack.c.bf16 %v3986_v43, %v3985_v27  ;;  %v3351_v27 = vld [vmem:[#allocation2 + $0x6a] sm:$0xff] }
 0x40c   : > { %4413 = vmatmul.mubr.f32.gmra.mrb[68].mxu1 %v8340_v0  ;;  %v9064_v0 = vld [vmem:[#allocation26_spill] sm:$0xff] }
 0x40d   : > { %4417 = vmatprep.mubr.f32.mxu1 %v8366_v44 }
 0x410   : > { %4418 = vmatmul.mubr.f32.gmra.mrb[70].mxu1 %v8344_v23  ;;  %v8590_v23 = vld [vmem:[#allocation2 + $0x172] sm:$0xff] }
 0x411   : > { %4422 = vmatprep.mubr.f32.mxu1 %v8379_v42  ;;  %v3987_v42 = vld [vmem:[#allocation10 + $0x790] sm:$0xff] }
 0x414   : > { %4423 = vmatmul.mubr.f32.gmra.mrb[72].mxu1 %v8364_v28 }
 0x415   : > { %4427 = vmatprep.mubr.f32.mxu1 %v8390_v16 }
 0x418   : > { %4428 = vmatmul.mubr.f32.gmra.mrb[74].mxu1 %v8368_v5 }
 0x419   : > { %4432 = vmatprep.mubr.f32.mxu1 %v8403_v61  ;;  %v3988_v61 = vld [vmem:[#allocation10 + $0x798] sm:$0xff] }
 0x41c   : > { %4433 = vmatmul.mubr.f32.gmra.mrb[76].mxu1 %v8388_v3 }
 0x41d   : > { %4437 = vmatprep.mubr.f32.mxu1 %v8414_v58  ;;  %v8566_v58 = vld [vmem:[#allocation2 + $0x152] sm:$0xff] }
 0x420   : > { %4438 = vmatmul.mubr.f32.gmra.mrb[78].mxu1 %v8392_v25 }
 0x421   : > { %4442 = vmatprep.mubr.f32.mxu1 %v8427_v50 }
 0x424   : > { %4443 = vmatmul.mubr.f32.gmra.mrb[80].mxu1 %v8412_v57 }
 0x425   : > { %4447 = vmatprep.mubr.f32.mxu1 %v8438_v22  ;;  %v3280_v22 = vld [vmem:[#allocation2 + $0x19] sm:$0xff] }
 0x428   : > { %4448 = vmatmul.mubr.f32.gmra.mrb[82].mxu1 %v9064_v0 }
 0x429   : > { %4452 = vmatprep.mubr.f32.mxu1 %v8451_v53 }
 0x42b   : > { %v8558_v16 = vpop.f32.mrb[64].mxu0 }
 0x42c   : > { %4453 = vmatmul.mubr.f32.gmra.mrb[84].mxu1 %v8436_v18  ;;  %v8561_v44 = vpop.f32.mrb[65].mxu0 }
 0x42d   : > { %4457 = vmatprep.mubr.f32.mxu1 %v8459_v20  ;;  %v6077_v20 = vpack.c.bf16 %v3988_v61, %v3987_v42  ;;  %v4001_v42 = vld [vmem:[#allocation10 + $0x800] sm:$0xff]  ;;  %v4002_v61 = vld [vmem:[#allocation10 + $0x808] sm:$0xff] }
 0x430   : > { %4458 = vmatmul.mubr.f32.gmra.mrb[86].mxu1 %v8440_v60 }
 0x431   : > { %4462 = vmatprep.mubr.f32.mxu1 %v8469_v33  ;;  %v3989_v33 = vld [vmem:[#allocation10 + $0x7a0] sm:$0xff] }
 0x433   : > { %v8568_v7 = vpop.f32.mrb[66].mxu0 }
 0x434   : > { %4463 = vmatmul.mubr.f32.gmra.mrb[88].mxu1 %v8566_v58  ;;  %v8571_v1 = vpop.f32.mrb[67].mxu0 }
 0x435   : > { %4467 = vmatprep.mubr.f32.mxu1 %v8478_v19  ;;  %v3990_v19 = vld [vmem:[#allocation10 + $0x7a8] sm:$0xff] }
 0x438   : > { %4468 = vmatmul.mubr.f32.gmra.mrb[90].mxu1 %v8574_v32 }
 0x439   : > { %4472 = vmatprep.mubr.f32.mxu1 %v8577_v49 }
 0x43b   : > { %v8582_v12 = vpop.f32.mrb[68].mxu0 }
 0x43c   : > { %4473 = vmatmul.mubr.f32.gmra.mrb[92].mxu1 %v8580_v13  ;;  %v8587_v29 = vpop.f32.mrb[69].mxu0 }
 0x43d   : > { %4477 = vmatprep.mubr.f32.mxu1 %v8585_v11 }
 0x440   : > { %4478 = vmatmul.mubr.f32.gmra.mrb[94].mxu1 %v8590_v23 }
 0x441   : > { %4547 = vmatprep.mubr.f32.mxu1 %v8488_v54  ;;  %v6080_v54 = vpack.c.bf16 %v3990_v19, %v3989_v33  ;;  %v6098_v33 = vpack.c.bf16 %v4002_v61, %v4001_v42  ;;  %v4003_v19 = vld [vmem:[#allocation10 + $0x810] sm:$0xff] }
 0x442   : > { %v3356_v42 = vld [vmem:[#allocation2 + $0xaa] sm:$0xff] }
 0x443   : > { %v8594_v50 = vpop.f32.mrb[70].mxu0 }
 0x444   : > { %4548 = vmatmul.mubr.f32.vlgmr.msra.gmra.mrb[32].mxu1 %v3280_v22  ;;  %v8596_v53 = vpop.f32.mrb[71].mxu0  ;;  %v8635_v22 = vld [vmem:[#allocation2 + $0x69] sm:$0xff] }
 0x445   : > { %4552 = vmatprep.mubr.f32.mxu1 %v8493_v38  ;;  %6075 = vmatpush1.bf16.msra.mxu1 %v6074_v17  ;;  %v6095_v17 = vpack.c.bf16 %v4000_v15, %v3999_v51  ;;  %v4009_v15 = vld [vmem:[#allocation10 + $0x840] sm:$0xff] }
 0x446   : > { %6076 = vmatprep.subr.bf16.mxu1 %v9063_v10 }
 0x448   : > { %4553 = vmatmul.mubr.f32.gmra.mrb[34].mxu1 %v3281_v9  ;;  %v4004_v9 = vld [vmem:[#allocation10 + $0x818] sm:$0xff] }
 0x449   : > { %4557 = vmatprep.mubr.f32.mxu1 %v8498_v14  ;;  %6078 = vmatpush1.bf16.msra.mxu1 %v6077_v20  ;;  %v3993_v14 = vld [vmem:[#allocation10 + $0x7c0] sm:$0xff] }
 0x44a   : > { %6079 = vmatprep.subr.bf16.mxu1 %v9063_v10  ;;  %v6086_v55 = vpack.c.bf16 %v3994_v26, %v3993_v14  ;;  %v3352_v20 = vld [vmem:[#allocation2 + $0x7a] sm:$0xff]  ;;  %v6101_v14 = vpack.c.bf16 %v4004_v9, %v4003_v19  ;;  %v8663_v19 = vld [vmem:[#allocation2 + $0xa9] sm:$0xff] }
 0x44b   : > { %v8604_v45 = vpop.f32.mrb[72].mxu0  ;;  %v4005_v26 = vld [vmem:[#allocation10 + $0x820] sm:$0xff] }
 0x44c   : > { %4558 = vmatmul.mubr.f32.gmra.mrb[36].mxu1 %v8602_v40  ;;  %v8607_v38 = vpop.f32.mrb[73].mxu0 }
 0x44d   : > { %4562 = vmatprep.mubr.f32.mxu1 %v8503_v35  ;;  %6081 = vmatpush1.bf16.msra.mxu1 %v6080_v54  ;;  %v8639_v54 = vld [vmem:[#allocation2 + $0x79] sm:$0xff] }
 0x44e   : > { %6082 = vmatprep.subr.bf16.mxu1 %v9063_v10 }
 0x450   : > { %4563 = vmatmul.mubr.f32.gmra.mrb[38].mxu1 %v8611_v21 }
 0x451   : > { %4567 = vmatprep.mubr.f32.mxu1 %v3348_v47  ;;  %6084 = vmatpush1.bf16.msra.mxu1 %v6083_v34  ;;  %v4006_v47 = vld [vmem:[#allocation10 + $0x828] sm:$0xff] }
 0x452   : > { %6085 = vmatprep.subr.bf16.mxu1 %v9063_v10  ;;  %v6104_v4 = vpack.c.bf16 %v4006_v47, %v4005_v26  ;;  %v4013_v47 = vld [vmem:[#allocation10 + $0x860] sm:$0xff] }
 0x453   : > { %v8617_v35 = vpop.f32.mrb[74].mxu0 }
 0x454   : > { %4568 = vmatmul.mubr.f32.gmra.mrb[40].mxu1 %v8615_v30  ;;  %v8620_v24 = vpop.f32.mrb[75].mxu0 }
 0x455   : > { %4572 = vmatprep.mubr.f32.mxu1 %v3349_v59  ;;  %6087 = vmatpush1.bf16.msra.mxu1 %v6086_v55  ;;  %v8647_v55 = vld [vmem:[#allocation2 + $0x81] sm:$0xff] }
 0x456   : > { %6088 = vmatprep.subr.bf16.mxu1 %v9063_v10  ;;  %v4007_v59 = vld [vmem:[#allocation10 + $0x830] sm:$0xff] }
 0x458   : > { %4573 = vmatmul.mubr.f32.gmra.mrb[42].mxu1 %v8623_v36 }
 0x459   : > { %4577 = vmatprep.mubr.f32.mxu1 %v3350_v8  ;;  %6090 = vmatpush1.bf16.msra.mxu1 %v6089_v48  ;;  %v4008_v48 = vld [vmem:[#allocation10 + $0x838] sm:$0xff]  ;;  %v3355_v8 = vld [vmem:[#allocation2 + $0x9a] sm:$0xff] }
 0x45a   : > { %6091 = vmatprep.subr.bf16.mxu1 %v9063_v10  ;;  %v6107_v51 = vpack.c.bf16 %v4008_v48, %v4007_v59  ;;  %v3358_v59 = vld [vmem:[#allocation2 + $0xc2] sm:$0xff] }
 0x45b   : > { %v8629_v56 = vpop.f32.mrb[76].mxu0 }
 0x45c   : > { %4578 = vmatmul.mubr.f32.gmra.mrb[44].mxu1 %v8627_v46  ;;  %v8632_v43 = vpop.f32.mrb[77].mxu0 }
 0x45d   : > { %4582 = vmatprep.mubr.f32.mxu1 %v3351_v27  ;;  %6093 = vmatpush1.bf16.msra.mxu1 %v6092_v6  ;;  %v4010_v27 = vld [vmem:[#allocation10 + $0x848] sm:$0xff] }
 0x45e   : > { %6094 = vmatprep.subr.bf16.mxu1 %v9063_v10  ;;  %v6110_v61 = vpack.c.bf16 %v4010_v27, %v4009_v15  ;;  %v8675_v15 = vld [vmem:[#allocation2 + $0xc1] sm:$0xff] }
 0x460   : > { %4583 = vmatmul.mubr.f32.gmra.mrb[46].mxu1 %v8635_v22 }
 0x461   : > { %4587 = vmatprep.mubr.f32.mxu1 %v3352_v20  ;;  %6096 = vmatpush1.bf16.msra.mxu1 %v6095_v17  ;;  %v8659_v17 = vld [vmem:[#allocation2 + $0x99] sm:$0xff]  ;;  %v4011_v20 = vld [vmem:[#allocation10 + $0x850] sm:$0xff] }
 0x462   : > { %6097 = vmatprep.subr.bf16.mxu1 %v9063_v10 }
 0x463   : > { %v8641_v39 = vpop.f32.mrb[78].mxu0 }
 0x464   : > { %4588 = vmatmul.mubr.f32.gmra.mrb[48].mxu1 %v8639_v54  ;;  %v8644_v34 = vpop.f32.mrb[79].mxu0 }
 0x465   : > { %4592 = vmatprep.mubr.f32.mxu1 %v3353_v62  ;;  %6099 = vmatpush1.bf16.msra.mxu1 %v6098_v33  ;;  %v4012_v33 = vld [vmem:[#allocation10 + $0x858] sm:$0xff] }
 0x466   : > { %6100 = vmatprep.subr.bf16.mxu1 %v9063_v10  ;;  %v3357_v62 = vld [vmem:[#allocation2 + $0xb2] sm:$0xff]  ;;  %v6113_v26 = vpack.c.bf16 %v4012_v33, %v4011_v20  ;;  %v8683_v33 = vld [vmem:[#allocation2 + $0xc9] sm:$0xff] }
 0x468   : > { %4593 = vmatmul.mubr.f32.gmra.mrb[50].mxu1 %v8647_v55 }
 0x469   : > { %4597 = vmatprep.mubr.f32.mxu1 %v3354_v2  ;;  %6102 = vmatpush1.bf16.msra.mxu1 %v6101_v14  ;;  %v4014_v2 = vld [vmem:[#allocation10 + $0x868] sm:$0xff] }
 0x46a   : > { %6103 = vmatprep.subr.bf16.mxu1 %v9063_v10  ;;  %v6116_v48 = vpack.c.bf16 %v4014_v2, %v4013_v47  ;;  %v8687_v47 = vld [vmem:[#allocation2 + $0xd9] sm:$0xff] }
 0x46b   : > { %v8653_v31 = vpop.f32.mrb[80].mxu0 }
 0x46c   : > { %4598 = vmatmul.mubr.f32.gmra.mrb[52].mxu1 %v8651_v52  ;;  %v8656_v6 = vpop.f32.mrb[81].mxu0 }
 0x46d   : > { %4602 = vmatprep.mubr.f32.mxu1 %v3355_v8  ;;  %6105 = vmatpush1.bf16.msra.mxu1 %v6104_v4  ;;  %v8671_v4 = vld [vmem:[#allocation2 + $0xb1] sm:$0xff]  ;;  %v4015_v8 = vld [vmem:[#allocation10 + $0x870] sm:$0xff] }
 0x46e   : > { %6106 = vmatprep.subr.bf16.mxu1 %v9063_v10 }
 0x470   : > { %4603 = vmatmul.mubr.f32.gmra.mrb[54].mxu1 %v8659_v17 }
 0x471   : > { %4607 = vmatprep.mubr.f32.mxu1 %v3356_v42  ;;  %6108 = vmatpush1.bf16.msra.mxu1 %v6107_v51  ;;  %v4016_v51 = vld [vmem:[#allocation10 + $0x878] sm:$0xff] }
 0x472   : > { %6109 = vmatprep.subr.bf16.mxu1 %v9063_v10  ;;  %v3359_v42 = vld [vmem:[#allocation2 + $0xca] sm:$0xff]  ;;  %v6119_v20 = vpack.c.bf16 %v4016_v51, %v4015_v8  ;;  %v8702_v51 = vld [vmem:[#allocation2 + $0xf9] sm:$0xff] }
 0x473   : > { %v8665_v9 = vpop.f32.mrb[82].mxu0  ;;  %v8698_v8 = vld [vmem:[#allocation2 + $0xf1] sm:$0xff] }
 0x474   : > { %4608 = vmatmul.mubr.f32.gmra.mrb[56].mxu1 %v8663_v19  ;;  %v8668_v14 = vpop.f32.mrb[83].mxu0 }
 0x475   : > { %4612 = vmatprep.mubr.f32.mxu1 %v3357_v62  ;;  %6111 = vmatpush1.bf16.msra.mxu1 %v6110_v61  ;;  %v3360_v62 = vld [vmem:[#allocation2 + $0xda] sm:$0xff] }
 0x476   : > { %6112 = vmatprep.subr.bf16.mxu1 %v9063_v10 }
 0x478   : > { %4613 = vmatmul.mubr.f32.gmra.mrb[58].mxu1 %v8671_v4 }
 0x479   : > { %4617 = vmatprep.mubr.f32.mxu1 %v3358_v59  ;;  %6114 = vmatpush1.bf16.msra.mxu1 %v6113_v26  ;;  %v9067_v26 = vld [vmem:[#allocation18_spill] sm:$0xff]  ;;  %v3361_v59 = vld [vmem:[#allocation2 + $0xe2] sm:$0xff] }
 0x47a   : > { %6115 = vmatprep.subr.bf16.mxu1 %v9063_v10 }
 0x47b   : > { %v8677_v27 = vpop.f32.mrb[84].mxu0 }
 0x47c   : > { %9065 = vst [vmem:[#allocation26_spill] sm:$0xff] %v8677_v27  ;;  %4618 = vmatmul.mubr.f32.gmra.mrb[60].mxu1 %v8675_v15  ;;  %v8680_v61 = vpop.f32.mrb[85].mxu0  ;;  %v9072_v27 = vld [vmem:[#allocation19_spill] sm:$0xff] }
 0x47d   : > { %9066 = vst [vmem:[#allocation27_spill] sm:$0xff] %v8680_v61  ;;  %4622 = vmatprep.mubr.f32.mxu1 %v3359_v42  ;;  %6117 = vmatpush1.bf16.msra.mxu1 %v6116_v48  ;;  %v8706_v42 = vld [vmem:[#allocation2 + $0x109] sm:$0xff]  ;;  %v3409_v61 = vld [vmem:[#allocation2 + $0x38] sm:$0xff] }
 0x47e   : > { %6118 = vmatprep.subr.bf16.mxu1 %v9063_v10  ;;  %v8694_v10 = vld [vmem:[#allocation2 + $0xe1] sm:$0xff] }
 0x480   : > { %4623 = vmatmul.mubr.f32.gmra.mrb[62].mxu1 %v8683_v33 }
 0x481   : > { %4627 = vmatprep.mubr.f32.mxu1 %v3360_v62  ;;  %6120 = vmatpush1.bf16.msra.mxu1 %v6119_v20  ;;  %v8710_v20 = vld [vmem:[#allocation2 + $0x111] sm:$0xff]  ;;  %v8745_v62 = vld [vmem:[#allocation2 + $0x182] sm:$0xff] }
 0x482   : > { %6153 = vmatprep.subr.bf16.mxu1 %v9067_v26 }
 0x483   : > { %v8689_v2 = vpop.f32.mrb[86].mxu0 }
 0x484   : > { %9068 = vst [vmem:[#allocation18_spill] sm:$0xff] %v8689_v2  ;;  %4628 = vmatmul.mubr.f32.gmra.mrb[64].mxu1 %v8687_v47  ;;  %v8692_v48 = vpop.f32.mrb[87].mxu0  ;;  %v8750_v2 = vld [vmem:[#allocation2 + $0x18a] sm:$0xff] }
 0x485   : > { %9069 = vst [vmem:[#allocation28_spill] sm:$0xff] %v8692_v48  ;;  %4632 = vmatprep.mubr.f32.mxu1 %v3361_v59  ;;  %v9070_v59 = vmax.f32 %v8462_v37, 0.0  ;;  %v9071_v48 = vmax.f32 %v8474_v41, 0.0  ;;  %v9073_v37 = vld [vmem:[#allocation20_spill] sm:$0xff] }
 0x486   : > { %v3410_v41 = vld [vmem:[#allocation2 + $0x48] sm:$0xff] }
 0x488   : > { %4633 = vmatmul.mubr.f32.gmra.mrb[66].mxu1 %v8694_v10 }
 0x489   : > { %4637 = vmatprep.mubr.f32.mxu1 %v8364_v28  ;;  %v8714_v28 = vld [vmem:[#allocation2 + $0x121] sm:$0xff] }
 0x48c   : > { %4638 = vmatmul.mubr.f32.gmra.mrb[68].mxu1 %v8698_v8 }
 0x48d   : > { %4642 = vmatprep.mubr.f32.mxu1 %v8368_v5  ;;  %v8718_v5 = vld [vmem:[#allocation2 + $0x129] sm:$0xff] }
 0x490   : > { %4643 = vmatmul.mubr.f32.gmra.mrb[70].mxu1 %v8702_v51 }
 0x491   : > { %4647 = vmatprep.mubr.f32.mxu1 %v8388_v3  ;;  %v8722_v3 = vld [vmem:[#allocation2 + $0x139] sm:$0xff] }
 0x494   : > { %4648 = vmatmul.mubr.f32.gmra.mrb[72].mxu1 %v8706_v42 }
 0x495   : > { %4652 = vmatprep.mubr.f32.mxu1 %v8392_v25  ;;  %v8726_v25 = vld [vmem:[#allocation2 + $0x141] sm:$0xff] }
 0x498   : > { %4653 = vmatmul.mubr.f32.gmra.mrb[74].mxu1 %v8710_v20 }
 0x499   : > { %4657 = vmatprep.mubr.f32.mxu1 %v8412_v57  ;;  %v8730_v57 = vld [vmem:[#allocation2 + $0x151] sm:$0xff] }
 0x49c   : > { %4658 = vmatmul.mubr.f32.gmra.mrb[76].mxu1 %v8714_v28 }
 0x49d   : > { %4662 = vmatprep.mubr.f32.mxu1 %v9064_v0  ;;  %v8734_v0 = vld [vmem:[#allocation2 + $0x159] sm:$0xff] }
 0x4a0   : > { %4663 = vmatmul.mubr.f32.gmra.mrb[78].mxu1 %v8718_v5 }
 0x4a1   : > { %4667 = vmatprep.mubr.f32.mxu1 %v8436_v18  ;;  %v8738_v18 = vld [vmem:[#allocation2 + $0x169] sm:$0xff] }
 0x4a4   : > { %4668 = vmatmul.mubr.f32.gmra.mrb[80].mxu1 %v8722_v3 }
 0x4a5   : > { %4672 = vmatprep.mubr.f32.mxu1 %v8440_v60  ;;  %v8742_v60 = vld [vmem:[#allocation2 + $0x171] sm:$0xff] }
 0x4a8   : > { %4673 = vmatmul.mubr.f32.gmra.mrb[82].mxu1 %v8726_v25 }
 0x4a9   : > { %4677 = vmatprep.mubr.f32.mxu1 %v8566_v58 }
 0x4ac   : > { %4678 = vmatmul.mubr.f32.gmra.mrb[84].mxu1 %v8730_v57 }
 0x4ad   : > { %4682 = vmatprep.mubr.f32.mxu1 %v8574_v32 }
 0x4b0   : > { %4683 = vmatmul.mubr.f32.gmra.mrb[86].mxu1 %v8734_v0 }
 0x4b1   : > { %4687 = vmatprep.mubr.f32.mxu1 %v8580_v13 }
 0x4b4   : > { %4688 = vmatmul.mubr.f32.gmra.mrb[88].mxu1 %v8738_v18 }
 0x4b5   : > { %4692 = vmatprep.mubr.f32.mxu1 %v8590_v23 }
 0x4b8   : > { %4693 = vmatmul.mubr.f32.gmra.mrb[90].mxu1 %v8742_v60 }
 0x4b9   : > { %4697 = vmatprep.mubr.f32.mxu1 %v8745_v62 }
 0x4bc   : > { %4698 = vmatmul.mubr.f32.gmra.mrb[92].mxu1 %v9070_v59  ;;  %v3418_v59 = vld [vmem:[#allocation2 + $0xa8] sm:$0xff] }
 0x4bd   : > { %4702 = vmatprep.mubr.f32.mxu1 %v8750_v2 }
 0x4c0   : > { %4703 = vmatmul.mubr.f32.gmra.mrb[94].mxu1 %v9071_v48  ;;  %v3416_v48 = vld [vmem:[#allocation2 + $0x90] sm:$0xff] }
 0x4c1   : > { %4772 = vmatprep.mubr.f32.mxu1 %v8602_v40  ;;  %v3411_v40 = vld [vmem:[#allocation2 + $0x50] sm:$0xff] }
 0x4c4   : > { %4773 = vmatmul.mubr.f32.vlgmr.msra.gmra.mrb[32].mxu1 %v8484_v63  ;;  %v9074_v63 = vld [vmem:[#allocation21_spill] sm:$0xff] }
 0x4c5   : > { %4777 = vmatprep.mubr.f32.mxu1 %v8611_v21  ;;  %6161 = vmatpush3.bf16.msra.mxu1 %v9067_v26  ;;  %v9075_v21 = vld [vmem:[#allocation22_spill] sm:$0xff]  ;;  %v9078_v26 = vld [vmem:[#allocation25_spill] sm:$0xff] }
 0x4c6   : > { %6154 = vmatprep.subr.bf16.mxu1 %v9072_v27 }
 0x4c8   : > { %4778 = vmatmul.mubr.f32.gmra.mrb[34].mxu1 %v3409_v61  ;;  %v9077_v61 = vld [vmem:[#allocation24_spill] sm:$0xff] }
 0x4c9   : > { %4782 = vmatprep.mubr.f32.mxu1 %v8615_v30  ;;  %6162 = vmatpush3.bf16.msra.mxu1 %v9072_v27  ;;  %v3412_v30 = vld [vmem:[#allocation2 + $0x60] sm:$0xff] }
 0x4ca   : > { %6155 = vmatprep.subr.bf16.mxu1 %v9073_v37  ;;  %v9076_v27 = vld [vmem:[#allocation23_spill] sm:$0xff] }
 0x4cc   : > { %4783 = vmatmul.mubr.f32.gmra.mrb[36].mxu1 %v3410_v41  ;;  %v3500_v41 = vld [vmem:[#allocation2 + $0x181] sm:$0xff] }
 0x4cd   : > { %4787 = vmatprep.mubr.f32.mxu1 %v8623_v36  ;;  %6163 = vmatpush3.bf16.msra.mxu1 %v9073_v37  ;;  %v3413_v36 = vld [vmem:[#allocation2 + $0x68] sm:$0xff]  ;;  %v3420_v37 = vld [vmem:[#allocation2 + $0xc0] sm:$0xff] }
 0x4ce   : > { %6156 = vmatprep.subr.bf16.mxu1 %v9074_v63 }
 0x4d0   : > { %4788 = vmatmul.mubr.f32.gmra.mrb[38].mxu1 %v3411_v40 }
 0x4d1   : > { %4792 = vmatprep.mubr.f32.mxu1 %v8627_v46  ;;  %6164 = vmatpush3.bf16.msra.mxu1 %v9074_v63  ;;  %v3414_v46 = vld [vmem:[#allocation2 + $0x78] sm:$0xff]  ;;  %v6665_v63 = vld [vmem:[#allocation2] sm:$0xff] }
 0x4d2   : > { %6157 = vmatprep.subr.bf16.mxu1 %v9075_v21 }
 0x4d4   : > { %4793 = vmatmul.mubr.f32.gmra.mrb[40].mxu1 %v3412_v30  ;;  %v5159_v30 = vld [vmem:[%s7227_s24 + $0x8] sm:$0xff] }
 0x4d5   : > { %4797 = vmatprep.mubr.f32.mxu1 %v8635_v22  ;;  %6165 = vmatpush3.bf16.msra.mxu1 %v9075_v21  ;;  %v3415_v22 = vld [vmem:[#allocation2 + $0x80] sm:$0xff] }
 0x4d6   : > { %6158 = vmatprep.subr.bf16.mxu1 %v9076_v27 }
 0x4d8   : > { %4798 = vmatmul.mubr.f32.gmra.mrb[42].mxu1 %v3413_v36 }
 0x4d9   : > { %4802 = vmatprep.mubr.f32.mxu1 %v8639_v54  ;;  %6166 = vmatpush3.bf16.msra.mxu1 %v9076_v27  ;;  %v3417_v54 = vld [vmem:[#allocation2 + $0x98] sm:$0xff] }
 0x4da   : > { %6159 = vmatprep.subr.bf16.mxu1 %v9077_v61 }
 0x4dc   : > { %4803 = vmatmul.mubr.f32.gmra.mrb[44].mxu1 %v3414_v46 }
 0x4dd   : > { %4807 = vmatprep.mubr.f32.mxu1 %v8647_v55  ;;  %6167 = vmatpush3.bf16.msra.mxu1 %v9077_v61  ;;  %v3419_v55 = vld [vmem:[#allocation2 + $0xb0] sm:$0xff] }
 0x4de   : > { %6160 = vmatprep.subr.bf16.mxu1 %v9078_v26 }
 0x4e0   : > { %4808 = vmatmul.mubr.f32.gmra.mrb[46].mxu1 %v3415_v22 }
 0x4e1   : > { %4812 = vmatprep.mubr.f32.mxu1 %v8651_v52  ;;  %6168 = vmatpush3.bf16.msra.mxu1 %v9078_v26  ;;  %v3421_v52 = vld [vmem:[#allocation2 + $0xc8] sm:$0xff] }
 0x4e2   : > { %v5160_v26 = vld [vmem:[%s7227_s24 + $0x10] sm:$0xff] }
 0x4e4   : > { %4813 = vmatmul.mubr.f32.gmra.mrb[48].mxu1 %v3416_v48 }
 0x4e5   : > { %4817 = vmatprep.mubr.f32.mxu1 %v8659_v17  ;;  %v3422_v17 = vld [vmem:[#allocation2 + $0xd8] sm:$0xff] }
 0x4e8   : > { %4818 = vmatmul.mubr.f32.gmra.mrb[50].mxu1 %v3417_v54 }
 0x4e9   : > { %4822 = vmatprep.mubr.f32.mxu1 %v8663_v19  ;;  %v3423_v19 = vld [vmem:[#allocation2 + $0xe0] sm:$0xff] }
 0x4ec   : > { %4823 = vmatmul.mubr.f32.gmra.mrb[52].mxu1 %v3418_v59 }
 0x4ed   : > { %4827 = vmatprep.mubr.f32.mxu1 %v8671_v4  ;;  %v3424_v4 = vld [vmem:[#allocation2 + $0xf0] sm:$0xff] }
 0x4f0   : > { %4828 = vmatmul.mubr.f32.gmra.mrb[54].mxu1 %v3419_v55  ;;  %v5161_v55 = vld [vmem:[%s7227_s24 + $0x18] sm:$0xff] }
 0x4f1   : > { %4832 = vmatprep.mubr.f32.mxu1 %v8675_v15  ;;  %v3425_v15 = vld [vmem:[#allocation2 + $0xf8] sm:$0xff] }
 0x4f4   : > { %4833 = vmatmul.mubr.f32.gmra.mrb[56].mxu1 %v3420_v37 }
 0x4f5   : > { %4837 = vmatprep.mubr.f32.mxu1 %v8683_v33  ;;  %v3426_v33 = vld [vmem:[#allocation2 + $0x108] sm:$0xff] }
 0x4f8   : > { %4838 = vmatmul.mubr.f32.gmra.mrb[58].mxu1 %v3421_v52 }
 0x4f9   : > { %4842 = vmatprep.mubr.f32.mxu1 %v8687_v47  ;;  %v3427_v47 = vld [vmem:[#allocation2 + $0x110] sm:$0xff] }
 0x4fc   : > { %4843 = vmatmul.mubr.f32.gmra.mrb[60].mxu1 %v3422_v17 }
 0x4fd   : > { %4847 = vmatprep.mubr.f32.mxu1 %v8694_v10  ;;  %v3428_v10 = vld [vmem:[#allocation2 + $0x120] sm:$0xff] }
 0x500   : > { %4848 = vmatmul.mubr.f32.gmra.mrb[62].mxu1 %v3423_v19 }
 0x501   : > { %4852 = vmatprep.mubr.f32.mxu1 %v8698_v8  ;;  %v3429_v8 = vld [vmem:[#allocation2 + $0x128] sm:$0xff] }
 0x504   : > { %4853 = vmatmul.mubr.f32.gmra.mrb[64].mxu1 %v3424_v4  ;;  %v5162_v4 = vld [vmem:[%s7227_s24 + $0x20] sm:$0xff] }
 0x505   : > { %4857 = vmatprep.mubr.f32.mxu1 %v8702_v51  ;;  %v3430_v51 = vld [vmem:[#allocation2 + $0x138] sm:$0xff] }
 0x508   : > { %4858 = vmatmul.mubr.f32.gmra.mrb[66].mxu1 %v3425_v15 }
 0x509   : > { %4862 = vmatprep.mubr.f32.mxu1 %v8706_v42  ;;  %v3431_v42 = vld [vmem:[#allocation2 + $0x140] sm:$0xff] }
 0x50c   : > { %4863 = vmatmul.mubr.f32.gmra.mrb[68].mxu1 %v3426_v33 }
 0x50d   : > { %4867 = vmatprep.mubr.f32.mxu1 %v8710_v20  ;;  %v3432_v20 = vld [vmem:[#allocation2 + $0x150] sm:$0xff] }
 0x510   : > { %4868 = vmatmul.mubr.f32.gmra.mrb[70].mxu1 %v3427_v47 }
 0x511   : > { %4872 = vmatprep.mubr.f32.mxu1 %v8714_v28  ;;  %v3433_v28 = vld [vmem:[#allocation2 + $0x158] sm:$0xff] }
 0x514   : > { %4873 = vmatmul.mubr.f32.gmra.mrb[72].mxu1 %v3428_v10 }
 0x515   : > { %4877 = vmatprep.mubr.f32.mxu1 %v8718_v5  ;;  %v3434_v5 = vld [vmem:[#allocation2 + $0x168] sm:$0xff] }
 0x518   : > { %4878 = vmatmul.mubr.f32.gmra.mrb[74].mxu1 %v3429_v8  ;;  %v5163_v8 = vld [vmem:[%s7227_s24 + $0x28] sm:$0xff] }
 0x519   : > { %4882 = vmatprep.mubr.f32.mxu1 %v8722_v3  ;;  %v3435_v3 = vld [vmem:[#allocation2 + $0x170] sm:$0xff] }
 0x51c   : > { %4883 = vmatmul.mubr.f32.gmra.mrb[76].mxu1 %v3430_v51 }
 0x51d   : > { %4887 = vmatprep.mubr.f32.mxu1 %v8726_v25  ;;  %v3501_v25 = vld [vmem:[#allocation2 + $0x189] sm:$0xff] }
 0x520   : > { %4888 = vmatmul.mubr.f32.gmra.mrb[78].mxu1 %v3431_v42 }
 0x521   : > { %4892 = vmatprep.mubr.f32.mxu1 %v8730_v57  ;;  %v3502_v57 = vld [vmem:[#allocation2 + $0x199] sm:$0xff] }
 0x524   : > { %4893 = vmatmul.mubr.f32.gmra.mrb[80].mxu1 %v3432_v20 }
 0x525   : > { %4897 = vmatprep.mubr.f32.mxu1 %v8734_v0  ;;  %v3503_v0 = vld [vmem:[#allocation2 + $0x1a1] sm:$0xff] }
 0x528   : > { %4898 = vmatmul.mubr.f32.gmra.mrb[82].mxu1 %v3433_v28 }
 0x529   : > { %4902 = vmatprep.mubr.f32.mxu1 %v8738_v18 }
 0x52c   : > { %4903 = vmatmul.mubr.f32.gmra.mrb[84].mxu1 %v3434_v5  ;;  %v5164_v5 = vld [vmem:[%s7227_s24 + $0x30] sm:$0xff] }
 0x52d   : > { %4907 = vmatprep.mubr.f32.mxu1 %v8742_v60 }
 0x530   : > { %4908 = vmatmul.mubr.f32.gmra.mrb[86].mxu1 %v3435_v3 }
 0x531   : > { %4912 = vmatprep.mubr.f32.mxu1 %v3500_v41 }
 0x534   : > { %4913 = vmatmul.mubr.f32.gmra.mrb[88].mxu1 %v8577_v49  ;;  %v3566_v49 = vld [vmem:[#allocation2 + $0x19a] sm:$0xff] }
 0x535   : > { %4917 = vmatprep.mubr.f32.mxu1 %v3501_v25 }
 0x538   : > { %4918 = vmatmul.mubr.f32.gmra.mrb[90].mxu1 %v8585_v11  ;;  %v3567_v11 = vld [vmem:[#allocation2 + $0x1a2] sm:$0xff] }
 0x539   : > { %4922 = vmatprep.mubr.f32.mxu1 %v3502_v57 }
 0x53c   : > { %4923 = vmatmul.mubr.f32.gmra.mrb[92].mxu1 %v6665_v63 }
 0x53d   : > { %4927 = vmatprep.mubr.f32.mxu1 %v3503_v0  ;;  %v5165_v0 = vld [vmem:[%s7227_s24 + $0x38] sm:$0xff] }
 0x540   : > { %4928 = vmatmul.mubr.f32.gmra.mrb[94].mxu1 %v6665_v63 }
 0x541   : > { %5693 = vmatprep.mubr.f32.mxu1 %v8566_v58 }
 0x544   : > { %5694 = vmatmul.mubr.f32.vlgmr.msra.gmra.mrb[96].mxu1 %v8574_v32  ;;  %v5158_v32 = vld [vmem:[%s7227_s24] sm:$0xff] }
 0x545   : > { %5696 = vmatprep.mubr.f32.mxu1 %v8580_v13  ;;  %v8809_v13 = vld [vmem:[#allocation12 + $0x1] ss:$0 sm:$0xff] }
 0x548   : > { %5697 = vmatmul.mubr.f32.gmra.mrb[98].mxu1 %v8590_v23 }
 0x549   : > { %5699 = vmatprep.mubr.f32.mxu1 %v8745_v62 }
 0x54c   : > { %5700 = vmatmul.mubr.f32.gmra.mrb[100].mxu1 %v8750_v2 }
 0x54d   : > { %5702 = vmatprep.mubr.f32.mxu1 %v3566_v49 }
 0x550   : > { %5703 = vmatmul.mubr.f32.gmra.mrb[102].mxu1 %v3567_v11 }
 0x597   : > { %v4774_v18 = vpop.f32.mrb[32].mxu1 }
 0x598   : > { %v5000_v60 = vadd.f32 %v8561_v44, %v4774_v18  ;;  %v4776_v58 = vpop.f32.mrb[33].mxu1 }
 0x59a   : > { %v5190_v23 = vadd.f32 %v5158_v32, %v5000_v60  ;;  %v5166_v60 = vld [vmem:[%s7227_s24 + $0x40] sm:$0xff] }
 0x59b   : > { %v4779_v40 = vpop.f32.mrb[34].mxu1 }
 0x59c   : > { %v5230_v62 = vadd.f32 %v8809_v13, %v5190_v23  ;;  %v5005_v21 = vadd.f32 %v8558_v16, %v4779_v40  ;;  %v4781_v2 = vpop.f32.mrb[35].mxu1 }
 0x59e   : > { %5262 = vst [vmem:[%s7227_s24] sm:$0xff] %v5230_v62  ;;  %v5191_v27 = vadd.f32 %v5159_v30, %v5005_v21  ;;  %v5167_v62 = vld [vmem:[%s7227_s24 + $0x48] sm:$0xff] }
 0x59f   : > { %v4784_v36 = vpop.f32.mrb[36].mxu1 }
 0x5a0   : > { %v5231_v44 = vadd.f32 %v8809_v13, %v5191_v27  ;;  %v5010_v61 = vadd.f32 %v8571_v1, %v4784_v36  ;;  %v4786_v46 = vpop.f32.mrb[37].mxu1  ;;  %v5168_v36 = vld [vmem:[%s7227_s24 + $0x50] sm:$0xff] }
 0x5a2   : > { %5263 = vst [vmem:[%s7227_s24 + $0x8] sm:$0xff] %v5231_v44  ;;  %v5192_v22 = vadd.f32 %v5160_v26, %v5010_v61 }
 0x5a3   : > { %v4789_v48 = vpop.f32.mrb[38].mxu1 }
 0x5a4   : > { %v5232_v16 = vadd.f32 %v8809_v13, %v5192_v22  ;;  %v5015_v54 = vadd.f32 %v8568_v7, %v4789_v48  ;;  %v4791_v59 = vpop.f32.mrb[39].mxu1  ;;  %v5169_v22 = vld [vmem:[%s7227_s24 + $0x58] sm:$0xff] }
 0x5a6   : > { %5264 = vst [vmem:[%s7227_s24 + $0x10] sm:$0xff] %v5232_v16  ;;  %v5193_v37 = vadd.f32 %v5161_v55, %v5015_v54  ;;  %v5170_v55 = vld [vmem:[%s7227_s24 + $0x60] sm:$0xff] }
 0x5a7   : > { %v4794_v52 = vpop.f32.mrb[40].mxu1 }
 0x5a8   : > { %v5233_v1 = vadd.f32 %v8809_v13, %v5193_v37  ;;  %v5020_v17 = vadd.f32 %v8587_v29, %v4794_v52  ;;  %v4796_v19 = vpop.f32.mrb[41].mxu1 }
 0x5a9   : > { %v5171_v19 = vld [vmem:[%s7227_s24 + $0x68] sm:$0xff] }
 0x5aa   : > { %5265 = vst [vmem:[%s7227_s24 + $0x18] sm:$0xff] %v5233_v1  ;;  %v5194_v15 = vadd.f32 %v5162_v4, %v5020_v17 }
 0x5ab   : > { %v4799_v33 = vpop.f32.mrb[42].mxu1 }
 0x5ac   : > { %v5234_v7 = vadd.f32 %v8809_v13, %v5194_v15  ;;  %v5025_v47 = vadd.f32 %v8582_v12, %v4799_v33  ;;  %v4801_v10 = vpop.f32.mrb[43].mxu1 }
 0x5ae   : > { %5266 = vst [vmem:[%s7227_s24 + $0x20] sm:$0xff] %v5234_v7  ;;  %v5195_v51 = vadd.f32 %v5163_v8, %v5025_v47  ;;  %v5172_v47 = vld [vmem:[%s7227_s24 + $0x70] sm:$0xff] }
 0x5af   : > { %v4804_v42 = vpop.f32.mrb[44].mxu1 }
 0x5b0   : > { %v5235_v29 = vadd.f32 %v8809_v13, %v5195_v51  ;;  %v5030_v20 = vadd.f32 %v8596_v53, %v4804_v42  ;;  %v4806_v28 = vpop.f32.mrb[45].mxu1 }
 0x5b2   : > { %5267 = vst [vmem:[%s7227_s24 + $0x28] sm:$0xff] %v5235_v29  ;;  %v5196_v3 = vadd.f32 %v5164_v5, %v5030_v20  ;;  %v5173_v29 = vld [vmem:[%s7227_s24 + $0x78] sm:$0xff] }
 0x5b3   : > { %v4809_v41 = vpop.f32.mrb[46].mxu1 }
 0x5b4   : > { %v5236_v12 = vadd.f32 %v8809_v13, %v5196_v3  ;;  %v5035_v25 = vadd.f32 %v8594_v50, %v4809_v41  ;;  %v4811_v57 = vpop.f32.mrb[47].mxu1  ;;  %v5174_v41 = vld [vmem:[%s7227_s24 + $0x80] sm:$0xff] }
 0x5b6   : > { %5268 = vst [vmem:[%s7227_s24 + $0x30] sm:$0xff] %v5236_v12  ;;  %v5197_v63 = vadd.f32 %v5165_v0, %v5035_v25 }
 0x5b7   : > { %v4814_v49 = vpop.f32.mrb[48].mxu1 }
 0x5b8   : > { %v5237_v53 = vadd.f32 %v8809_v13, %v5197_v63  ;;  %v5040_v11 = vadd.f32 %v8607_v38, %v4814_v49  ;;  %v4816_v18 = vpop.f32.mrb[49].mxu1  ;;  %v5175_v63 = vld [vmem:[%s7227_s24 + $0x88] sm:$0xff] }
 0x5ba   : > { %5269 = vst [vmem:[%s7227_s24 + $0x38] sm:$0xff] %v5237_v53  ;;  %v5198_v58 = vadd.f32 %v5166_v60, %v5040_v11  ;;  %v5176_v60 = vld [vmem:[%s7227_s24 + $0x90] sm:$0xff] }
 0x5bb   : > { %v4819_v32 = vpop.f32.mrb[50].mxu1 }
 0x5bc   : > { %v5238_v50 = vadd.f32 %v8809_v13, %v5198_v58  ;;  %v5045_v23 = vadd.f32 %v8604_v45, %v4819_v32  ;;  %v4821_v40 = vpop.f32.mrb[51].mxu1 }
 0x5bd   : > { %v5177_v40 = vld [vmem:[%s7227_s24 + $0x98] sm:$0xff] }
 0x5be   : > { %5270 = vst [vmem:[%s7227_s24 + $0x40] sm:$0xff] %v5238_v50  ;;  %v5199_v21 = vadd.f32 %v5167_v62, %v5045_v23 }
 0x5bf   : > { %v4824_v2 = vpop.f32.mrb[52].mxu1 }
 0x5c0   : > { %v5239_v38 = vadd.f32 %v8809_v13, %v5199_v21  ;;  %v5050_v30 = vadd.f32 %v8620_v24, %v4824_v2  ;;  %v4826_v27 = vpop.f32.mrb[53].mxu1  ;;  %v9079_v2 = vld [vmem:[#allocation27_spill] sm:$0xff] }
 0x5c1   : > { %v5178_v27 = vld [vmem:[%s7227_s24 + $0xa0] sm:$0xff] }
 0x5c2   : > { %5271 = vst [vmem:[%s7227_s24 + $0x48] sm:$0xff] %v5239_v38  ;;  %v5200_v44 = vadd.f32 %v5168_v36, %v5050_v30 }
 0x5c3   : > { %v4829_v61 = vpop.f32.mrb[54].mxu1 }
 0x5c4   : > { %v5240_v45 = vadd.f32 %v8809_v13, %v5200_v44  ;;  %v5055_v46 = vadd.f32 %v8617_v35, %v4829_v61  ;;  %v4831_v26 = vpop.f32.mrb[55].mxu1  ;;  %v9080_v61 = vld [vmem:[#allocation26_spill] sm:$0xff] }
 0x5c5   : > { %v5179_v26 = vld [vmem:[%s7227_s24 + $0xa8] sm:$0xff] }
 0x5c6   : > { %5272 = vst [vmem:[%s7227_s24 + $0x50] sm:$0xff] %v5240_v45  ;;  %v5201_v48 = vadd.f32 %v5169_v22, %v5055_v46 }
 0x5c7   : > { %v4834_v16 = vpop.f32.mrb[56].mxu1 }
 0x5c8   : > { %v5241_v24 = vadd.f32 %v8809_v13, %v5201_v48  ;;  %v5060_v54 = vadd.f32 %v8632_v43, %v4834_v16  ;;  %v4836_v59 = vpop.f32.mrb[57].mxu1 }
 0x5ca   : > { %5273 = vst [vmem:[%s7227_s24 + $0x58] sm:$0xff] %v5241_v24  ;;  %v5202_v37 = vadd.f32 %v5170_v55, %v5060_v54  ;;  %v9081_v24 = vld [vmem:[#allocation28_spill] sm:$0xff] }
 0x5cb   : > { %v4839_v52 = vpop.f32.mrb[58].mxu1  ;;  %v5180_v55 = vld [vmem:[%s7227_s24 + $0xb0] sm:$0xff] }
 0x5cc   : > { %v5242_v35 = vadd.f32 %v8809_v13, %v5202_v37  ;;  %v5065_v1 = vadd.f32 %v8629_v56, %v4839_v52  ;;  %v4841_v17 = vpop.f32.mrb[59].mxu1 }
 0x5ce   : > { %5274 = vst [vmem:[%s7227_s24 + $0x60] sm:$0xff] %v5242_v35  ;;  %v5203_v4 = vadd.f32 %v5171_v19, %v5065_v1  ;;  %v9082_v1 = vld [vmem:[#allocation18_spill] sm:$0xff] }
 0x5cf   : > { %v4844_v15 = vpop.f32.mrb[60].mxu1 }
 0x5d0   : > { %v5243_v43 = vadd.f32 %v8809_v13, %v5203_v4  ;;  %v5070_v33 = vadd.f32 %v8644_v34, %v4844_v15  ;;  %v4846_v7 = vpop.f32.mrb[61].mxu1  ;;  %v5181_v4 = vld [vmem:[%s7227_s24 + $0xb8] sm:$0xff] }
 0x5d2   : > { %5275 = vst [vmem:[%s7227_s24 + $0x68] sm:$0xff] %v5243_v43  ;;  %v5204_v10 = vadd.f32 %v5172_v47, %v5070_v33 }
 0x5d3   : > { %v4849_v8 = vpop.f32.mrb[62].mxu1 }
 0x5d4   : > { %v5244_v56 = vadd.f32 %v8809_v13, %v5204_v10  ;;  %v5075_v51 = vadd.f32 %v8641_v39, %v4849_v8  ;;  %v4851_v42 = vpop.f32.mrb[63].mxu1 }
 0x5d6   : > { %5276 = vst [vmem:[%s7227_s24 + $0x70] sm:$0xff] %v5244_v56  ;;  %v5205_v20 = vadd.f32 %v5173_v29, %v5075_v51 }
 0x5d7   : > { %v4854_v28 = vpop.f32.mrb[64].mxu1 }
 0x5d8   : > { %v5245_v34 = vadd.f32 %v8809_v13, %v5205_v20  ;;  %v5080_v5 = vadd.f32 %v8656_v6, %v4854_v28  ;;  %v4856_v3 = vpop.f32.mrb[65].mxu1 }
 0x5da   : > { %5277 = vst [vmem:[%s7227_s24 + $0x78] sm:$0xff] %v5245_v34  ;;  %v5206_v12 = vadd.f32 %v5174_v41, %v5080_v5 }
 0x5db   : > { %v4859_v25 = vpop.f32.mrb[66].mxu1 }
 0x5dc   : > { %v5246_v39 = vadd.f32 %v8809_v13, %v5206_v12  ;;  %v5085_v57 = vadd.f32 %v8653_v31, %v4859_v25  ;;  %v4861_v0 = vpop.f32.mrb[67].mxu1 }
 0x5dd   : > { %v5183_v0 = vld [vmem:[%s7227_s24 + $0xc8] sm:$0xff] }
 0x5de   : > { %5278 = vst [vmem:[%s7227_s24 + $0x80] sm:$0xff] %v5246_v39  ;;  %v5207_v49 = vadd.f32 %v5175_v63, %v5085_v57 }
 0x5df   : > { %v4864_v53 = vpop.f32.mrb[68].mxu1 }
 0x5e0   : > { %v5247_v6 = vadd.f32 %v8809_v13, %v5207_v49  ;;  %v5090_v11 = vadd.f32 %v8668_v14, %v4864_v53  ;;  %v4866_v18 = vpop.f32.mrb[69].mxu1  ;;  %v5182_v53 = vld [vmem:[%s7227_s24 + $0xc0] sm:$0xff] }
 0x5e2   : > { %5279 = vst [vmem:[%s7227_s24 + $0x88] sm:$0xff] %v5247_v6  ;;  %v5208_v58 = vadd.f32 %v5176_v60, %v5090_v11 }
 0x5e3   : > { %v4869_v32 = vpop.f32.mrb[70].mxu1 }
 0x5e4   : > { %v5248_v31 = vadd.f32 %v8809_v13, %v5208_v58  ;;  %v5095_v50 = vadd.f32 %v8665_v9, %v4869_v32  ;;  %v4871_v23 = vpop.f32.mrb[71].mxu1 }
 0x5e6   : > { %5280 = vst [vmem:[%s7227_s24 + $0x90] sm:$0xff] %v5248_v31  ;;  %v5209_v62 = vadd.f32 %v5177_v40, %v5095_v50  ;;  %v5185_v31 = vld [vmem:[%s7227_s24 + $0xd8] sm:$0xff]  ;;  %v5184_v40 = vld [vmem:[%s7227_s24 + $0xd0] sm:$0xff] }
 0x5e7   : > { %v4874_v21 = vpop.f32.mrb[72].mxu1 }
 0x5e8   : > { %v5249_v14 = vadd.f32 %v8809_v13, %v5209_v62  ;;  %v5100_v38 = vadd.f32 %v9079_v2, %v4874_v21  ;;  %v4876_v30 = vpop.f32.mrb[73].mxu1 }
 0x5ea   : > { %5281 = vst [vmem:[%s7227_s24 + $0x98] sm:$0xff] %v5249_v14  ;;  %v5210_v36 = vadd.f32 %v5178_v27, %v5100_v38  ;;  %v5187_v27 = vld [vmem:[%s7227_s24 + $0xe8] sm:$0xff] }
 0x5eb   : > { %v4879_v44 = vpop.f32.mrb[74].mxu1 }
 0x5ec   : > { %v5250_v9 = vadd.f32 %v8809_v13, %v5210_v36  ;;  %v5105_v45 = vadd.f32 %v9080_v61, %v4879_v44  ;;  %v4881_v46 = vpop.f32.mrb[75].mxu1 }
 0x5ee   : > { %5282 = vst [vmem:[%s7227_s24 + $0xa0] sm:$0xff] %v5250_v9  ;;  %v5211_v22 = vadd.f32 %v5179_v26, %v5105_v45  ;;  %v5186_v9 = vld [vmem:[%s7227_s24 + $0xe0] sm:$0xff] }
 0x5ef   : > { %v4884_v48 = vpop.f32.mrb[76].mxu1 }
 0x5f0   : > { %v5251_v16 = vadd.f32 %v8809_v13, %v5211_v22  ;;  %v5110_v54 = vadd.f32 %v9081_v24, %v4884_v48  ;;  %v4886_v59 = vpop.f32.mrb[77].mxu1 }
 0x5f1   : > { %v5188_v59 = vld [vmem:[%s7227_s24 + $0xf0] sm:$0xff] }
 0x5f2   : > { %5283 = vst [vmem:[%s7227_s24 + $0xa8] sm:$0xff] %v5251_v16  ;;  %v5212_v37 = vadd.f32 %v5180_v55, %v5110_v54  ;;  %v5189_v16 = vld [vmem:[%s7227_s24 + $0xf8] sm:$0xff] }
 0x5f3   : > { %v4889_v52 = vpop.f32.mrb[78].mxu1 }
 0x5f4   : > { %v5252_v35 = vadd.f32 %v8809_v13, %v5212_v37  ;;  %v5115_v17 = vadd.f32 %v9082_v1, %v4889_v52  ;;  %v4891_v19 = vpop.f32.mrb[79].mxu1 }
 0x5f6   : > { %5284 = vst [vmem:[%s7227_s24 + $0xb0] sm:$0xff] %v5252_v35  ;;  %v5213_v15 = vadd.f32 %v5181_v4, %v5115_v17 }
 0x5f7   : > { %v4894_v43 = vpop.f32.mrb[80].mxu1 }
 0x5f8   : > { %v5253_v33 = vadd.f32 %v8809_v13, %v5213_v15  ;;  %v4896_v7 = vpop.f32.mrb[81].mxu1 }
 0x5fa   : > { %5285 = vst [vmem:[%s7227_s24 + $0xb8] sm:$0xff] %v5253_v33 }
 0x5fb   : > { %v4899_v47 = vpop.f32.mrb[82].mxu1 }
 0x5fc   : > { %v4901_v10 = vpop.f32.mrb[83].mxu1 }
 0x5ff   : > { %v4904_v8 = vpop.f32.mrb[84].mxu1 }
 0x600   : > { %v4906_v56 = vpop.f32.mrb[85].mxu1 }
 0x603   : > { %v4909_v51 = vpop.f32.mrb[86].mxu1 }
 0x604   : > { %v4911_v42 = vpop.f32.mrb[87].mxu1 }
 0x607   : > { %v4914_v29 = vpop.f32.mrb[88].mxu1 }
 0x608   : > { %v4916_v20 = vpop.f32.mrb[89].mxu1 }
 0x60b   : > { %v4919_v28 = vpop.f32.mrb[90].mxu1 }
 0x60c   : > { %v4921_v34 = vpop.f32.mrb[91].mxu1 }
 0x60f   : > { %v4924_v5 = vpop.f32.mrb[92].mxu1 }
 0x610   : > { %v4926_v3 = vpop.f32.mrb[93].mxu1 }
 0x613   : > { %v4929_v41 = vpop.f32.mrb[94].mxu1 }
 0x614   : > { %v4931_v12 = vpop.f32.mrb[95].mxu1 }
 0x617   : > { %v5695_v25 = vpop.f32.mrb[96].mxu1 }
 0x618   : > { %v5125_v39 = vadd.f32 %v5695_v25, %v4899_v47  ;;  %v5119_v57 = vpop.f32.mrb[97].mxu1 }
 0x619   : > { %v5120_v63 = vadd.f32 %v5119_v57, %v4894_v43 }
 0x61a   : > { %v5215_v49 = vadd.f32 %v5183_v0, %v5125_v39 }
 0x61b   : > { %v5214_v6 = vadd.f32 %v5182_v53, %v5120_v63  ;;  %v5698_v11 = vpop.f32.mrb[98].mxu1 }
 0x61c   : > { %v5255_v18 = vadd.f32 %v8809_v13, %v5215_v49  ;;  %v5135_v60 = vadd.f32 %v5698_v11, %v4909_v51  ;;  %v5129_v58 = vpop.f32.mrb[99].mxu1 }
 0x61d   : > { %v5254_v32 = vadd.f32 %v8809_v13, %v5214_v6  ;;  %v5130_v50 = vadd.f32 %v5129_v58, %v4904_v8 }
 0x61e   : > { %5287 = vst [vmem:[%s7227_s24 + $0xc8] sm:$0xff] %v5255_v18  ;;  %v5217_v23 = vadd.f32 %v5185_v31, %v5135_v60 }
 0x61f   : > { %5286 = vst [vmem:[%s7227_s24 + $0xc0] sm:$0xff] %v5254_v32  ;;  %v5216_v62 = vadd.f32 %v5184_v40, %v5130_v50  ;;  %v5701_v21 = vpop.f32.mrb[100].mxu1 }
 0x620   : > { %v5257_v14 = vadd.f32 %v8809_v13, %v5217_v23  ;;  %v5145_v2 = vadd.f32 %v5701_v21, %v4919_v28  ;;  %v5139_v38 = vpop.f32.mrb[101].mxu1 }
 0x621   : > { %v5256_v30 = vadd.f32 %v8809_v13, %v5216_v62  ;;  %v5140_v36 = vadd.f32 %v5139_v38, %v4914_v29 }
 0x622   : > { %5289 = vst [vmem:[%s7227_s24 + $0xd8] sm:$0xff] %v5257_v14  ;;  %v5219_v44 = vadd.f32 %v5187_v27, %v5145_v2 }
 0x623   : > { %5288 = vst [vmem:[%s7227_s24 + $0xd0] sm:$0xff] %v5256_v30  ;;  %v5218_v61 = vadd.f32 %v5186_v9, %v5140_v36  ;;  %v5704_v45 = vpop.f32.mrb[102].mxu1 }
 0x624   : > { %v5259_v46 = vadd.f32 %v8809_v13, %v5219_v44  ;;  %v5155_v26 = vadd.f32 %v5704_v45, %v4929_v41  ;;  %v5149_v22 = vpop.f32.mrb[103].mxu1 }
 0x625   : > { %v5258_v48 = vadd.f32 %v8809_v13, %v5218_v61  ;;  %v5150_v24 = vadd.f32 %v5149_v22, %v4924_v5 }
 0x626   : > { %5291 = vst [vmem:[%s7227_s24 + $0xe8] sm:$0xff] %v5259_v46  ;;  %v5221_v54 = vadd.f32 %v5189_v16, %v5155_v26 }
 0x627   : > { %5290 = vst [vmem:[%s7227_s24 + $0xe0] sm:$0xff] %v5258_v48  ;;  %v5220_v55 = vadd.f32 %v5188_v59, %v5150_v24 }
 0x628   : > { %v5261_v37 = vadd.f32 %v8809_v13, %v5221_v54 }
 0x629   : > { %v5260_v52 = vadd.f32 %v8809_v13, %v5220_v55 }
 0x62a   : > { %5293 = vst [vmem:[%s7227_s24 + $0xf8] sm:$0xff] %v5261_v37 }
 0x62b   : > { %5292 = vst [vmem:[%s7227_s24 + $0xf0] sm:$0xff] %v5260_v52 }
 0x62c   : > { %6821 = shalt.err (!%p6818_p13)
}
 0x62d   : > { %s6822_s10 = scalar_lea.hbm %s8931_s7, 4096  ;;  %s6826_s9 = scalar_lea.hbm %s8985_s5, 8192 }
 0x62e   : > { %p6823_p9 = scmp.ne.s32.totalorder %s8931_s7, %s6822_s10  ;;  %p6827_p6 = scmp.lt.u32.totalorder %s8931_s7, %s8985_s5 }
 0x62f   : > { %p6828_p4 = scmp.lt.u32.totalorder %s6826_s9, %s6822_s10  ;;  %p6830_p10 = scmp.lt.u32.totalorder %s6822_s10, %s8931_s7 }
 0x630   : > { %p6824_p0 = pnand %p6823_p9, %p7106_p3 }
 0x631   : > { %p6829_p8 = por %p6828_p4, %p6827_p6 }
 0x632   : > { %p6825_p11 = pneg %p6824_p0 }
 0x633   : > { %p6831_p5 = por %p6830_p10, %p6829_p8 }
 0x635   : > { %p6832_p7 = pnand %p6831_p5, %p6825_p11 }
 0x637   : > { %6835 = shalt.err (!%p6832_p7)
}
 0x638   : > { %s6896_s26 = smov 128   ;;  %s6897_s15 = smov 8  }
 0x639   : > { %6571 = dma.vmem_to_hbm [thread:$0]  (%p7106_p3), %s8933_s14, 4096, %s8931_s7, %s5295_s22, %s6896_s26, %s6896_s26, %s6897_s15  }
 0x63a PF: > { %s5323_s6 = sand.u32 1, %s6870_s18   ;;  %p9083_p12 = scmp.ne.s32.totalorder %s9027_s25, 0 }
 0x63b   : > { %p9084_p1 = scmp.ge.s32.totalorder %s6882_s21, 2  ;;  %s5324_s8 = scalar_lea.sflag [#allocation6], %s5323_s6 }
 0x63d   : > { %p6591_p2 = pnand %p9084_p1, %p9083_p12 }
 0x63f   : > { %6865 = dma.done.wait (!%p6591_p2), %s5324_s8, 4096  }
 0x640   : > { %6867 = vsyncadd (!%p6591_p2), %s5324_s8, 4294963200  ;;  %p20_p13 = scmp.ge.s32.totalorder %s7093_s29, 4   ;;  %s9085_s18 = smov %s6874_s19 }
 0x641   : > { %s9086_s19 = smov %s6878_s20  ;;  %s9087_s20 = smov %s7102_s11 }
 0x642   : > { %s9088_s21 = smov %s7093_s29  ;;  %22 = sbr.rel (!%p20_p13) target bundleno = 7 (0x7), region = 108 }
 0x649   :  { %5329 = vsyncpa [#allocation5], 1 }
 0x64a   :  { %5331 = vsyncpa [#allocation5 + $0x1], 1 }
 0x64b   :  { %5332 = vsyncpa [#allocation8], 1 }
 0x64c   :  { %5333 = vsyncpa [#allocation11], 1 }
 0x64d   :  { %5334 = vsyncpa [#allocation6], 1 }
 0x64e   :  { %5336 = vsyncpa [#allocation6 + $0x1], 1 }

</bundles_post_ra>
